<compile_context>
chip_gen: v6e
topology: v6e:2x2x1
jax: 0.10.0
libtpu: 0.0.40
codegen_flags: <defaults>
</compile_context>

<pallas_src>
import jax
import jax.numpy as jnp
from jax.experimental import pallas as pl
from jax.experimental.pallas import tpu as pltpu  # noqa: F401  (TPU backend)


# --------------------------------------------------------------------------- #
# Pallas kernels
# --------------------------------------------------------------------------- #
def _gemm_bias_tanh_pool_kernel(p00_ref, p01_ref, p10_ref, p11_ref,
                                w_ref, b_ref, o_ref):
    """out = mean_{4 pool phases} tanh(P_phase @ W + b)  (conv+tanh+avgpool2)."""
    w = w_ref[...]
    b = b_ref[...]
    acc = jnp.tanh(jnp.dot(p00_ref[...], w, preferred_element_type=jnp.float32) + b)
    acc = acc + jnp.tanh(jnp.dot(p01_ref[...], w, preferred_element_type=jnp.float32) + b)
    acc = acc + jnp.tanh(jnp.dot(p10_ref[...], w, preferred_element_type=jnp.float32) + b)
    acc = acc + jnp.tanh(jnp.dot(p11_ref[...], w, preferred_element_type=jnp.float32) + b)
    o_ref[...] = (0.25 * acc).astype(o_ref.dtype)


def _gemm_bias_tanh_kernel(p_ref, w_ref, b_ref, o_ref):
    """out = tanh(P @ W + b)  (conv + tanh, no pooling)."""
    acc = jnp.dot(p_ref[...], w_ref[...], preferred_element_type=jnp.float32)
    o_ref[...] = jnp.tanh(acc + b_ref[...]).astype(o_ref.dtype)


def _full_spec(shape):
    # Block == full array: satisfies the (8,128) rule regardless of shape.
    return pl.BlockSpec(shape, lambda i: (0,) * len(shape))


def _conv_tanh_pool_gemm(p00, p01, p10, p11, w_gemm, b_row):
    m, k = p00.shape
    cout = w_gemm.shape[1]
    return pl.pallas_call(
        _gemm_bias_tanh_pool_kernel,
        out_shape=jax.ShapeDtypeStruct((m, cout), p00.dtype),
        grid=(1,),
        in_specs=[_full_spec((m, k)), _full_spec((m, k)),
                  _full_spec((m, k)), _full_spec((m, k)),
                  _full_spec((k, cout)), _full_spec((1, cout))],
        out_specs=_full_spec((m, cout)),
    )(p00, p01, p10, p11, w_gemm, b_row)


def _conv_tanh_gemm(p, w_gemm, b_row):
    m, k = p.shape
    cout = w_gemm.shape[1]
    return pl.pallas_call(
        _gemm_bias_tanh_kernel,
        out_shape=jax.ShapeDtypeStruct((m, cout), p.dtype),
        grid=(1,),
        in_specs=[_full_spec((m, k)), _full_spec((k, cout)), _full_spec((1, cout))],
        out_specs=_full_spec((m, cout)),
    )(p, w_gemm, b_row)


# --------------------------------------------------------------------------- #
# Wrapper-side layout plumbing (im2col patches, feature order = (dy, dx, cin))
# --------------------------------------------------------------------------- #
def _patches(x_nhwc, ksize, out_h, out_w, oy, ox, stride):
    """im2col patches for conv output positions (stride*i+oy, stride*j+ox).

    Returns [N*out_h*out_w, ksize*ksize*C], feature order (dy, dx, c).
    """
    n, _, _, c = x_nhwc.shape
    cols = []
    for dy in range(ksize):
        for dx in range(ksize):
            sl = jax.lax.slice(
                x_nhwc,
                (0, oy + dy, ox + dx, 0),
                (n, oy + dy + (out_h - 1) * stride + 1,
                 ox + dx + (out_w - 1) * stride + 1, c),
                (1, stride, stride, 1))
            cols.append(sl)                      # [N, out_h, out_w, C]
    patches = jnp.stack(cols, axis=3)            # [N, out_h, out_w, k*k, C]
    return patches.reshape(n * out_h * out_w, ksize * ksize * c)


def _w_gemm(w_oihw):
    """[Cout, Cin, kh, kw] -> [kh*kw*Cin, Cout] matching (dy, dx, cin) order."""
    cout, cin, kh, kw = w_oihw.shape
    return jnp.transpose(w_oihw, (2, 3, 1, 0)).reshape(kh * kw * cin, cout)


def features3_forward(x, params, padding):
    """x: [N, 1, H, W] (NCHW, like PyTorch). Returns [N, 120, H', W']."""
    (w1, b1), (w2, b2), (w3, b3) = params
    n = x.shape[0]

    x_nhwc = jnp.transpose(x, (0, 2, 3, 1))
    xp = jnp.pad(x_nhwc, ((0, 0), (padding, padding), (padding, padding), (0, 0)))

    # ---- conv1 (1->6, k=5, pad) + tanh, fused 2x2 avg-pool ----
    hp, wp = xp.shape[1], xp.shape[2]
    oh1, ow1 = (hp - 4) // 2, (wp - 4) // 2
    p = [_patches(xp, 5, oh1, ow1, py, px, 2) for py in (0, 1) for px in (0, 1)]
    h1 = _conv_tanh_pool_gemm(p[0], p[1], p[2], p[3], _w_gemm(w1), b1.reshape(1, -1))
    h1 = h1.reshape(n, oh1, ow1, 6)

    # ---- conv2 (6->16, k=5) + tanh, fused 2x2 avg-pool ----
    oh2, ow2 = (oh1 - 4) // 2, (ow1 - 4) // 2
    p = [_patches(h1, 5, oh2, ow2, py, px, 2) for py in (0, 1) for px in (0, 1)]
    h2 = _conv_tanh_pool_gemm(p[0], p[1], p[2], p[3], _w_gemm(w2), b2.reshape(1, -1))
    h2 = h2.reshape(n, oh2, ow2, 16)

    # ---- conv3 (16->120, k=5) + tanh ----
    oh3, ow3 = oh2 - 4, ow2 - 4
    p3 = _patches(h2, 5, oh3, ow3, 0, 0, 1)
    h3 = _conv_tanh_gemm(p3, _w_gemm(w3), b3.reshape(1, -1))
    return jnp.transpose(h3.reshape(n, oh3, ow3, 120), (0, 3, 1, 2))


# --------------------------------------------------------------------------- #
# Parameter init (PyTorch Conv2d-style uniform) and pure-JAX reference
# --------------------------------------------------------------------------- #
def init_features3_params(key):
    def conv_init(k, cout, cin, ksz):
        fan_in = cin * ksz * ksz
        bound = 1.0 / (fan_in ** 0.5)
        kw_, kb_ = jax.random.split(k)
        w = jax.random.uniform(kw_, (cout, cin, ksz, ksz), jnp.float32, -bound, bound)
        b = jax.random.uniform(kb_, (cout,), jnp.float32, -bound, bound)
        return w, b

    k1, k2, k3 = jax.random.split(key, 3)
    return (conv_init(k1, 6, 1, 5), conv_init(k2, 16, 6, 5), conv_init(k3, 120, 16, 5))


def _ref_features3(x, params, padding):
    (w1, b1), (w2, b2), (w3, b3) = params

    def conv(z, w, b, pad):
        y = jax.lax.conv_general_dilated(
            z, w, window_strides=(1, 1), padding=((pad, pad), (pad, pad)),
            dimension_numbers=("NCHW", "OIHW", "NCHW"),
            precision=jax.lax.Precision.HIGHEST)
        return jnp.tanh(y + b.reshape(1, -1, 1, 1))

    def pool(z):
        n, c, h, w_ = z.shape
        return z.reshape(n, c, h // 2, 2, w_ // 2, 2).mean(axis=(3, 5))

    o2 = pool(conv(x, w1, b1, padding))
    o4 = pool(conv(o2, w2, b2, 0))
    return conv(o4, w3, b3, 0)


# --------------------------------------------------------------------------- #
if __name__ == "__main__":
    key = jax.random.PRNGKey(0)
    kx, kp = jax.random.split(key)

    padding = 2
    x = jax.random.normal(kx, (2, 1, 28, 28), dtype=jnp.float32)  # [N,1,H,W]
    params = init_features3_params(kp)

    fwd = jax.jit(lambda inp: features3_forward(inp, params, padding))
    out = jax.block_until_ready(fwd(x))

    ref = jax.block_until_ready(_ref_features3(x, params, padding))
    assert out.shape == (2, 120, 1, 1) and out.dtype == jnp.float32
    # Tolerant threshold: absorbs MXU f32-pass vs XLA-conv accumulation-order
    # differences; outputs are O(1) post-tanh so this is still a strong
    # structural check on patch ordering / weight layout.
    assert jnp.allclose(out, ref, atol=1e-2, rtol=1e-2), float(jnp.max(jnp.abs(out - ref)))

    print("KERNEL_OK")
</pallas_src>

<mosaic_0001>
module attributes {stable_mosaic.version = 11 : i64} {
  func.func @_gemm_bias_tanh_pool_kernel(%arg0: i32, %arg1: memref<392x25xf32, #tpu.memory_space<vmem>>, %arg2: memref<392x25xf32, #tpu.memory_space<vmem>>, %arg3: memref<392x25xf32, #tpu.memory_space<vmem>>, %arg4: memref<392x25xf32, #tpu.memory_space<vmem>>, %arg5: memref<25x6xf32, #tpu.memory_space<vmem>>, %arg6: memref<1x6xf32, #tpu.memory_space<vmem>>, %arg7: memref<392x6xf32, #tpu.memory_space<vmem>>) attributes {dimension_semantics = [#tpu.dimension_semantics<arbitrary>], iteration_bounds = array<i64: 1>, scalar_prefetch = 0 : i64, scratch_operands = 0 : i64, tpu.core_type = #tpu.core_type<tc>, window_params = [{pipeline_mode = #tpu.pipeline_mode<synchronous>, transform_indices = @transform_0, window_bounds = array<i64: 392, 25>}, {pipeline_mode = #tpu.pipeline_mode<synchronous>, transform_indices = @transform_1, window_bounds = array<i64: 392, 25>}, {pipeline_mode = #tpu.pipeline_mode<synchronous>, transform_indices = @transform_2, window_bounds = array<i64: 392, 25>}, {pipeline_mode = #tpu.pipeline_mode<synchronous>, transform_indices = @transform_3, window_bounds = array<i64: 392, 25>}, {pipeline_mode = #tpu.pipeline_mode<synchronous>, transform_indices = @transform_4, window_bounds = array<i64: 25, 6>}, {pipeline_mode = #tpu.pipeline_mode<synchronous>, transform_indices = @transform_5, window_bounds = array<i64: 1, 6>}, {pipeline_mode = #tpu.pipeline_mode<synchronous>, transform_indices = @transform_6, window_bounds = array<i64: 392, 6>}]} {
    %c0 = arith.constant 0 : index
    %c0_0 = arith.constant 0 : index
    %0 = vector.load %arg5[%c0, %c0_0] : memref<25x6xf32, #tpu.memory_space<vmem>>, vector<25x6xf32>
    %c0_1 = arith.constant 0 : index
    %c0_2 = arith.constant 0 : index
    %1 = vector.load %arg6[%c0_1, %c0_2] : memref<1x6xf32, #tpu.memory_space<vmem>>, vector<1x6xf32>
    %c0_3 = arith.constant 0 : index
    %c0_4 = arith.constant 0 : index
    %2 = vector.load %arg1[%c0_3, %c0_4] : memref<392x25xf32, #tpu.memory_space<vmem>>, vector<392x25xf32>
    %cst = arith.constant dense<0.000000e+00> : vector<392x6xf32>
    %3 = tpu.matmul %2, %0, %cst {dimension_numbers = #tpu.dot_dimension_numbers<[1], [0], [0], [1], [0, 0, 1, 1], [], []>} : vector<392x25xf32>, vector<25x6xf32>, vector<392x6xf32> -> vector<392x6xf32>
    %4 = vector.broadcast %1 : vector<1x6xf32> to vector<392x6xf32>
    %5 = arith.addf %3, %4 : vector<392x6xf32>
    %6 = math.tanh %5 : vector<392x6xf32>
    %c0_5 = arith.constant 0 : index
    %c0_6 = arith.constant 0 : index
    %7 = vector.load %arg2[%c0_5, %c0_6] : memref<392x25xf32, #tpu.memory_space<vmem>>, vector<392x25xf32>
    %cst_7 = arith.constant dense<0.000000e+00> : vector<392x6xf32>
    %8 = tpu.matmul %7, %0, %cst_7 {dimension_numbers = #tpu.dot_dimension_numbers<[1], [0], [0], [1], [0, 0, 1, 1], [], []>} : vector<392x25xf32>, vector<25x6xf32>, vector<392x6xf32> -> vector<392x6xf32>
    %9 = vector.broadcast %1 : vector<1x6xf32> to vector<392x6xf32>
    %10 = arith.addf %8, %9 : vector<392x6xf32>
    %11 = math.tanh %10 : vector<392x6xf32>
    %12 = arith.addf %6, %11 : vector<392x6xf32>
    %c0_8 = arith.constant 0 : index
    %c0_9 = arith.constant 0 : index
    %13 = vector.load %arg3[%c0_8, %c0_9] : memref<392x25xf32, #tpu.memory_space<vmem>>, vector<392x25xf32>
    %cst_10 = arith.constant dense<0.000000e+00> : vector<392x6xf32>
    %14 = tpu.matmul %13, %0, %cst_10 {dimension_numbers = #tpu.dot_dimension_numbers<[1], [0], [0], [1], [0, 0, 1, 1], [], []>} : vector<392x25xf32>, vector<25x6xf32>, vector<392x6xf32> -> vector<392x6xf32>
    %15 = vector.broadcast %1 : vector<1x6xf32> to vector<392x6xf32>
    %16 = arith.addf %14, %15 : vector<392x6xf32>
    %17 = math.tanh %16 : vector<392x6xf32>
    %18 = arith.addf %12, %17 : vector<392x6xf32>
    %c0_11 = arith.constant 0 : index
    %c0_12 = arith.constant 0 : index
    %19 = vector.load %arg4[%c0_11, %c0_12] : memref<392x25xf32, #tpu.memory_space<vmem>>, vector<392x25xf32>
    %cst_13 = arith.constant dense<0.000000e+00> : vector<392x6xf32>
    %20 = tpu.matmul %19, %0, %cst_13 {dimension_numbers = #tpu.dot_dimension_numbers<[1], [0], [0], [1], [0, 0, 1, 1], [], []>} : vector<392x25xf32>, vector<25x6xf32>, vector<392x6xf32> -> vector<392x6xf32>
    %21 = vector.broadcast %1 : vector<1x6xf32> to vector<392x6xf32>
    %22 = arith.addf %20, %21 : vector<392x6xf32>
    %23 = math.tanh %22 : vector<392x6xf32>
    %24 = arith.addf %18, %23 : vector<392x6xf32>
    %cst_14 = arith.constant 2.500000e-01 : f32
    %25 = vector.broadcast %cst_14 : f32 to vector<392x6xf32>
    %26 = arith.mulf %25, %24 : vector<392x6xf32>
    %c0_15 = arith.constant 0 : index
    %c0_16 = arith.constant 0 : index
    %27 = vector.load %arg7[%c0_15, %c0_16] : memref<392x6xf32, #tpu.memory_space<vmem>>, vector<392x6xf32>
    tpu.vector_store %arg7[%c0_15, %c0_16], %26 {strides = array<i32>} : memref<392x6xf32, #tpu.memory_space<vmem>>, vector<392x6xf32>,
    return
  }
  func.func @transform_0(%arg0: i32) -> (i32, i32) {
    %c0_i32 = arith.constant 0 : i32
    %c0_i32_0 = arith.constant 0 : i32
    %c0_i32_1 = arith.constant 0 : i32
    return %c0_i32, %c0_i32_0 : i32, i32
  }
  func.func @transform_1(%arg0: i32) -> (i32, i32) {
    %c0_i32 = arith.constant 0 : i32
    %c0_i32_0 = arith.constant 0 : i32
    %c0_i32_1 = arith.constant 0 : i32
    return %c0_i32, %c0_i32_0 : i32, i32
  }
  func.func @transform_2(%arg0: i32) -> (i32, i32) {
    %c0_i32 = arith.constant 0 : i32
    %c0_i32_0 = arith.constant 0 : i32
    %c0_i32_1 = arith.constant 0 : i32
    return %c0_i32, %c0_i32_0 : i32, i32
  }
  func.func @transform_3(%arg0: i32) -> (i32, i32) {
    %c0_i32 = arith.constant 0 : i32
    %c0_i32_0 = arith.constant 0 : i32
    %c0_i32_1 = arith.constant 0 : i32
    return %c0_i32, %c0_i32_0 : i32, i32
  }
  func.func @transform_4(%arg0: i32) -> (i32, i32) {
    %c0_i32 = arith.constant 0 : i32
    %c0_i32_0 = arith.constant 0 : i32
    %c0_i32_1 = arith.constant 0 : i32
    return %c0_i32, %c0_i32_0 : i32, i32
  }
  func.func @transform_5(%arg0: i32) -> (i32, i32) {
    %c0_i32 = arith.constant 0 : i32
    %c0_i32_0 = arith.constant 0 : i32
    %c0_i32_1 = arith.constant 0 : i32
    return %c0_i32, %c0_i32_0 : i32, i32
  }
  func.func @transform_6(%arg0: i32) -> (i32, i32) {
    %c0_i32 = arith.constant 0 : i32
    %c0_i32_0 = arith.constant 0 : i32
    %c0_i32_1 = arith.constant 0 : i32
    return %c0_i32, %c0_i32_0 : i32, i32
  }
}

module attributes {stable_mosaic.version = 11 : i64} {
  func.func @_gemm_bias_tanh_pool_kernel(%arg0: i32, %arg1: memref<50x150xf32, #tpu.memory_space<vmem>>, %arg2: memref<50x150xf32, #tpu.memory_space<vmem>>, %arg3: memref<50x150xf32, #tpu.memory_space<vmem>>, %arg4: memref<50x150xf32, #tpu.memory_space<vmem>>, %arg5: memref<150x16xf32, #tpu.memory_space<vmem>>, %arg6: memref<1x16xf32, #tpu.memory_space<vmem>>, %arg7: memref<50x16xf32, #tpu.memory_space<vmem>>) attributes {dimension_semantics = [#tpu.dimension_semantics<arbitrary>], iteration_bounds = array<i64: 1>, scalar_prefetch = 0 : i64, scratch_operands = 0 : i64, tpu.core_type = #tpu.core_type<tc>, window_params = [{pipeline_mode = #tpu.pipeline_mode<synchronous>, transform_indices = @transform_0, window_bounds = array<i64: 50, 150>}, {pipeline_mode = #tpu.pipeline_mode<synchronous>, transform_indices = @transform_1, window_bounds = array<i64: 50, 150>}, {pipeline_mode = #tpu.pipeline_mode<synchronous>, transform_indices = @transform_2, window_bounds = array<i64: 50, 150>}, {pipeline_mode = #tpu.pipeline_mode<synchronous>, transform_indices = @transform_3, window_bounds = array<i64: 50, 150>}, {pipeline_mode = #tpu.pipeline_mode<synchronous>, transform_indices = @transform_4, window_bounds = array<i64: 150, 16>}, {pipeline_mode = #tpu.pipeline_mode<synchronous>, transform_indices = @transform_5, window_bounds = array<i64: 1, 16>}, {pipeline_mode = #tpu.pipeline_mode<synchronous>, transform_indices = @transform_6, window_bounds = array<i64: 50, 16>}]} {
    %c0 = arith.constant 0 : index
    %c0_0 = arith.constant 0 : index
    %0 = vector.load %arg5[%c0, %c0_0] : memref<150x16xf32, #tpu.memory_space<vmem>>, vector<150x16xf32>
    %c0_1 = arith.constant 0 : index
    %c0_2 = arith.constant 0 : index
    %1 = vector.load %arg6[%c0_1, %c0_2] : memref<1x16xf32, #tpu.memory_space<vmem>>, vector<1x16xf32>
    %c0_3 = arith.constant 0 : index
    %c0_4 = arith.constant 0 : index
    %2 = vector.load %arg1[%c0_3, %c0_4] : memref<50x150xf32, #tpu.memory_space<vmem>>, vector<50x150xf32>
    %cst = arith.constant dense<0.000000e+00> : vector<50x16xf32>
    %3 = tpu.matmul %2, %0, %cst {dimension_numbers = #tpu.dot_dimension_numbers<[1], [0], [0], [1], [0, 0, 1, 1], [], []>} : vector<50x150xf32>, vector<150x16xf32>, vector<50x16xf32> -> vector<50x16xf32>
    %4 = vector.broadcast %1 : vector<1x16xf32> to vector<50x16xf32>
    %5 = arith.addf %3, %4 : vector<50x16xf32>
    %6 = math.tanh %5 : vector<50x16xf32>
    %c0_5 = arith.constant 0 : index
    %c0_6 = arith.constant 0 : index
    %7 = vector.load %arg2[%c0_5, %c0_6] : memref<50x150xf32, #tpu.memory_space<vmem>>, vector<50x150xf32>
    %cst_7 = arith.constant dense<0.000000e+00> : vector<50x16xf32>
    %8 = tpu.matmul %7, %0, %cst_7 {dimension_numbers = #tpu.dot_dimension_numbers<[1], [0], [0], [1], [0, 0, 1, 1], [], []>} : vector<50x150xf32>, vector<150x16xf32>, vector<50x16xf32> -> vector<50x16xf32>
    %9 = vector.broadcast %1 : vector<1x16xf32> to vector<50x16xf32>
    %10 = arith.addf %8, %9 : vector<50x16xf32>
    %11 = math.tanh %10 : vector<50x16xf32>
    %12 = arith.addf %6, %11 : vector<50x16xf32>
    %c0_8 = arith.constant 0 : index
    %c0_9 = arith.constant 0 : index
    %13 = vector.load %arg3[%c0_8, %c0_9] : memref<50x150xf32, #tpu.memory_space<vmem>>, vector<50x150xf32>
    %cst_10 = arith.constant dense<0.000000e+00> : vector<50x16xf32>
    %14 = tpu.matmul %13, %0, %cst_10 {dimension_numbers = #tpu.dot_dimension_numbers<[1], [0], [0], [1], [0, 0, 1, 1], [], []>} : vector<50x150xf32>, vector<150x16xf32>, vector<50x16xf32> -> vector<50x16xf32>
    %15 = vector.broadcast %1 : vector<1x16xf32> to vector<50x16xf32>
    %16 = arith.addf %14, %15 : vector<50x16xf32>
    %17 = math.tanh %16 : vector<50x16xf32>
    %18 = arith.addf %12, %17 : vector<50x16xf32>
    %c0_11 = arith.constant 0 : index
    %c0_12 = arith.constant 0 : index
    %19 = vector.load %arg4[%c0_11, %c0_12] : memref<50x150xf32, #tpu.memory_space<vmem>>, vector<50x150xf32>
    %cst_13 = arith.constant dense<0.000000e+00> : vector<50x16xf32>
    %20 = tpu.matmul %19, %0, %cst_13 {dimension_numbers = #tpu.dot_dimension_numbers<[1], [0], [0], [1], [0, 0, 1, 1], [], []>} : vector<50x150xf32>, vector<150x16xf32>, vector<50x16xf32> -> vector<50x16xf32>
    %21 = vector.broadcast %1 : vector<1x16xf32> to vector<50x16xf32>
    %22 = arith.addf %20, %21 : vector<50x16xf32>
    %23 = math.tanh %22 : vector<50x16xf32>
    %24 = arith.addf %18, %23 : vector<50x16xf32>
    %cst_14 = arith.constant 2.500000e-01 : f32
    %25 = vector.broadcast %cst_14 : f32 to vector<50x16xf32>
    %26 = arith.mulf %25, %24 : vector<50x16xf32>
    %c0_15 = arith.constant 0 : index
    %c0_16 = arith.constant 0 : index
    %27 = vector.load %arg7[%c0_15, %c0_16] : memref<50x16xf32, #tpu.memory_space<vmem>>, vector<50x16xf32>
    tpu.vector_store %arg7[%c0_15, %c0_16], %26 {strides = array<i32>} : memref<50x16xf32, #tpu.memory_space<vmem>>, vector<50x16xf32>,
    return
  }
  func.func @transform_0(%arg0: i32) -> (i32, i32) {
    %c0_i32 = arith.constant 0 : i32
    %c0_i32_0 = arith.constant 0 : i32
    %c0_i32_1 = arith.constant 0 : i32
    return %c0_i32, %c0_i32_0 : i32, i32
  }
  func.func @transform_1(%arg0: i32) -> (i32, i32) {
    %c0_i32 = arith.constant 0 : i32
    %c0_i32_0 = arith.constant 0 : i32
    %c0_i32_1 = arith.constant 0 : i32
    return %c0_i32, %c0_i32_0 : i32, i32
  }
  func.func @transform_2(%arg0: i32) -> (i32, i32) {
    %c0_i32 = arith.constant 0 : i32
    %c0_i32_0 = arith.constant 0 : i32
    %c0_i32_1 = arith.constant 0 : i32
    return %c0_i32, %c0_i32_0 : i32, i32
  }
  func.func @transform_3(%arg0: i32) -> (i32, i32) {
    %c0_i32 = arith.constant 0 : i32
    %c0_i32_0 = arith.constant 0 : i32
    %c0_i32_1 = arith.constant 0 : i32
    return %c0_i32, %c0_i32_0 : i32, i32
  }
  func.func @transform_4(%arg0: i32) -> (i32, i32) {
    %c0_i32 = arith.constant 0 : i32
    %c0_i32_0 = arith.constant 0 : i32
    %c0_i32_1 = arith.constant 0 : i32
    return %c0_i32, %c0_i32_0 : i32, i32
  }
  func.func @transform_5(%arg0: i32) -> (i32, i32) {
    %c0_i32 = arith.constant 0 : i32
    %c0_i32_0 = arith.constant 0 : i32
    %c0_i32_1 = arith.constant 0 : i32
    return %c0_i32, %c0_i32_0 : i32, i32
  }
  func.func @transform_6(%arg0: i32) -> (i32, i32) {
    %c0_i32 = arith.constant 0 : i32
    %c0_i32_0 = arith.constant 0 : i32
    %c0_i32_1 = arith.constant 0 : i32
    return %c0_i32, %c0_i32_0 : i32, i32
  }
}

module attributes {stable_mosaic.version = 11 : i64} {
  func.func @_gemm_bias_tanh_kernel(%arg0: i32, %arg1: memref<2x400xf32, #tpu.memory_space<vmem>>, %arg2: memref<400x120xf32, #tpu.memory_space<vmem>>, %arg3: memref<1x120xf32, #tpu.memory_space<vmem>>, %arg4: memref<2x120xf32, #tpu.memory_space<vmem>>) attributes {dimension_semantics = [#tpu.dimension_semantics<arbitrary>], iteration_bounds = array<i64: 1>, scalar_prefetch = 0 : i64, scratch_operands = 0 : i64, tpu.core_type = #tpu.core_type<tc>, window_params = [{pipeline_mode = #tpu.pipeline_mode<synchronous>, transform_indices = @transform_0, window_bounds = array<i64: 2, 400>}, {pipeline_mode = #tpu.pipeline_mode<synchronous>, transform_indices = @transform_1, window_bounds = array<i64: 400, 120>}, {pipeline_mode = #tpu.pipeline_mode<synchronous>, transform_indices = @transform_2, window_bounds = array<i64: 1, 120>}, {pipeline_mode = #tpu.pipeline_mode<synchronous>, transform_indices = @transform_3, window_bounds = array<i64: 2, 120>}]} {
    %c0 = arith.constant 0 : index
    %c0_0 = arith.constant 0 : index
    %0 = vector.load %arg1[%c0, %c0_0] : memref<2x400xf32, #tpu.memory_space<vmem>>, vector<2x400xf32>
    %c0_1 = arith.constant 0 : index
    %c0_2 = arith.constant 0 : index
    %1 = vector.load %arg2[%c0_1, %c0_2] : memref<400x120xf32, #tpu.memory_space<vmem>>, vector<400x120xf32>
    %cst = arith.constant dense<0.000000e+00> : vector<2x120xf32>
    %2 = tpu.matmul %0, %1, %cst {dimension_numbers = #tpu.dot_dimension_numbers<[1], [0], [0], [1], [0, 0, 1, 1], [], []>} : vector<2x400xf32>, vector<400x120xf32>, vector<2x120xf32> -> vector<2x120xf32>
    %c0_3 = arith.constant 0 : index
    %c0_4 = arith.constant 0 : index
    %3 = vector.load %arg3[%c0_3, %c0_4] : memref<1x120xf32, #tpu.memory_space<vmem>>, vector<1x120xf32>
    %4 = vector.broadcast %3 : vector<1x120xf32> to vector<2x120xf32>
    %5 = arith.addf %2, %4 : vector<2x120xf32>
    %6 = math.tanh %5 : vector<2x120xf32>
    %c0_5 = arith.constant 0 : index
    %c0_6 = arith.constant 0 : index
    %7 = vector.load %arg4[%c0_5, %c0_6] : memref<2x120xf32, #tpu.memory_space<vmem>>, vector<2x120xf32>
    tpu.vector_store %arg4[%c0_5, %c0_6], %6 {strides = array<i32>} : memref<2x120xf32, #tpu.memory_space<vmem>>, vector<2x120xf32>,
    return
  }
  func.func @transform_0(%arg0: i32) -> (i32, i32) {
    %c0_i32 = arith.constant 0 : i32
    %c0_i32_0 = arith.constant 0 : i32
    %c0_i32_1 = arith.constant 0 : i32
    return %c0_i32, %c0_i32_0 : i32, i32
  }
  func.func @transform_1(%arg0: i32) -> (i32, i32) {
    %c0_i32 = arith.constant 0 : i32
    %c0_i32_0 = arith.constant 0 : i32
    %c0_i32_1 = arith.constant 0 : i32
    return %c0_i32, %c0_i32_0 : i32, i32
  }
  func.func @transform_2(%arg0: i32) -> (i32, i32) {
    %c0_i32 = arith.constant 0 : i32
    %c0_i32_0 = arith.constant 0 : i32
    %c0_i32_1 = arith.constant 0 : i32
    return %c0_i32, %c0_i32_0 : i32, i32
  }
  func.func @transform_3(%arg0: i32) -> (i32, i32) {
    %c0_i32 = arith.constant 0 : i32
    %c0_i32_0 = arith.constant 0 : i32
    %c0_i32_1 = arith.constant 0 : i32
    return %c0_i32, %c0_i32_0 : i32, i32
  }
}

</mosaic_0001>

<bundles_post_ra>
// kernel: _lambda_.3
= control target key start
LH: loop header
LB: loop body
LE: loop exit
PB: predicated region body
PF: predicated region fallthrough
CT: control target
= control target key end

     0   :  { %vm231_vm0 = vcmask 1040384   ;;  %v3938_v0 = vmov 0.0   ;;  %vm83_vm1 = vcmask 203776   ;;  %vm3939_vm2 = vmmov 0   ;;  %s5737_s4 = inlined_call_operand.vmem [shape: f32[25,6], index: 4, kind: input, shape index: {}]   ;;  %s5738_s0 = inlined_call_operand.vmem [shape: f32[392,25], index: 0, kind: input, shape index: {}]   ;;  %s5739_s1 = inlined_call_operand.vmem [shape: f32[392,25], index: 1, kind: input, shape index: {}]   ;;  %s5740_s5 = inlined_call_operand.vmem [shape: f32[1,6], index: 5, kind: input, shape index: {}]   ;;  %s5741_s2 = inlined_call_operand.vmem [shape: f32[392,25], index: 2, kind: input, shape index: {}]   ;;  %s5742_s3 = inlined_call_operand.vmem [shape: f32[392,25], index: 3, kind: input, shape index: {}]   ;;  %s5743_s6 = inlined_call_operand.vmem [shape: f32[392,6], index: 6, kind: output, shape index: {}]  }
   0x1   :  { %2922 = vmatprep.subr.mxu0 %v3938_v0  ;;  %v26_v1 = vld [vmem:[%s5737_s4 + $0x18] sm:$0x1]  ;;  %3077 = vmatprep.subr.mxu1 %v3938_v0  ;;  %v25_v2 = vld [vmem:[%s5737_s4 + $0x10] sm:$0xff]  ;;  %v24_v3 = vld [vmem:[%s5737_s4 + $0x8] sm:$0xff]  ;;  %vm2455_vm3 = vcmask 48128  }
   0x2   :  { %2923 = vmatpush3.msk.msra.mxu0 %vm231_vm0, %v26_v1  ;;  %3078 = vmatpush3.msk.msra.mxu1 %vm231_vm0, %v26_v1  ;;  %v23_v4 = vld [vmem:[%s5737_s4] sm:$0xff]  ;;  %v29_v7 = vld [vmem:[%s5738_s0 + $0x8] sm:$0xff]  ;;  %v30_v9 = vld [vmem:[%s5738_s0 + $0x10] sm:$0xff] }
   0x3   :  { %2924 = vmatprep.subr.mxu0 %v3938_v0  ;;  %3079 = vmatprep.subr.mxu1 %v3938_v0  ;;  %v28_v5 = vld [vmem:[%s5738_s0] sm:$0xff]  ;;  %v595_v8 = vld [vmem:[%s5739_s1 + $0x8] sm:$0xff]  ;;  %v596_v10 = vld [vmem:[%s5739_s1 + $0x10] sm:$0xff] }
   0x4   :  { %2925 = vmatpush3.msra.mxu0 %v25_v2  ;;  %3080 = vmatpush3.msra.mxu1 %v25_v2  ;;  %v594_v6 = vld [vmem:[%s5739_s1] sm:$0xff]  ;;  %v31_v11 = vld [vmem:[%s5738_s0 + $0x18] sm:$0xff]  ;;  %v33_v15 = vld [vmem:[%s5738_s0 + $0x28] sm:$0xff] }
   0x5   :  { %2926 = vmatprep.subr.mxu0 %v3938_v0  ;;  %3081 = vmatprep.subr.mxu1 %v3938_v0  ;;  %v597_v12 = vld [vmem:[%s5739_s1 + $0x18] sm:$0xff]  ;;  %v32_v13 = vld [vmem:[%s5738_s0 + $0x20] sm:$0xff]  ;;  %v599_v16 = vld [vmem:[%s5739_s1 + $0x28] sm:$0xff] }
   0x6   :  { %2927 = vmatpush3.msra.mxu0 %v24_v3  ;;  %3082 = vmatpush3.msra.mxu1 %v24_v3  ;;  %v598_v14 = vld [vmem:[%s5739_s1 + $0x20] sm:$0xff]  ;;  %v34_v17 = vld [vmem:[%s5738_s0 + $0x30] sm:$0xff]  ;;  %v35_v19 = vld [vmem:[%s5738_s0 + $0x38] sm:$0xff] }
   0x7   :  { %2928 = vmatprep.subr.mxu0 %v3938_v0  ;;  %2930 = vmatprep.mubr.msk.f32.mxu0 %vm3939_vm2, %v3938_v0  ;;  %v600_v18 = vld [vmem:[%s5739_s1 + $0x30] sm:$0xff]  ;;  %v601_v20 = vld [vmem:[%s5739_s1 + $0x38] sm:$0xff]  ;;  %v36_v21 = vld [vmem:[%s5738_s0 + $0x40] sm:$0xff] }
   0x8   :  { %2929 = vmatpush3.msra.mxu0 %v23_v4  ;;  %3083 = vmatprep.subr.mxu1 %v3938_v0  ;;  %v602_v22 = vld [vmem:[%s5739_s1 + $0x40] sm:$0xff]  ;;  %v37_v23 = vld [vmem:[%s5738_s0 + $0x48] sm:$0xff]  ;;  %v38_v25 = vld [vmem:[%s5738_s0 + $0x50] sm:$0xff] }
   0x9   :  { %2931 = vmatmul.mubr.msk.f32.vlgmr.msra.gmra.mxu0 %vm83_vm1, %v28_v5  ;;  %3084 = vmatpush3.msra.mxu1 %v23_v4  ;;  %v603_v24 = vld [vmem:[%s5739_s1 + $0x48] sm:$0xff]  ;;  %v604_v26 = vld [vmem:[%s5739_s1 + $0x50] sm:$0xff]  ;;  %v39_v27 = vld [vmem:[%s5738_s0 + $0x58] sm:$0xff] }
   0xa   :  { %3085 = vmatprep.mubr.msk.f32.mxu1 %vm3939_vm2, %v3938_v0  ;;  %3232 = vmatprep.subr.mxu0 %v3938_v0  ;;  %v605_v28 = vld [vmem:[%s5739_s1 + $0x58] sm:$0xff]  ;;  %v40_v29 = vld [vmem:[%s5738_s0 + $0x60] sm:$0xff]  ;;  %v41_v31 = vld [vmem:[%s5738_s0 + $0x68] sm:$0xff] }
   0xb   :  { %3086 = vmatmul.mubr.msk.f32.vlgmr.msra.gmra.mxu1 %vm83_vm1, %v594_v6  ;;  %3233 = vmatpush3.msk.msra.mxu0 %vm231_vm0, %v26_v1  ;;  %v606_v30 = vld [vmem:[%s5739_s1 + $0x60] sm:$0xff]  ;;  %v607_v32 = vld [vmem:[%s5739_s1 + $0x68] sm:$0xff]  ;;  %v42_v33 = vld [vmem:[%s5738_s0 + $0x70] sm:$0xff] }
   0xc   :  { %3387 = vmatprep.subr.mxu1 %v3938_v0  ;;  %2933 = vmatprep.mubr.msk.f32.mxu0 %vm3939_vm2, %v3938_v0  ;;  %v608_v34 = vld [vmem:[%s5739_s1 + $0x70] sm:$0xff]  ;;  %v43_v35 = vld [vmem:[%s5738_s0 + $0x78] sm:$0xff]  ;;  %v44_v37 = vld [vmem:[%s5738_s0 + $0x80] sm:$0xff] }
   0xd   :  { %3388 = vmatpush3.msk.msra.mxu1 %vm231_vm0, %v26_v1  ;;  %2934 = vmatmul.mubr.msk.f32.gmra.mxu0 %vm83_vm1, %v29_v7  ;;  %v609_v36 = vld [vmem:[%s5739_s1 + $0x78] sm:$0xff]  ;;  %v610_v38 = vld [vmem:[%s5739_s1 + $0x80] sm:$0xff]  ;;  %v45_v39 = vld [vmem:[%s5738_s0 + $0x88] sm:$0xff] }
   0xe   :  { %3088 = vmatprep.mubr.msk.f32.mxu1 %vm3939_vm2, %v3938_v0  ;;  %2936 = vmatprep.mubr.msk.f32.mxu0 %vm3939_vm2, %v3938_v0  ;;  %v611_v40 = vld [vmem:[%s5739_s1 + $0x88] sm:$0xff]  ;;  %v46_v41 = vld [vmem:[%s5738_s0 + $0x90] sm:$0xff]  ;;  %v47_v43 = vld [vmem:[%s5738_s0 + $0x98] sm:$0xff] }
   0xf   :  { %3089 = vmatmul.mubr.msk.f32.gmra.mxu1 %vm83_vm1, %v595_v8  ;;  %3234 = vmatprep.subr.mxu0 %v3938_v0  ;;  %v612_v42 = vld [vmem:[%s5739_s1 + $0x90] sm:$0xff]  ;;  %v613_v44 = vld [vmem:[%s5739_s1 + $0x98] sm:$0xff]  ;;  %v48_v45 = vld [vmem:[%s5738_s0 + $0xa0] sm:$0xff] }
  0x10   :  { %3091 = vmatprep.mubr.msk.f32.mxu1 %vm3939_vm2, %v3938_v0  ;;  %3235 = vmatpush3.msra.mxu0 %v25_v2  ;;  %v614_v46 = vld [vmem:[%s5739_s1 + $0xa0] sm:$0xff]  ;;  %v49_v47 = vld [vmem:[%s5738_s0 + $0xa8] sm:$0xff]  ;;  %v50_v49 = vld [vmem:[%s5738_s0 + $0xb0] sm:$0xff] }
  0x11   :  { %2937 = vmatmul.mubr.msk.f32.gmra.mxu0 %vm83_vm1, %v30_v9  ;;  %3389 = vmatprep.subr.mxu1 %v3938_v0  ;;  %v615_v48 = vld [vmem:[%s5739_s1 + $0xa8] sm:$0xff]  ;;  %v616_v50 = vld [vmem:[%s5739_s1 + $0xb0] sm:$0xff]  ;;  %v51_v51 = vld [vmem:[%s5738_s0 + $0xb8] sm:$0xff] }
  0x12   :  { %2939 = vmatprep.mubr.msk.f32.mxu0 %vm3939_vm2, %v3938_v0  ;;  %3390 = vmatpush3.msra.mxu1 %v25_v2  ;;  %v617_v52 = vld [vmem:[%s5739_s1 + $0xb8] sm:$0xff]  ;;  %v52_v53 = vld [vmem:[%s5738_s0 + $0xc0] sm:$0xff]  ;;  %v53_v55 = vld [vmem:[%s5738_s0 + $0xc8] sm:$0xff] }
  0x13   :  { %3092 = vmatmul.mubr.msk.f32.gmra.mxu1 %vm83_vm1, %v596_v10  ;;  %3236 = vmatprep.subr.mxu0 %v3938_v0  ;;  %v618_v54 = vld [vmem:[%s5739_s1 + $0xc0] sm:$0xff]  ;;  %v619_v56 = vld [vmem:[%s5739_s1 + $0xc8] sm:$0xff]  ;;  %v54_v57 = vld [vmem:[%s5738_s0 + $0xd0] sm:$0xff] }
  0x14   :  { %3094 = vmatprep.mubr.msk.f32.mxu1 %vm3939_vm2, %v3938_v0  ;;  %3237 = vmatpush3.msra.mxu0 %v24_v3  ;;  %v620_v58 = vld [vmem:[%s5739_s1 + $0xd0] sm:$0xff]  ;;  %v55_v59 = vld [vmem:[%s5738_s0 + $0xd8] sm:$0xff]  ;;  %v56_v61 = vld [vmem:[%s5738_s0 + $0xe0] sm:$0xff] }
  0x15   :  { %2940 = vmatmul.mubr.msk.f32.gmra.mxu0 %vm83_vm1, %v31_v11  ;;  %3391 = vmatprep.subr.mxu1 %v3938_v0  ;;  %v621_v60 = vld [vmem:[%s5739_s1 + $0xd8] sm:$0xff]  ;;  %v622_v62 = vld [vmem:[%s5739_s1 + $0xe0] sm:$0xff]  ;;  %v57_v63 = vld [vmem:[%s5738_s0 + $0xe8] sm:$0xff] }
  0x16   :  { %2942 = vmatprep.mubr.msk.f32.mxu0 %vm3939_vm2, %v3938_v0  ;;  %3392 = vmatpush3.msra.mxu1 %v24_v3  ;;  %v623_v1 = vld [vmem:[%s5739_s1 + $0xe8] sm:$0xff]  ;;  %v58_v2 = vld [vmem:[%s5738_s0 + $0xf0] sm:$0xff]  ;;  %v625_v5 = vld [vmem:[%s5739_s1 + $0xf8] sm:$0xff] }
  0x17   :  { %3095 = vmatmul.mubr.msk.f32.gmra.mxu1 %vm83_vm1, %v597_v12  ;;  %3238 = vmatprep.subr.mxu0 %v3938_v0  ;;  %v624_v3 = vld [vmem:[%s5739_s1 + $0xf0] sm:$0xff]  ;;  %v60_v6 = vld [vmem:[%s5738_s0 + $0x100] sm:$0xff]  ;;  %v61_v8 = vld [vmem:[%s5738_s0 + $0x108] sm:$0xff] }
  0x18   :  { %3097 = vmatprep.mubr.msk.f32.mxu1 %vm3939_vm2, %v3938_v0  ;;  %3239 = vmatpush3.msra.mxu0 %v23_v4  ;;  %v626_v7 = vld [vmem:[%s5739_s1 + $0x100] sm:$0xff]  ;;  %v627_v9 = vld [vmem:[%s5739_s1 + $0x108] sm:$0xff]  ;;  %v62_v10 = vld [vmem:[%s5738_s0 + $0x110] sm:$0xff] }
  0x19   :  { %2943 = vmatmul.mubr.msk.f32.gmra.mxu0 %vm83_vm1, %v32_v13  ;;  %3393 = vmatprep.subr.mxu1 %v3938_v0  ;;  %v628_v11 = vld [vmem:[%s5739_s1 + $0x110] sm:$0xff]  ;;  %v63_v12 = vld [vmem:[%s5738_s0 + $0x118] sm:$0xff] }
  0x1a   :  { %2945 = vmatprep.mubr.msk.f32.mxu0 %vm3939_vm2, %v3938_v0  ;;  %3394 = vmatpush3.msra.mxu1 %v23_v4  ;;  %v59_v4 = vld [vmem:[%s5738_s0 + $0xf8] sm:$0xff] }
  0x1b   :  { %3098 = vmatmul.mubr.msk.f32.gmra.mxu1 %vm83_vm1, %v598_v14  ;;  %v629_v13 = vld [vmem:[%s5739_s1 + $0x118] sm:$0xff]  ;;  %v64_v14 = vld [vmem:[%s5738_s0 + $0x120] sm:$0xff] }
  0x1c   :  { %3100 = vmatprep.mubr.msk.f32.mxu1 %vm3939_vm2, %v3938_v0 }
  0x1d   :  { %2946 = vmatmul.mubr.msk.f32.gmra.mxu0 %vm83_vm1, %v33_v15  ;;  %v630_v15 = vld [vmem:[%s5739_s1 + $0x120] sm:$0xff] }
  0x1e   :  { %2948 = vmatprep.mubr.msk.f32.mxu0 %vm3939_vm2, %v3938_v0 }
  0x1f   :  { %3101 = vmatmul.mubr.msk.f32.gmra.mxu1 %vm83_vm1, %v599_v16  ;;  %v65_v16 = vld [vmem:[%s5738_s0 + $0x128] sm:$0xff] }
  0x20   :  { %3103 = vmatprep.mubr.msk.f32.mxu1 %vm3939_vm2, %v3938_v0 }
  0x21   :  { %2949 = vmatmul.mubr.msk.f32.gmra.mxu0 %vm83_vm1, %v34_v17  ;;  %v631_v17 = vld [vmem:[%s5739_s1 + $0x128] sm:$0xff] }
  0x22   :  { %2951 = vmatprep.mubr.msk.f32.mxu0 %vm3939_vm2, %v3938_v0 }
  0x23   :  { %3104 = vmatmul.mubr.msk.f32.gmra.mxu1 %vm83_vm1, %v600_v18  ;;  %v66_v18 = vld [vmem:[%s5738_s0 + $0x130] sm:$0xff] }
  0x24   :  { %3106 = vmatprep.mubr.msk.f32.mxu1 %vm3939_vm2, %v3938_v0 }
  0x25   :  { %2952 = vmatmul.mubr.msk.f32.gmra.mxu0 %vm83_vm1, %v35_v19  ;;  %v632_v19 = vld [vmem:[%s5739_s1 + $0x130] sm:$0xff] }
  0x26   :  { %2954 = vmatprep.mubr.msk.f32.mxu0 %vm3939_vm2, %v3938_v0 }
  0x27   :  { %3107 = vmatmul.mubr.msk.f32.gmra.mxu1 %vm83_vm1, %v601_v20  ;;  %v67_v20 = vld [vmem:[%s5738_s0 + $0x138] sm:$0xff] }
  0x28   :  { %3109 = vmatprep.mubr.msk.f32.mxu1 %vm3939_vm2, %v3938_v0 }
  0x29   :  { %2955 = vmatmul.mubr.msk.f32.gmra.mxu0 %vm83_vm1, %v36_v21  ;;  %v633_v21 = vld [vmem:[%s5739_s1 + $0x138] sm:$0xff] }
  0x2a   :  { %2957 = vmatprep.mubr.msk.f32.mxu0 %vm3939_vm2, %v3938_v0 }
  0x2b   :  { %3110 = vmatmul.mubr.msk.f32.gmra.mxu1 %vm83_vm1, %v602_v22  ;;  %v68_v22 = vld [vmem:[%s5738_s0 + $0x140] sm:$0xff] }
  0x2c   :  { %3112 = vmatprep.mubr.msk.f32.mxu1 %vm3939_vm2, %v3938_v0 }
  0x2d   :  { %2958 = vmatmul.mubr.msk.f32.gmra.mxu0 %vm83_vm1, %v37_v23  ;;  %v634_v23 = vld [vmem:[%s5739_s1 + $0x140] sm:$0xff] }
  0x2e   :  { %2960 = vmatprep.mubr.msk.f32.mxu0 %vm3939_vm2, %v3938_v0 }
  0x2f   :  { %3113 = vmatmul.mubr.msk.f32.gmra.mxu1 %vm83_vm1, %v603_v24  ;;  %v69_v24 = vld [vmem:[%s5738_s0 + $0x148] sm:$0xff] }
  0x30   :  { %3115 = vmatprep.mubr.msk.f32.mxu1 %vm3939_vm2, %v3938_v0 }
  0x31   :  { %2961 = vmatmul.mubr.msk.f32.gmra.mxu0 %vm83_vm1, %v38_v25  ;;  %v635_v25 = vld [vmem:[%s5739_s1 + $0x148] sm:$0xff] }
  0x32   :  { %2963 = vmatprep.mubr.msk.f32.mxu0 %vm3939_vm2, %v3938_v0 }
  0x33   :  { %3116 = vmatmul.mubr.msk.f32.gmra.mxu1 %vm83_vm1, %v604_v26  ;;  %v70_v26 = vld [vmem:[%s5738_s0 + $0x150] sm:$0xff] }
  0x34   :  { %3118 = vmatprep.mubr.msk.f32.mxu1 %vm3939_vm2, %v3938_v0 }
  0x35   :  { %2964 = vmatmul.mubr.msk.f32.gmra.mxu0 %vm83_vm1, %v39_v27  ;;  %v636_v27 = vld [vmem:[%s5739_s1 + $0x150] sm:$0xff] }
  0x36   :  { %2966 = vmatprep.mubr.msk.f32.mxu0 %vm3939_vm2, %v3938_v0 }
  0x37   :  { %3119 = vmatmul.mubr.msk.f32.gmra.mxu1 %vm83_vm1, %v605_v28  ;;  %v71_v28 = vld [vmem:[%s5738_s0 + $0x158] sm:$0xff] }
  0x38   :  { %3121 = vmatprep.mubr.msk.f32.mxu1 %vm3939_vm2, %v3938_v0 }
  0x39   :  { %2967 = vmatmul.mubr.msk.f32.gmra.mxu0 %vm83_vm1, %v40_v29  ;;  %v637_v29 = vld [vmem:[%s5739_s1 + $0x158] sm:$0xff] }
  0x3a   :  { %2969 = vmatprep.mubr.msk.f32.mxu0 %vm3939_vm2, %v3938_v0 }
  0x3b   :  { %3122 = vmatmul.mubr.msk.f32.gmra.mxu1 %vm83_vm1, %v606_v30  ;;  %v72_v30 = vld [vmem:[%s5738_s0 + $0x160] sm:$0xff] }
  0x3c   :  { %3124 = vmatprep.mubr.msk.f32.mxu1 %vm3939_vm2, %v3938_v0 }
  0x3d   :  { %2970 = vmatmul.mubr.msk.f32.gmra.mxu0 %vm83_vm1, %v41_v31  ;;  %v638_v31 = vld [vmem:[%s5739_s1 + $0x160] sm:$0xff] }
  0x3e   :  { %2972 = vmatprep.mubr.msk.f32.mxu0 %vm3939_vm2, %v3938_v0 }
  0x3f   :  { %3125 = vmatmul.mubr.msk.f32.gmra.mxu1 %vm83_vm1, %v607_v32  ;;  %v73_v32 = vld [vmem:[%s5738_s0 + $0x168] sm:$0xff] }
  0x40   :  { %3127 = vmatprep.mubr.msk.f32.mxu1 %vm3939_vm2, %v3938_v0 }
  0x41   :  { %2973 = vmatmul.mubr.msk.f32.gmra.mxu0 %vm83_vm1, %v42_v33  ;;  %v639_v33 = vld [vmem:[%s5739_s1 + $0x168] sm:$0xff] }
  0x42   :  { %2975 = vmatprep.mubr.msk.f32.mxu0 %vm3939_vm2, %v3938_v0 }
  0x43   :  { %3128 = vmatmul.mubr.msk.f32.gmra.mxu1 %vm83_vm1, %v608_v34  ;;  %v74_v34 = vld [vmem:[%s5738_s0 + $0x170] sm:$0xff] }
  0x44   :  { %3130 = vmatprep.mubr.msk.f32.mxu1 %vm3939_vm2, %v3938_v0 }
  0x45   :  { %2976 = vmatmul.mubr.msk.f32.gmra.mxu0 %vm83_vm1, %v43_v35  ;;  %v640_v35 = vld [vmem:[%s5739_s1 + $0x170] sm:$0xff] }
  0x46   :  { %2978 = vmatprep.mubr.msk.f32.mxu0 %vm3939_vm2, %v3938_v0 }
  0x47   :  { %3131 = vmatmul.mubr.msk.f32.gmra.mxu1 %vm83_vm1, %v609_v36  ;;  %v75_v36 = vld [vmem:[%s5738_s0 + $0x178] sm:$0xff] }
  0x48   :  { %3133 = vmatprep.mubr.msk.f32.mxu1 %vm3939_vm2, %v3938_v0 }
  0x49   :  { %2979 = vmatmul.mubr.msk.f32.gmra.mxu0 %vm83_vm1, %v44_v37  ;;  %v641_v37 = vld [vmem:[%s5739_s1 + $0x178] sm:$0xff] }
  0x4a   :  { %2981 = vmatprep.mubr.msk.f32.mxu0 %vm3939_vm2, %v3938_v0 }
  0x4b   :  { %3134 = vmatmul.mubr.msk.f32.gmra.mxu1 %vm83_vm1, %v610_v38  ;;  %v76_v38 = vld [vmem:[%s5738_s0 + $0x180] sm:$0xff] }
  0x4c   :  { %3136 = vmatprep.mubr.msk.f32.mxu1 %vm3939_vm2, %v3938_v0 }
  0x4d   :  { %2982 = vmatmul.mubr.msk.f32.gmra.mxu0 %vm83_vm1, %v45_v39  ;;  %v4591_v39 = vld [vmem:[%s5740_s5] ss:$0 sm:$0xff] }
  0x4e   :  { %2984 = vmatprep.mubr.msk.f32.mxu0 %vm3939_vm2, %v3938_v0 }
  0x4f   :  { %3137 = vmatmul.mubr.msk.f32.gmra.mxu1 %vm83_vm1, %v611_v40  ;;  %v642_v40 = vld [vmem:[%s5739_s1 + $0x180] sm:$0xff] }
  0x50   :  { %3139 = vmatprep.mubr.msk.f32.mxu1 %vm3939_vm2, %v3938_v0 }
  0x51   :  { %2985 = vmatmul.mubr.msk.f32.gmra.mxu0 %vm83_vm1, %v46_v41 }
  0x52   :  { %2987 = vmatprep.mubr.msk.f32.mxu0 %vm3939_vm2, %v3938_v0 }
  0x53   :  { %3140 = vmatmul.mubr.msk.f32.gmra.mxu1 %vm83_vm1, %v612_v42 }
  0x54   :  { %3142 = vmatprep.mubr.msk.f32.mxu1 %vm3939_vm2, %v3938_v0 }
  0x55   :  { %2988 = vmatmul.mubr.msk.f32.gmra.mxu0 %vm83_vm1, %v47_v43  ;;  %v1198_v43 = vld [vmem:[%s5741_s2] sm:$0xff] }
  0x56   :  { %2990 = vmatprep.mubr.msk.f32.mxu0 %vm3939_vm2, %v3938_v0 }
  0x57   :  { %3143 = vmatmul.mubr.msk.f32.gmra.mxu1 %vm83_vm1, %v613_v44 }
  0x58   :  { %3145 = vmatprep.mubr.msk.f32.mxu1 %vm3939_vm2, %v3938_v0 }
  0x59   :  { %2991 = vmatmul.mubr.msk.f32.gmra.mxu0 %vm83_vm1, %v48_v45 }
  0x5a   :  { %2993 = vmatprep.mubr.msk.f32.mxu0 %vm3939_vm2, %v3938_v0 }
  0x5b   :  { %3146 = vmatmul.mubr.msk.f32.gmra.mxu1 %vm83_vm1, %v614_v46 }
  0x5c   :  { %3148 = vmatprep.mubr.msk.f32.mxu1 %vm3939_vm2, %v3938_v0 }
  0x5d   :  { %2994 = vmatmul.mubr.msk.f32.gmra.mxu0 %vm83_vm1, %v49_v47  ;;  %v1802_v47 = vld [vmem:[%s5742_s3] sm:$0xff] }
  0x5e   :  { %2996 = vmatprep.mubr.msk.f32.mxu0 %vm3939_vm2, %v3938_v0 }
  0x5f   :  { %3149 = vmatmul.mubr.msk.f32.gmra.mxu1 %vm83_vm1, %v615_v48 }
  0x60   :  { %3151 = vmatprep.mubr.msk.f32.mxu1 %vm3939_vm2, %v3938_v0 }
  0x61   :  { %2997 = vmatmul.mubr.msk.f32.gmra.mxu0 %vm83_vm1, %v50_v49 }
  0x62   :  { %2999 = vmatprep.mubr.msk.f32.mxu0 %vm3939_vm2, %v3938_v0 }
  0x63   :  { %3152 = vmatmul.mubr.msk.f32.gmra.mxu1 %vm83_vm1, %v616_v50 }
  0x64   :  { %3154 = vmatprep.mubr.msk.f32.mxu1 %vm3939_vm2, %v3938_v0 }
  0x65   :  { %3000 = vmatmul.mubr.msk.f32.gmra.mxu0 %vm83_vm1, %v51_v51  ;;  %v1199_v51 = vld [vmem:[%s5741_s2 + $0x8] sm:$0xff] }
  0x66   :  { %3002 = vmatprep.mubr.msk.f32.mxu0 %vm3939_vm2, %v3938_v0 }
  0x67   :  { %3155 = vmatmul.mubr.msk.f32.gmra.mxu1 %vm83_vm1, %v617_v52 }
  0x68   :  { %3157 = vmatprep.mubr.msk.f32.mxu1 %vm3939_vm2, %v3938_v0 }
  0x69   :  { %3003 = vmatmul.mubr.msk.f32.gmra.mxu0 %vm83_vm1, %v52_v53 }
  0x6a   :  { %3005 = vmatprep.mubr.msk.f32.mxu0 %vm3939_vm2, %v3938_v0 }
  0x6b   :  { %3158 = vmatmul.mubr.msk.f32.gmra.mxu1 %vm83_vm1, %v618_v54 }
  0x6c   :  { %3160 = vmatprep.mubr.msk.f32.mxu1 %vm3939_vm2, %v3938_v0 }
  0x6d   :  { %3006 = vmatmul.mubr.msk.f32.gmra.mxu0 %vm83_vm1, %v53_v55  ;;  %v1803_v55 = vld [vmem:[%s5742_s3 + $0x8] sm:$0xff] }
  0x6e   :  { %3008 = vmatprep.mubr.msk.f32.mxu0 %vm3939_vm2, %v3938_v0 }
  0x6f   :  { %3161 = vmatmul.mubr.msk.f32.gmra.mxu1 %vm83_vm1, %v619_v56 }
  0x70   :  { %3163 = vmatprep.mubr.msk.f32.mxu1 %vm3939_vm2, %v3938_v0 }
  0x71   :  { %3009 = vmatmul.mubr.msk.f32.gmra.mxu0 %vm83_vm1, %v54_v57 }
  0x72   :  { %3011 = vmatprep.mubr.msk.f32.mxu0 %vm3939_vm2, %v3938_v0 }
  0x73   :  { %3164 = vmatmul.mubr.msk.f32.gmra.mxu1 %vm83_vm1, %v620_v58 }
  0x74   :  { %3166 = vmatprep.mubr.msk.f32.mxu1 %vm3939_vm2, %v3938_v0 }
  0x75   :  { %3012 = vmatmul.mubr.msk.f32.gmra.mxu0 %vm83_vm1, %v55_v59  ;;  %v1200_v59 = vld [vmem:[%s5741_s2 + $0x10] sm:$0xff] }
  0x76   :  { %3014 = vmatprep.mubr.msk.f32.mxu0 %vm3939_vm2, %v3938_v0 }
  0x77   :  { %3167 = vmatmul.mubr.msk.f32.gmra.mxu1 %vm83_vm1, %v621_v60 }
  0x78   :  { %3169 = vmatprep.mubr.msk.f32.mxu1 %vm3939_vm2, %v3938_v0 }
  0x79   :  { %3015 = vmatmul.mubr.msk.f32.gmra.mxu0 %vm83_vm1, %v56_v61 }
  0x7a   :  { %3017 = vmatprep.mubr.msk.f32.mxu0 %vm3939_vm2, %v3938_v0 }
  0x7b   :  { %3170 = vmatmul.mubr.msk.f32.gmra.mxu1 %vm83_vm1, %v622_v62 }
  0x7c   :  { %3172 = vmatprep.mubr.msk.f32.mxu1 %vm3939_vm2, %v3938_v0 }
  0x7d   :  { %3018 = vmatmul.mubr.msk.f32.gmra.mxu0 %vm83_vm1, %v57_v63  ;;  %v1804_v63 = vld [vmem:[%s5742_s3 + $0x10] sm:$0xff] }
  0x7e   :  { %3020 = vmatprep.mubr.msk.f32.mxu0 %vm3939_vm2, %v3938_v0 }
  0x7f   :  { %3173 = vmatmul.mubr.msk.f32.gmra.mxu1 %vm83_vm1, %v623_v1 }
  0x80   :  { %3175 = vmatprep.mubr.msk.f32.mxu1 %vm3939_vm2, %v3938_v0 }
  0x81   :  { %3021 = vmatmul.mubr.msk.f32.gmra.mxu0 %vm83_vm1, %v58_v2 }
  0x82   :  { %3023 = vmatprep.mubr.msk.f32.mxu0 %vm3939_vm2, %v3938_v0 }
  0x83   :  { %3176 = vmatmul.mubr.msk.f32.gmra.mxu1 %vm83_vm1, %v624_v3 }
  0x84   :  { %3178 = vmatprep.mubr.msk.f32.mxu1 %vm3939_vm2, %v3938_v0 }
  0x85   :  { %3024 = vmatmul.mubr.msk.f32.gmra.mxu0 %vm83_vm1, %v59_v4  ;;  %v1201_v4 = vld [vmem:[%s5741_s2 + $0x18] sm:$0xff] }
  0x86   :  { %3026 = vmatprep.mubr.msk.f32.mxu0 %vm3939_vm2, %v3938_v0 }
  0x87   :  { %3179 = vmatmul.mubr.msk.f32.gmra.mxu1 %vm83_vm1, %v625_v5 }
  0x88   :  { %3181 = vmatprep.mubr.msk.f32.mxu1 %vm3939_vm2, %v3938_v0 }
  0x89   :  { %3027 = vmatmul.mubr.msk.f32.gmra.mxu0 %vm83_vm1, %v60_v6 }
  0x8a   :  { %3029 = vmatprep.mubr.msk.f32.mxu0 %vm3939_vm2, %v3938_v0 }
  0x8b   :  { %3182 = vmatmul.mubr.msk.f32.gmra.mxu1 %vm83_vm1, %v626_v7 }
  0x8c   :  { %3184 = vmatprep.mubr.msk.f32.mxu1 %vm3939_vm2, %v3938_v0 }
  0x8d   :  { %3030 = vmatmul.mubr.msk.f32.gmra.mxu0 %vm83_vm1, %v61_v8  ;;  %v1805_v8 = vld [vmem:[%s5742_s3 + $0x18] sm:$0xff] }
  0x8e   :  { %3032 = vmatprep.mubr.msk.f32.mxu0 %vm3939_vm2, %v3938_v0 }
  0x8f   :  { %3185 = vmatmul.mubr.msk.f32.gmra.mxu1 %vm83_vm1, %v627_v9 }
  0x90   :  { %3187 = vmatprep.mubr.msk.f32.mxu1 %vm3939_vm2, %v3938_v0 }
  0x91   :  { %3033 = vmatmul.mubr.msk.f32.gmra.mxu0 %vm83_vm1, %v62_v10 }
  0x92   :  { %3035 = vmatprep.mubr.msk.f32.mxu0 %vm3939_vm2, %v3938_v0 }
  0x93   :  { %3188 = vmatmul.mubr.msk.f32.gmra.mxu1 %vm83_vm1, %v628_v11 }
  0x94   :  { %3190 = vmatprep.mubr.msk.f32.mxu1 %vm3939_vm2, %v3938_v0 }
  0x95   :  { %3036 = vmatmul.mubr.msk.f32.gmra.mxu0 %vm83_vm1, %v63_v12 }
  0x96   :  { %3038 = vmatprep.mubr.msk.f32.mxu0 %vm3939_vm2, %v3938_v0 }
  0x97   :  { %3191 = vmatmul.mubr.msk.f32.gmra.mxu1 %vm83_vm1, %v629_v13  ;;  %v1202_v13 = vld [vmem:[%s5741_s2 + $0x20] sm:$0xff] }
  0x98   :  { %3193 = vmatprep.mubr.msk.f32.mxu1 %vm3939_vm2, %v3938_v0 }
  0x99   :  { %3039 = vmatmul.mubr.msk.f32.gmra.mxu0 %vm83_vm1, %v64_v14 }
  0x9a   :  { %3041 = vmatprep.mubr.msk.f32.mxu0 %vm3939_vm2, %v3938_v0 }
  0x9b   :  { %3194 = vmatmul.mubr.msk.f32.gmra.mxu1 %vm83_vm1, %v630_v15 }
  0x9c   :  { %3196 = vmatprep.mubr.msk.f32.mxu1 %vm3939_vm2, %v3938_v0 }
  0x9d   :  { %3042 = vmatmul.mubr.msk.f32.gmra.mxu0 %vm83_vm1, %v65_v16 }
  0x9e   :  { %3044 = vmatprep.mubr.msk.f32.mxu0 %vm3939_vm2, %v3938_v0 }
  0x9f   :  { %3197 = vmatmul.mubr.msk.f32.gmra.mxu1 %vm83_vm1, %v631_v17 }
  0xa0   :  { %3199 = vmatprep.mubr.msk.f32.mxu1 %vm3939_vm2, %v3938_v0 }
  0xa1   :  { %3045 = vmatmul.mubr.msk.f32.gmra.mxu0 %vm83_vm1, %v66_v18 }
  0xa2   :  { %3047 = vmatprep.mubr.msk.f32.mxu0 %vm3939_vm2, %v3938_v0 }
  0xa3   :  { %3200 = vmatmul.mubr.msk.f32.gmra.mxu1 %vm83_vm1, %v632_v19  ;;  %v1806_v19 = vld [vmem:[%s5742_s3 + $0x20] sm:$0xff] }
  0xa4   :  { %3202 = vmatprep.mubr.msk.f32.mxu1 %vm3939_vm2, %v3938_v0 }
  0xa5   :  { %3048 = vmatmul.mubr.msk.f32.gmra.mxu0 %vm83_vm1, %v67_v20 }
  0xa6   :  { %3050 = vmatprep.mubr.msk.f32.mxu0 %vm3939_vm2, %v3938_v0 }
  0xa7   :  { %3203 = vmatmul.mubr.msk.f32.gmra.mxu1 %vm83_vm1, %v633_v21 }
  0xa8   :  { %3205 = vmatprep.mubr.msk.f32.mxu1 %vm3939_vm2, %v3938_v0 }
  0xa9   :  { %3051 = vmatmul.mubr.msk.f32.gmra.mxu0 %vm83_vm1, %v68_v22 }
  0xaa   :  { %3053 = vmatprep.mubr.msk.f32.mxu0 %vm3939_vm2, %v3938_v0 }
  0xab   :  { %3206 = vmatmul.mubr.msk.f32.gmra.mxu1 %vm83_vm1, %v634_v23 }
  0xac   :  { %3208 = vmatprep.mubr.msk.f32.mxu1 %vm3939_vm2, %v3938_v0 }
  0xad   :  { %3054 = vmatmul.mubr.msk.f32.gmra.mxu0 %vm83_vm1, %v69_v24  ;;  %v1203_v24 = vld [vmem:[%s5741_s2 + $0x28] sm:$0xff] }
  0xae   :  { %3056 = vmatprep.mubr.msk.f32.mxu0 %vm3939_vm2, %v3938_v0 }
  0xaf   :  { %3209 = vmatmul.mubr.msk.f32.gmra.mxu1 %vm83_vm1, %v635_v25 }
  0xb0   :  { %3211 = vmatprep.mubr.msk.f32.mxu1 %vm3939_vm2, %v3938_v0 }
  0xb1   :  { %3057 = vmatmul.mubr.msk.f32.gmra.mxu0 %vm83_vm1, %v70_v26 }
  0xb2   :  { %3059 = vmatprep.mubr.msk.f32.mxu0 %vm3939_vm2, %v3938_v0 }
  0xb3   :  { %3212 = vmatmul.mubr.msk.f32.gmra.mxu1 %vm83_vm1, %v636_v27 }
  0xb4   :  { %3214 = vmatprep.mubr.msk.f32.mxu1 %vm3939_vm2, %v3938_v0 }
  0xb5   :  { %3060 = vmatmul.mubr.msk.f32.gmra.mxu0 %vm83_vm1, %v71_v28 }
  0xb6   :  { %3062 = vmatprep.mubr.msk.f32.mxu0 %vm3939_vm2, %v3938_v0 }
  0xb7   :  { %3215 = vmatmul.mubr.msk.f32.gmra.mxu1 %vm83_vm1, %v637_v29 }
  0xb8   :  { %3217 = vmatprep.mubr.msk.f32.mxu1 %vm3939_vm2, %v3938_v0 }
  0xb9   :  { %3063 = vmatmul.mubr.msk.f32.gmra.mxu0 %vm83_vm1, %v72_v30  ;;  %v1807_v30 = vld [vmem:[%s5742_s3 + $0x28] sm:$0xff] }
  0xba   :  { %3065 = vmatprep.mubr.msk.f32.mxu0 %vm3939_vm2, %v3938_v0 }
  0xbb   :  { %3218 = vmatmul.mubr.msk.f32.gmra.mxu1 %vm83_vm1, %v638_v31 }
  0xbc   :  { %3220 = vmatprep.mubr.msk.f32.mxu1 %vm3939_vm2, %v3938_v0 }
  0xbd   :  { %3066 = vmatmul.mubr.msk.f32.gmra.mxu0 %vm83_vm1, %v73_v32 }
  0xbe   :  { %3068 = vmatprep.mubr.msk.f32.mxu0 %vm3939_vm2, %v3938_v0 }
  0xbf   :  { %3221 = vmatmul.mubr.msk.f32.gmra.mxu1 %vm83_vm1, %v639_v33 }
  0xc0   :  { %3223 = vmatprep.mubr.msk.f32.mxu1 %vm3939_vm2, %v3938_v0 }
  0xc1   :  { %3069 = vmatmul.mubr.msk.f32.gmra.mxu0 %vm83_vm1, %v74_v34 }
  0xc2   :  { %3071 = vmatprep.mubr.msk.f32.mxu0 %vm3939_vm2, %v3938_v0 }
  0xc3   :  { %3224 = vmatmul.mubr.msk.f32.gmra.mxu1 %vm83_vm1, %v640_v35  ;;  %v1204_v35 = vld [vmem:[%s5741_s2 + $0x30] sm:$0xff] }
  0xc4   :  { %3226 = vmatprep.mubr.msk.f32.mxu1 %vm3939_vm2, %v3938_v0 }
  0xc5   :  { %3072 = vmatmul.mubr.msk.f32.gmra.mxu0 %vm83_vm1, %v75_v36 }
  0xc6   :  { %3074 = vmatprep.mubr.msk.f32.mxu0 %vm3939_vm2, %v3938_v0 }
  0xc7   :  { %3227 = vmatmul.mubr.msk.f32.gmra.mxu1 %vm83_vm1, %v641_v37 }
  0xc8   :  { %3229 = vmatprep.mubr.msk.f32.mxu1 %vm3939_vm2, %v3938_v0 }
  0xc9   :  { %v301_v41 = vpop.f32.mrf.mxu0  ;;  %3075 = vmatmul.mubr.msk.f32.gmra.mxu0 %vm83_vm1, %v76_v38 }
  0xca   :  { %v302_v42 = vadd.f32 %v4591_v39, %v301_v41  ;;  %3240 = vmatprep.mubr.msk.f32.mxu0 %vm3939_vm2, %v3938_v0 }
  0xcb   :  { %v856_v44 = vpop.f32.mrf.mxu1  ;;  %3230 = vmatmul.mubr.msk.f32.gmra.mxu1 %vm83_vm1, %v642_v40  ;;  %v2932_v45 = vpop.f32.mrf.mxu0 }
  0xcc   :  { %3544 = vtanh.f32 %v302_v42  ;;  %v857_v46 = vadd.f32 %v4591_v39, %v856_v44  ;;  %3395 = vmatprep.mubr.msk.f32.mxu1 %vm3939_vm2, %v3938_v0  ;;  %v1808_v42 = vld [vmem:[%s5742_s3 + $0x30] sm:$0xff] }
  0xcd   :  { %v3087_v48 = vpop.f32.mrf.mxu1  ;;  %v306_v49 = vpop.f32.mrf.mxu0  ;;  %3241 = vmatmul.mubr.msk.f32.vlgmr.msra.gmra.mxu0 %vm83_vm1, %v1198_v43 }
  0xce   :  { %3546 = vtanh.f32 %v857_v46  ;;  %v307_v50 = vadd.f32 %v4591_v39, %v306_v49  ;;  %3243 = vmatprep.mubr.msk.f32.mxu0 %vm3939_vm2, %v3938_v0 }
  0xcf   :  { %v861_v52 = vpop.f32.mrf.mxu1  ;;  %3396 = vmatmul.mubr.msk.f32.vlgmr.msra.gmra.mxu1 %vm83_vm1, %v1802_v47  ;;  %v2935_v53 = vpop.f32.mrf.mxu0  ;;  %v1205_v47 = vld [vmem:[%s5741_s2 + $0x38] sm:$0xff] }
  0xd0   :  { %3548 = vtanh.f32 %v307_v50  ;;  %v862_v54 = vadd.f32 %v4591_v39, %v861_v52  ;;  %3398 = vmatprep.mubr.msk.f32.mxu1 %vm3939_vm2, %v3938_v0  ;;  %v1809_v53 = vld [vmem:[%s5742_s3 + $0x38] sm:$0xff] }
  0xd1   :  { %v3090_v56 = vpop.f32.mrf.mxu1  ;;  %v311_v57 = vpop.f32.mrf.mxu0  ;;  %3244 = vmatmul.mubr.msk.f32.gmra.mxu0 %vm83_vm1, %v1199_v51 }
  0xd2   :  { %3550 = vtanh.f32 %v862_v54  ;;  %v312_v58 = vadd.f32 %v4591_v39, %v311_v57  ;;  %3246 = vmatprep.mubr.msk.f32.mxu0 %vm3939_vm2, %v3938_v0 }
  0xd3   :  { %v866_v60 = vpop.f32.mrf.mxu1  ;;  %3399 = vmatmul.mubr.msk.f32.gmra.mxu1 %vm83_vm1, %v1803_v55  ;;  %v2938_v61 = vpop.f32.mrf.mxu0 }
  0xd4   :  { %3552 = vtanh.f32 %v312_v58  ;;  %v867_v62 = vadd.f32 %v4591_v39, %v866_v60  ;;  %3401 = vmatprep.mubr.msk.f32.mxu1 %vm3939_vm2, %v3938_v0  ;;  %v1206_v58 = vld [vmem:[%s5741_s2 + $0x40] sm:$0xff] }
  0xd5   :  { %v3093_v1 = vpop.f32.mrf.mxu1  ;;  %v316_v2 = vpop.f32.mrf.mxu0  ;;  %3247 = vmatmul.mubr.msk.f32.gmra.mxu0 %vm83_vm1, %v1200_v59 }
  0xd6   :  { %3554 = vtanh.f32 %v867_v62  ;;  %v317_v3 = vadd.f32 %v4591_v39, %v316_v2  ;;  %3249 = vmatprep.mubr.msk.f32.mxu0 %vm3939_vm2, %v3938_v0  ;;  %v1810_v1 = vld [vmem:[%s5742_s3 + $0x40] sm:$0xff] }
  0xd7   :  { %v871_v5 = vpop.f32.mrf.mxu1  ;;  %3402 = vmatmul.mubr.msk.f32.gmra.mxu1 %vm83_vm1, %v1804_v63  ;;  %v2941_v6 = vpop.f32.mrf.mxu0 }
  0xd8   :  { %3556 = vtanh.f32 %v317_v3  ;;  %v872_v7 = vadd.f32 %v4591_v39, %v871_v5  ;;  %3404 = vmatprep.mubr.msk.f32.mxu1 %vm3939_vm2, %v3938_v0  ;;  %v1207_v6 = vld [vmem:[%s5741_s2 + $0x48] sm:$0xff] }
  0xd9   :  { %v3545_v9 = vpop.eup %3544  ;;  %v3096_v10 = vpop.f32.mrf.mxu1  ;;  %3250 = vmatmul.mubr.msk.f32.gmra.mxu0 %vm83_vm1, %v1201_v4 }
  0xda   :  { %v321_v11 = vpop.f32.mrf.mxu0  ;;  %3558 = vtanh.f32 %v872_v7  ;;  %3252 = vmatprep.mubr.msk.f32.mxu0 %vm3939_vm2, %v3938_v0 }
  0xdb   :  { %v322_v12 = vadd.f32 %v4591_v39, %v321_v11  ;;  %v3547_v14 = vpop.eup %3546  ;;  %v876_v15 = vpop.f32.mrf.mxu1  ;;  %3405 = vmatmul.mubr.msk.f32.gmra.mxu1 %vm83_vm1, %v1805_v8 }
  0xdc   :  { %v2944_v16 = vpop.f32.mrf.mxu0  ;;  %v4662_v17 = vadd.f32 %v3547_v14, %v3545_v9  ;;  %v877_v18 = vadd.f32 %v4591_v39, %v876_v15  ;;  %3407 = vmatprep.mubr.msk.f32.mxu1 %vm3939_vm2, %v3938_v0 }
  0xdd   :  { %3560 = vtanh.f32 %v322_v12  ;;  %v3549_v20 = vpop.eup %3548  ;;  %v3099_v21 = vpop.f32.mrf.mxu1  ;;  %3253 = vmatmul.mubr.msk.f32.gmra.mxu0 %vm83_vm1, %v1202_v13  ;;  %v1811_v12 = vld [vmem:[%s5742_s3 + $0x48] sm:$0xff] }
  0xde   :  { %v326_v22 = vpop.f32.mrf.mxu0  ;;  %3562 = vtanh.f32 %v877_v18  ;;  %3255 = vmatprep.mubr.msk.f32.mxu0 %vm3939_vm2, %v3938_v0  ;;  %v1208_v18 = vld [vmem:[%s5741_s2 + $0x50] sm:$0xff] }
  0xdf   :  { %v327_v23 = vadd.f32 %v4591_v39, %v326_v22  ;;  %v3551_v25 = vpop.eup %3550  ;;  %v881_v26 = vpop.f32.mrf.mxu1  ;;  %3408 = vmatmul.mubr.msk.f32.gmra.mxu1 %vm83_vm1, %v1806_v19 }
  0xe0   :  { %v2947_v27 = vpop.f32.mrf.mxu0  ;;  %v4678_v28 = vadd.f32 %v3551_v25, %v3549_v20  ;;  %v882_v29 = vadd.f32 %v4591_v39, %v881_v26  ;;  %3410 = vmatprep.mubr.msk.f32.mxu1 %vm3939_vm2, %v3938_v0 }
  0xe1   :  { %3564 = vtanh.f32 %v327_v23  ;;  %v3553_v31 = vpop.eup %3552  ;;  %v3102_v32 = vpop.f32.mrf.mxu1  ;;  %3256 = vmatmul.mubr.msk.f32.gmra.mxu0 %vm83_vm1, %v1203_v24  ;;  %v1812_v24 = vld [vmem:[%s5742_s3 + $0x50] sm:$0xff] }
  0xe2   :  { %v331_v33 = vpop.f32.mrf.mxu0  ;;  %3566 = vtanh.f32 %v882_v29  ;;  %3258 = vmatprep.mubr.msk.f32.mxu0 %vm3939_vm2, %v3938_v0 }
  0xe3   :  { %v332_v34 = vadd.f32 %v4591_v39, %v331_v33  ;;  %v3555_v36 = vpop.eup %3554  ;;  %v886_v37 = vpop.f32.mrf.mxu1  ;;  %3411 = vmatmul.mubr.msk.f32.gmra.mxu1 %vm83_vm1, %v1807_v30  ;;  %v1209_v30 = vld [vmem:[%s5741_s2 + $0x58] sm:$0xff] }
  0xe4   :  { %v2950_v38 = vpop.f32.mrf.mxu0  ;;  %v4694_v40 = vadd.f32 %v3555_v36, %v3553_v31  ;;  %v887_v41 = vadd.f32 %v4591_v39, %v886_v37  ;;  %3413 = vmatprep.mubr.msk.f32.mxu1 %vm3939_vm2, %v3938_v0  ;;  %v1813_v36 = vld [vmem:[%s5742_s3 + $0x58] sm:$0xff] }
  0xe5   :  { %3568 = vtanh.f32 %v332_v34  ;;  %v3557_v43 = vpop.eup %3556  ;;  %v3105_v44 = vpop.f32.mrf.mxu1  ;;  %3259 = vmatmul.mubr.msk.f32.gmra.mxu0 %vm83_vm1, %v1204_v35 }
  0xe6   :  { %v336_v45 = vpop.f32.mrf.mxu0  ;;  %3570 = vtanh.f32 %v887_v41  ;;  %3261 = vmatprep.mubr.msk.f32.mxu0 %vm3939_vm2, %v3938_v0 }
  0xe7   :  { %v337_v46 = vadd.f32 %v4591_v39, %v336_v45  ;;  %v3559_v48 = vpop.eup %3558  ;;  %v891_v49 = vpop.f32.mrf.mxu1  ;;  %3414 = vmatmul.mubr.msk.f32.gmra.mxu1 %vm83_vm1, %v1808_v42 }
  0xe8   :  { %v2953_v50 = vpop.f32.mrf.mxu0  ;;  %v4710_v51 = vadd.f32 %v3559_v48, %v3557_v43  ;;  %v892_v52 = vadd.f32 %v4591_v39, %v891_v49  ;;  %3416 = vmatprep.mubr.msk.f32.mxu1 %vm3939_vm2, %v3938_v0  ;;  %v1210_v43 = vld [vmem:[%s5741_s2 + $0x60] sm:$0xff] }
  0xe9   :  { %3572 = vtanh.f32 %v337_v46  ;;  %v3108_v55 = vpop.f32.mrf.mxu1  ;;  %3262 = vmatmul.mubr.msk.f32.gmra.mxu0 %vm83_vm1, %v1205_v47  ;;  %v1814_v49 = vld [vmem:[%s5742_s3 + $0x60] sm:$0xff] }
  0xea   :  { %v3561_v54 = vpop.eup %3560  ;;  %v341_v56 = vpop.f32.mrf.mxu0  ;;  %3574 = vtanh.f32 %v892_v52  ;;  %3264 = vmatprep.mubr.msk.f32.mxu0 %vm3939_vm2, %v3938_v0  ;;  %v1211_v55 = vld [vmem:[%s5741_s2 + $0x68] sm:$0xff] }
  0xeb   :  { %v342_v57 = vadd.f32 %v4591_v39, %v341_v56  ;;  %v3563_v59 = vpop.eup %3562  ;;  %v896_v60 = vpop.f32.mrf.mxu1  ;;  %3417 = vmatmul.mubr.msk.f32.gmra.mxu1 %vm83_vm1, %v1809_v53 }
  0xec   :  { %v2956_v61 = vpop.f32.mrf.mxu0  ;;  %v4726_v62 = vadd.f32 %v3563_v59, %v3561_v54  ;;  %v897_v63 = vadd.f32 %v4591_v39, %v896_v60  ;;  %3419 = vmatprep.mubr.msk.f32.mxu1 %vm3939_vm2, %v3938_v0 }
  0xed   :  { %3576 = vtanh.f32 %v342_v57  ;;  %v3111_v3 = vpop.f32.mrf.mxu1  ;;  %3265 = vmatmul.mubr.msk.f32.gmra.mxu0 %vm83_vm1, %v1206_v58  ;;  %v1815_v61 = vld [vmem:[%s5742_s3 + $0x68] sm:$0xff] }
  0xee   :  { %v3565_v2 = vpop.eup %3564  ;;  %v346_v4 = vpop.f32.mrf.mxu0  ;;  %3578 = vtanh.f32 %v897_v63  ;;  %3267 = vmatprep.mubr.msk.f32.mxu0 %vm3939_vm2, %v3938_v0 }
  0xef   :  { %v347_v5 = vadd.f32 %v4591_v39, %v346_v4  ;;  %v3567_v7 = vpop.eup %3566  ;;  %v901_v8 = vpop.f32.mrf.mxu1  ;;  %3420 = vmatmul.mubr.msk.f32.gmra.mxu1 %vm83_vm1, %v1810_v1  ;;  %v1212_v4 = vld [vmem:[%s5741_s2 + $0x70] sm:$0xff] }
  0xf0   :  { %v2959_v9 = vpop.f32.mrf.mxu0  ;;  %v4742_v10 = vadd.f32 %v3567_v7, %v3565_v2  ;;  %v902_v11 = vadd.f32 %v4591_v39, %v901_v8  ;;  %3422 = vmatprep.mubr.msk.f32.mxu1 %vm3939_vm2, %v3938_v0 }
  0xf1   :  { %3580 = vtanh.f32 %v347_v5  ;;  %v3114_v14 = vpop.f32.mrf.mxu1  ;;  %3268 = vmatmul.mubr.msk.f32.gmra.mxu0 %vm83_vm1, %v1207_v6 }
  0xf2   :  { %v3569_v13 = vpop.eup %3568  ;;  %v351_v15 = vpop.f32.mrf.mxu0  ;;  %3582 = vtanh.f32 %v902_v11  ;;  %3270 = vmatprep.mubr.msk.f32.mxu0 %vm3939_vm2, %v3938_v0  ;;  %v1816_v11 = vld [vmem:[%s5742_s3 + $0x70] sm:$0xff] }
  0xf3   :  { %v352_v16 = vadd.f32 %v4591_v39, %v351_v15  ;;  %v3571_v19 = vpop.eup %3570  ;;  %v906_v20 = vpop.f32.mrf.mxu1  ;;  %3423 = vmatmul.mubr.msk.f32.gmra.mxu1 %vm83_vm1, %v1811_v12 }
  0xf4   :  { %v2962_v21 = vpop.f32.mrf.mxu0  ;;  %v4758_v22 = vadd.f32 %v3571_v19, %v3569_v13  ;;  %v907_v23 = vadd.f32 %v4591_v39, %v906_v20  ;;  %3425 = vmatprep.mubr.msk.f32.mxu1 %vm3939_vm2, %v3938_v0 }
  0xf5   :  { %3584 = vtanh.f32 %v352_v16  ;;  %v3117_v26 = vpop.f32.mrf.mxu1  ;;  %3271 = vmatmul.mubr.msk.f32.gmra.mxu0 %vm83_vm1, %v1208_v18  ;;  %v1213_v16 = vld [vmem:[%s5741_s2 + $0x78] sm:$0xff] }
  0xf6   :  { %v3573_v25 = vpop.eup %3572  ;;  %v356_v27 = vpop.f32.mrf.mxu0  ;;  %3586 = vtanh.f32 %v907_v23  ;;  %3273 = vmatprep.mubr.msk.f32.mxu0 %vm3939_vm2, %v3938_v0 }
  0xf7   :  { %v357_v29 = vadd.f32 %v4591_v39, %v356_v27  ;;  %v3575_v31 = vpop.eup %3574  ;;  %v911_v32 = vpop.f32.mrf.mxu1  ;;  %3426 = vmatmul.mubr.msk.f32.gmra.mxu1 %vm83_vm1, %v1812_v24  ;;  %v1817_v24 = vld [vmem:[%s5742_s3 + $0x78] sm:$0xff] }
  0xf8   :  { %v2965_v33 = vpop.f32.mrf.mxu0  ;;  %v4774_v34 = vadd.f32 %v3575_v31, %v3573_v25  ;;  %v912_v35 = vadd.f32 %v4591_v39, %v911_v32  ;;  %3428 = vmatprep.mubr.msk.f32.mxu1 %vm3939_vm2, %v3938_v0 }
  0xf9   :  { %3588 = vtanh.f32 %v357_v29  ;;  %v3120_v38 = vpop.f32.mrf.mxu1  ;;  %3274 = vmatmul.mubr.msk.f32.gmra.mxu0 %vm83_vm1, %v1209_v30  ;;  %v1214_v30 = vld [vmem:[%s5741_s2 + $0x80] sm:$0xff] }
  0xfa   :  { %v3577_v37 = vpop.eup %3576  ;;  %v361_v41 = vpop.f32.mrf.mxu0  ;;  %3590 = vtanh.f32 %v912_v35  ;;  %3276 = vmatprep.mubr.msk.f32.mxu0 %vm3939_vm2, %v3938_v0 }
  0xfb   :  { %v362_v42 = vadd.f32 %v4591_v39, %v361_v41  ;;  %v3579_v44 = vpop.eup %3578  ;;  %v916_v45 = vpop.f32.mrf.mxu1  ;;  %3429 = vmatmul.mubr.msk.f32.gmra.mxu1 %vm83_vm1, %v1813_v36 }
  0xfc   :  { %v2968_v46 = vpop.f32.mrf.mxu0  ;;  %v4790_v47 = vadd.f32 %v3579_v44, %v3577_v37  ;;  %v917_v48 = vadd.f32 %v4591_v39, %v916_v45  ;;  %3431 = vmatprep.mubr.msk.f32.mxu1 %vm3939_vm2, %v3938_v0  ;;  %v1818_v37 = vld [vmem:[%s5742_s3 + $0x80] sm:$0xff]  ;;  %v1215_v44 = vld [vmem:[%s5741_s2 + $0x88] sm:$0xff] }
  0xfd   :  { %3592 = vtanh.f32 %v362_v42  ;;  %v3123_v52 = vpop.f32.mrf.mxu1  ;;  %3277 = vmatmul.mubr.msk.f32.gmra.mxu0 %vm83_vm1, %v1210_v43 }
  0xfe   :  { %v3581_v50 = vpop.eup %3580  ;;  %v366_v53 = vpop.f32.mrf.mxu0  ;;  %3594 = vtanh.f32 %v917_v48  ;;  %3279 = vmatprep.mubr.msk.f32.mxu0 %vm3939_vm2, %v3938_v0  ;;  %v1819_v52 = vld [vmem:[%s5742_s3 + $0x88] sm:$0xff] }
  0xff   :  { %v367_v54 = vadd.f32 %v4591_v39, %v366_v53  ;;  %v3583_v56 = vpop.eup %3582  ;;  %v921_v57 = vpop.f32.mrf.mxu1  ;;  %3432 = vmatmul.mubr.msk.f32.gmra.mxu1 %vm83_vm1, %v1814_v49 }
 0x100   :  { %v2971_v58 = vpop.f32.mrf.mxu0  ;;  %v4806_v59 = vadd.f32 %v3583_v56, %v3581_v50  ;;  %v922_v60 = vadd.f32 %v4591_v39, %v921_v57  ;;  %3434 = vmatprep.mubr.msk.f32.mxu1 %vm3939_vm2, %v3938_v0  ;;  %v1216_v57 = vld [vmem:[%s5741_s2 + $0x90] sm:$0xff] }
 0x101   :  { %3596 = vtanh.f32 %v367_v54  ;;  %v3126_v1 = vpop.f32.mrf.mxu1  ;;  %3280 = vmatmul.mubr.msk.f32.gmra.mxu0 %vm83_vm1, %v1211_v55 }
 0x102   :  { %v3585_v63 = vpop.eup %3584  ;;  %v371_v2 = vpop.f32.mrf.mxu0  ;;  %3598 = vtanh.f32 %v922_v60  ;;  %3282 = vmatprep.mubr.msk.f32.mxu0 %vm3939_vm2, %v3938_v0 }
 0x103   :  { %v372_v3 = vadd.f32 %v4591_v39, %v371_v2  ;;  %v3587_v5 = vpop.eup %3586  ;;  %v926_v6 = vpop.f32.mrf.mxu1  ;;  %3435 = vmatmul.mubr.msk.f32.gmra.mxu1 %vm83_vm1, %v1815_v61  ;;  %v1820_v2 = vld [vmem:[%s5742_s3 + $0x90] sm:$0xff] }
 0x104   :  { %v2974_v7 = vpop.f32.mrf.mxu0  ;;  %v4822_v8 = vadd.f32 %v3587_v5, %v3585_v63  ;;  %v927_v9 = vadd.f32 %v4591_v39, %v926_v6  ;;  %3437 = vmatprep.mubr.msk.f32.mxu1 %vm3939_vm2, %v3938_v0 }
 0x105   :  { %3600 = vtanh.f32 %v372_v3  ;;  %v3129_v13 = vpop.f32.mrf.mxu1  ;;  %3283 = vmatmul.mubr.msk.f32.gmra.mxu0 %vm83_vm1, %v1212_v4  ;;  %v1217_v7 = vld [vmem:[%s5741_s2 + $0x98] sm:$0xff] }
 0x106   :  { %v3589_v12 = vpop.eup %3588  ;;  %v376_v14 = vpop.f32.mrf.mxu0  ;;  %3602 = vtanh.f32 %v927_v9  ;;  %3285 = vmatprep.mubr.msk.f32.mxu0 %vm3939_vm2, %v3938_v0 }
 0x107   :  { %v377_v15 = vadd.f32 %v4591_v39, %v376_v14  ;;  %v3591_v18 = vpop.eup %3590  ;;  %v931_v19 = vpop.f32.mrf.mxu1  ;;  %3438 = vmatmul.mubr.msk.f32.gmra.mxu1 %vm83_vm1, %v1816_v11 }
 0x108   :  { %v2977_v20 = vpop.f32.mrf.mxu0  ;;  %v4838_v21 = vadd.f32 %v3591_v18, %v3589_v12  ;;  %v932_v23 = vadd.f32 %v4591_v39, %v931_v19  ;;  %3440 = vmatprep.mubr.msk.f32.mxu1 %vm3939_vm2, %v3938_v0 }
 0x109   :  { %3604 = vtanh.f32 %v377_v15  ;;  %v3132_v26 = vpop.f32.mrf.mxu1  ;;  %3286 = vmatmul.mubr.msk.f32.gmra.mxu0 %vm83_vm1, %v1213_v16  ;;  %v1821_v15 = vld [vmem:[%s5742_s3 + $0x98] sm:$0xff] }
 0x10a   :  { %v3593_v25 = vpop.eup %3592  ;;  %v381_v27 = vpop.f32.mrf.mxu0  ;;  %3606 = vtanh.f32 %v932_v23  ;;  %3288 = vmatprep.mubr.msk.f32.mxu0 %vm3939_vm2, %v3938_v0  ;;  %v1218_v23 = vld [vmem:[%s5741_s2 + $0xa0] sm:$0xff] }
 0x10b   :  { %v382_v29 = vadd.f32 %v4591_v39, %v381_v27  ;;  %v3595_v31 = vpop.eup %3594  ;;  %v936_v32 = vpop.f32.mrf.mxu1  ;;  %3441 = vmatmul.mubr.msk.f32.gmra.mxu1 %vm83_vm1, %v1817_v24 }
 0x10c   :  { %v2980_v33 = vpop.f32.mrf.mxu0  ;;  %v4854_v35 = vadd.f32 %v3595_v31, %v3593_v25  ;;  %v937_v36 = vadd.f32 %v4591_v39, %v936_v32  ;;  %3443 = vmatprep.mubr.msk.f32.mxu1 %vm3939_vm2, %v3938_v0 }
 0x10d   :  { %3608 = vtanh.f32 %v382_v29  ;;  %v3135_v41 = vpop.f32.mrf.mxu1  ;;  %3289 = vmatmul.mubr.msk.f32.gmra.mxu0 %vm83_vm1, %v1214_v30  ;;  %v1822_v30 = vld [vmem:[%s5742_s3 + $0xa0] sm:$0xff] }
 0x10e   :  { %v3597_v38 = vpop.eup %3596  ;;  %v386_v42 = vpop.f32.mrf.mxu0  ;;  %3610 = vtanh.f32 %v937_v36  ;;  %3291 = vmatprep.mubr.msk.f32.mxu0 %vm3939_vm2, %v3938_v0 }
 0x10f   :  { %v387_v43 = vadd.f32 %v4591_v39, %v386_v42  ;;  %v3599_v45 = vpop.eup %3598  ;;  %v941_v46 = vpop.f32.mrf.mxu1  ;;  %3444 = vmatmul.mubr.msk.f32.gmra.mxu1 %vm83_vm1, %v1818_v37  ;;  %v1219_v37 = vld [vmem:[%s5741_s2 + $0xa8] sm:$0xff] }
 0x110   :  { %v2983_v48 = vpop.f32.mrf.mxu0  ;;  %v4870_v49 = vadd.f32 %v3599_v45, %v3597_v38  ;;  %v942_v50 = vadd.f32 %v4591_v39, %v941_v46  ;;  %3446 = vmatprep.mubr.msk.f32.mxu1 %vm3939_vm2, %v3938_v0  ;;  %v1823_v45 = vld [vmem:[%s5742_s3 + $0xa8] sm:$0xff] }
 0x111   :  { %3612 = vtanh.f32 %v387_v43  ;;  %v3138_v54 = vpop.f32.mrf.mxu1  ;;  %3292 = vmatmul.mubr.msk.f32.gmra.mxu0 %vm83_vm1, %v1215_v44 }
 0x112   :  { %v3601_v53 = vpop.eup %3600  ;;  %v391_v55 = vpop.f32.mrf.mxu0  ;;  %3614 = vtanh.f32 %v942_v50  ;;  %3294 = vmatprep.mubr.msk.f32.mxu0 %vm3939_vm2, %v3938_v0 }
 0x113   :  { %v392_v56 = vadd.f32 %v4591_v39, %v391_v55  ;;  %v3603_v58 = vpop.eup %3602  ;;  %v946_v60 = vpop.f32.mrf.mxu1  ;;  %3447 = vmatmul.mubr.msk.f32.gmra.mxu1 %vm83_vm1, %v1819_v52 }
 0x114   :  { %v2986_v61 = vpop.f32.mrf.mxu0  ;;  %v4886_v63 = vadd.f32 %v3603_v58, %v3601_v53  ;;  %v947_v1 = vadd.f32 %v4591_v39, %v946_v60  ;;  %3449 = vmatprep.mubr.msk.f32.mxu1 %vm3939_vm2, %v3938_v0  ;;  %v1220_v53 = vld [vmem:[%s5741_s2 + $0xb0] sm:$0xff] }
 0x115   :  { %3616 = vtanh.f32 %v392_v56  ;;  %v3141_v4 = vpop.f32.mrf.mxu1  ;;  %3295 = vmatmul.mubr.msk.f32.gmra.mxu0 %vm83_vm1, %v1216_v57  ;;  %v1824_v60 = vld [vmem:[%s5742_s3 + $0xb0] sm:$0xff] }
 0x116   :  { %v3605_v3 = vpop.eup %3604  ;;  %v396_v5 = vpop.f32.mrf.mxu0  ;;  %3618 = vtanh.f32 %v947_v1  ;;  %3297 = vmatprep.mubr.msk.f32.mxu0 %vm3939_vm2, %v3938_v0  ;;  %v1221_v4 = vld [vmem:[%s5741_s2 + $0xb8] sm:$0xff] }
 0x117   :  { %v397_v6 = vadd.f32 %v4591_v39, %v396_v5  ;;  %v3607_v9 = vpop.eup %3606  ;;  %v951_v11 = vpop.f32.mrf.mxu1  ;;  %3450 = vmatmul.mubr.msk.f32.gmra.mxu1 %vm83_vm1, %v1820_v2 }
 0x118   :  { %v2989_v12 = vpop.f32.mrf.mxu0  ;;  %v4902_v13 = vadd.f32 %v3607_v9, %v3605_v3  ;;  %v952_v14 = vadd.f32 %v4591_v39, %v951_v11  ;;  %3452 = vmatprep.mubr.msk.f32.mxu1 %vm3939_vm2, %v3938_v0 }
 0x119   :  { %3620 = vtanh.f32 %v397_v6  ;;  %v3144_v18 = vpop.f32.mrf.mxu1  ;;  %3298 = vmatmul.mubr.msk.f32.gmra.mxu0 %vm83_vm1, %v1217_v7  ;;  %v1825_v12 = vld [vmem:[%s5742_s3 + $0xb8] sm:$0xff] }
 0x11a   :  { %v3609_v16 = vpop.eup %3608  ;;  %v401_v19 = vpop.f32.mrf.mxu0  ;;  %3622 = vtanh.f32 %v952_v14  ;;  %3300 = vmatprep.mubr.msk.f32.mxu0 %vm3939_vm2, %v3938_v0 }
 0x11b   :  { %v402_v20 = vadd.f32 %v4591_v39, %v401_v19  ;;  %v3611_v24 = vpop.eup %3610  ;;  %v956_v25 = vpop.f32.mrf.mxu1  ;;  %3453 = vmatmul.mubr.msk.f32.gmra.mxu1 %vm83_vm1, %v1821_v15  ;;  %v1222_v19 = vld [vmem:[%s5741_s2 + $0xc0] sm:$0xff] }
 0x11c   :  { %v2992_v26 = vpop.f32.mrf.mxu0  ;;  %v4918_v27 = vadd.f32 %v3611_v24, %v3609_v16  ;;  %v957_v29 = vadd.f32 %v4591_v39, %v956_v25  ;;  %3455 = vmatprep.mubr.msk.f32.mxu1 %vm3939_vm2, %v3938_v0 }
 0x11d   :  { %3624 = vtanh.f32 %v402_v20  ;;  %v3147_v32 = vpop.f32.mrf.mxu1  ;;  %3301 = vmatmul.mubr.msk.f32.gmra.mxu0 %vm83_vm1, %v1218_v23 }
 0x11e   :  { %v3613_v31 = vpop.eup %3612  ;;  %v406_v33 = vpop.f32.mrf.mxu0  ;;  %3626 = vtanh.f32 %v957_v29  ;;  %3303 = vmatprep.mubr.msk.f32.mxu0 %vm3939_vm2, %v3938_v0  ;;  %v1826_v29 = vld [vmem:[%s5742_s3 + $0xc0] sm:$0xff] }
 0x11f   :  { %v407_v36 = vadd.f32 %v4591_v39, %v406_v33  ;;  %v3615_v38 = vpop.eup %3614  ;;  %v961_v41 = vpop.f32.mrf.mxu1  ;;  %3456 = vmatmul.mubr.msk.f32.gmra.mxu1 %vm83_vm1, %v1822_v30 }
 0x120   :  { %v2995_v42 = vpop.f32.mrf.mxu0  ;;  %v4934_v43 = vadd.f32 %v3615_v38, %v3613_v31  ;;  %v962_v44 = vadd.f32 %v4591_v39, %v961_v41  ;;  %3458 = vmatprep.mubr.msk.f32.mxu1 %vm3939_vm2, %v3938_v0 }
 0x121   :  { %3628 = vtanh.f32 %v407_v36  ;;  %v3150_v48 = vpop.f32.mrf.mxu1  ;;  %3304 = vmatmul.mubr.msk.f32.gmra.mxu0 %vm83_vm1, %v1219_v37  ;;  %v1223_v36 = vld [vmem:[%s5741_s2 + $0xc8] sm:$0xff] }
 0x122   :  { %v3617_v46 = vpop.eup %3616  ;;  %v411_v50 = vpop.f32.mrf.mxu0  ;;  %3630 = vtanh.f32 %v962_v44  ;;  %3306 = vmatprep.mubr.msk.f32.mxu0 %vm3939_vm2, %v3938_v0 }
 0x123   :  { %v412_v52 = vadd.f32 %v4591_v39, %v411_v50  ;;  %v3619_v54 = vpop.eup %3618  ;;  %v966_v55 = vpop.f32.mrf.mxu1  ;;  %3459 = vmatmul.mubr.msk.f32.gmra.mxu1 %vm83_vm1, %v1823_v45  ;;  %v1827_v45 = vld [vmem:[%s5742_s3 + $0xc8] sm:$0xff] }
 0x124   :  { %v2998_v56 = vpop.f32.mrf.mxu0  ;;  %v4950_v57 = vadd.f32 %v3619_v54, %v3617_v46  ;;  %v967_v58 = vadd.f32 %v4591_v39, %v966_v55  ;;  %3461 = vmatprep.mubr.msk.f32.mxu1 %vm3939_vm2, %v3938_v0 }
 0x125   :  { %3632 = vtanh.f32 %v412_v52  ;;  %v3153_v1 = vpop.f32.mrf.mxu1  ;;  %3307 = vmatmul.mubr.msk.f32.gmra.mxu0 %vm83_vm1, %v1220_v53  ;;  %v1224_v53 = vld [vmem:[%s5741_s2 + $0xd0] sm:$0xff] }
 0x126   :  { %v3621_v61 = vpop.eup %3620  ;;  %v416_v2 = vpop.f32.mrf.mxu0  ;;  %3634 = vtanh.f32 %v967_v58  ;;  %3309 = vmatprep.mubr.msk.f32.mxu0 %vm3939_vm2, %v3938_v0 }
 0x127   :  { %v417_v3 = vadd.f32 %v4591_v39, %v416_v2  ;;  %v3623_v5 = vpop.eup %3622  ;;  %v971_v6 = vpop.f32.mrf.mxu1  ;;  %3462 = vmatmul.mubr.msk.f32.gmra.mxu1 %vm83_vm1, %v1824_v60 }
 0x128   :  { %v3001_v7 = vpop.f32.mrf.mxu0  ;;  %v4966_v9 = vadd.f32 %v3623_v5, %v3621_v61  ;;  %v972_v11 = vadd.f32 %v4591_v39, %v971_v6  ;;  %3464 = vmatprep.mubr.msk.f32.mxu1 %vm3939_vm2, %v3938_v0  ;;  %v1828_v61 = vld [vmem:[%s5742_s3 + $0xd0] sm:$0xff]  ;;  %v1225_v5 = vld [vmem:[%s5741_s2 + $0xd8] sm:$0xff] }
 0x129   :  { %3636 = vtanh.f32 %v417_v3  ;;  %v3156_v15 = vpop.f32.mrf.mxu1  ;;  %3310 = vmatmul.mubr.msk.f32.gmra.mxu0 %vm83_vm1, %v1221_v4 }
 0x12a   :  { %v3625_v14 = vpop.eup %3624  ;;  %v421_v16 = vpop.f32.mrf.mxu0  ;;  %3638 = vtanh.f32 %v972_v11  ;;  %3312 = vmatprep.mubr.msk.f32.mxu0 %vm3939_vm2, %v3938_v0  ;;  %v1829_v15 = vld [vmem:[%s5742_s3 + $0xd8] sm:$0xff] }
 0x12b   :  { %v422_v18 = vadd.f32 %v4591_v39, %v421_v16  ;;  %v3627_v20 = vpop.eup %3626  ;;  %v976_v23 = vpop.f32.mrf.mxu1  ;;  %3465 = vmatmul.mubr.msk.f32.gmra.mxu1 %vm83_vm1, %v1825_v12 }
 0x12c   :  { %v3004_v24 = vpop.f32.mrf.mxu0  ;;  %v4982_v25 = vadd.f32 %v3627_v20, %v3625_v14  ;;  %v977_v26 = vadd.f32 %v4591_v39, %v976_v23  ;;  %3467 = vmatprep.mubr.msk.f32.mxu1 %vm3939_vm2, %v3938_v0  ;;  %v1226_v23 = vld [vmem:[%s5741_s2 + $0xe0] sm:$0xff] }
 0x12d   :  { %3640 = vtanh.f32 %v422_v18  ;;  %v3159_v31 = vpop.f32.mrf.mxu1  ;;  %3313 = vmatmul.mubr.msk.f32.gmra.mxu0 %vm83_vm1, %v1222_v19 }
 0x12e   :  { %v3629_v30 = vpop.eup %3628  ;;  %v426_v32 = vpop.f32.mrf.mxu0  ;;  %3642 = vtanh.f32 %v977_v26  ;;  %3315 = vmatprep.mubr.msk.f32.mxu0 %vm3939_vm2, %v3938_v0 }
 0x12f   :  { %v427_v33 = vadd.f32 %v4591_v39, %v426_v32  ;;  %v3631_v37 = vpop.eup %3630  ;;  %v981_v38 = vpop.f32.mrf.mxu1  ;;  %3468 = vmatmul.mubr.msk.f32.gmra.mxu1 %vm83_vm1, %v1826_v29  ;;  %v1830_v32 = vld [vmem:[%s5742_s3 + $0xe0] sm:$0xff] }
 0x130   :  { %v3007_v41 = vpop.f32.mrf.mxu0  ;;  %v4998_v42 = vadd.f32 %v3631_v37, %v3629_v30  ;;  %v982_v44 = vadd.f32 %v4591_v39, %v981_v38  ;;  %3470 = vmatprep.mubr.msk.f32.mxu1 %vm3939_vm2, %v3938_v0 }
 0x131   :  { %3644 = vtanh.f32 %v427_v33  ;;  %v3162_v48 = vpop.f32.mrf.mxu1  ;;  %3316 = vmatmul.mubr.msk.f32.gmra.mxu0 %vm83_vm1, %v1223_v36  ;;  %v1227_v41 = vld [vmem:[%s5741_s2 + $0xe8] sm:$0xff] }
 0x132   :  { %v3633_v46 = vpop.eup %3632  ;;  %v431_v50 = vpop.f32.mrf.mxu0  ;;  %3646 = vtanh.f32 %v982_v44  ;;  %3318 = vmatprep.mubr.msk.f32.mxu0 %vm3939_vm2, %v3938_v0 }
 0x133   :  { %v432_v52 = vadd.f32 %v4591_v39, %v431_v50  ;;  %v3635_v54 = vpop.eup %3634  ;;  %v986_v55 = vpop.f32.mrf.mxu1  ;;  %3471 = vmatmul.mubr.msk.f32.gmra.mxu1 %vm83_vm1, %v1827_v45 }
 0x134   :  { %v3010_v56 = vpop.f32.mrf.mxu0  ;;  %v5014_v58 = vadd.f32 %v3635_v54, %v3633_v46  ;;  %v987_v60 = vadd.f32 %v4591_v39, %v986_v55  ;;  %3473 = vmatprep.mubr.msk.f32.mxu1 %vm3939_vm2, %v3938_v0 }
 0x135   :  { %3648 = vtanh.f32 %v432_v52  ;;  %v3165_v2 = vpop.f32.mrf.mxu1  ;;  %3319 = vmatmul.mubr.msk.f32.gmra.mxu0 %vm83_vm1, %v1224_v53  ;;  %v1831_v52 = vld [vmem:[%s5742_s3 + $0xe8] sm:$0xff] }
 0x136   :  { %v3637_v1 = vpop.eup %3636  ;;  %v436_v3 = vpop.f32.mrf.mxu0  ;;  %3650 = vtanh.f32 %v987_v60  ;;  %3321 = vmatprep.mubr.msk.f32.mxu0 %vm3939_vm2, %v3938_v0  ;;  %v1228_v60 = vld [vmem:[%s5741_s2 + $0xf0] sm:$0xff] }
 0x137   :  { %v437_v4 = vadd.f32 %v4591_v39, %v436_v3  ;;  %v3639_v6 = vpop.eup %3638  ;;  %v991_v7 = vpop.f32.mrf.mxu1  ;;  %3474 = vmatmul.mubr.msk.f32.gmra.mxu1 %vm83_vm1, %v1828_v61 }
 0x138   :  { %v3013_v11 = vpop.f32.mrf.mxu0  ;;  %v5030_v12 = vadd.f32 %v3639_v6, %v3637_v1  ;;  %v992_v14 = vadd.f32 %v4591_v39, %v991_v7  ;;  %3476 = vmatprep.mubr.msk.f32.mxu1 %vm3939_vm2, %v3938_v0 }
 0x139   :  { %3652 = vtanh.f32 %v437_v4  ;;  %v3168_v18 = vpop.f32.mrf.mxu1  ;;  %3322 = vmatmul.mubr.msk.f32.gmra.mxu0 %vm83_vm1, %v1225_v5  ;;  %v5083_v4 = vld [vmem:[%s5740_s5] ss:$0 sm:$0xff]  ;;  %v1832_v5 = vld [vmem:[%s5742_s3 + $0xf0] sm:$0xff] }
 0x13a   :  { %v3641_v16 = vpop.eup %3640  ;;  %v441_v19 = vpop.f32.mrf.mxu0  ;;  %3654 = vtanh.f32 %v992_v14  ;;  %3324 = vmatprep.mubr.msk.f32.mxu0 %vm3939_vm2, %v3938_v0 }
 0x13b   :  { %v442_v20 = vadd.f32 %v4591_v39, %v441_v19  ;;  %v3643_v24 = vpop.eup %3642  ;;  %v996_v26 = vpop.f32.mrf.mxu1  ;;  %3477 = vmatmul.mubr.msk.f32.gmra.mxu1 %vm83_vm1, %v1829_v15  ;;  %v1229_v15 = vld [vmem:[%s5741_s2 + $0xf8] sm:$0xff] }
 0x13c   :  { %v3016_v29 = vpop.f32.mrf.mxu0  ;;  %v5046_v30 = vadd.f32 %v3643_v24, %v3641_v16  ;;  %v997_v31 = vadd.f32 %v4591_v39, %v996_v26  ;;  %3479 = vmatprep.mubr.msk.f32.mxu1 %vm3939_vm2, %v3938_v0  ;;  %v1833_v24 = vld [vmem:[%s5742_s3 + $0xf8] sm:$0xff] }
 0x13d   :  { %3656 = vtanh.f32 %v442_v20  ;;  %v3171_v36 = vpop.f32.mrf.mxu1  ;;  %3325 = vmatmul.mubr.msk.f32.gmra.mxu0 %vm83_vm1, %v1226_v23 }
 0x13e   :  { %v3645_v33 = vpop.eup %3644  ;;  %v446_v37 = vpop.f32.mrf.mxu0  ;;  %3658 = vtanh.f32 %v997_v31  ;;  %3327 = vmatprep.mubr.msk.f32.mxu0 %vm3939_vm2, %v3938_v0 }
 0x13f   :  { %v447_v38 = vadd.f32 %v4591_v39, %v446_v37  ;;  %v3647_v44 = vpop.eup %3646  ;;  %v1001_v45 = vpop.f32.mrf.mxu1  ;;  %3480 = vmatmul.mubr.msk.f32.gmra.mxu1 %vm83_vm1, %v1830_v32 }
 0x140   :  { %v3019_v46 = vpop.f32.mrf.mxu0  ;;  %v5062_v48 = vadd.f32 %v3647_v44, %v3645_v33  ;;  %v1002_v50 = vadd.f32 %v4591_v39, %v1001_v45  ;;  %3482 = vmatprep.mubr.msk.f32.mxu1 %vm3939_vm2, %v3938_v0  ;;  %v1230_v33 = vld [vmem:[%s5741_s2 + $0x100] sm:$0xff] }
 0x141   :  { %3660 = vtanh.f32 %v447_v38  ;;  %v3174_v54 = vpop.f32.mrf.mxu1  ;;  %3328 = vmatmul.mubr.msk.f32.gmra.mxu0 %vm83_vm1, %v1227_v41  ;;  %v1834_v45 = vld [vmem:[%s5742_s3 + $0x100] sm:$0xff] }
 0x142   :  { %v3649_v53 = vpop.eup %3648  ;;  %v451_v55 = vpop.f32.mrf.mxu0  ;;  %3662 = vtanh.f32 %v1002_v50  ;;  %3330 = vmatprep.mubr.msk.f32.mxu0 %vm3939_vm2, %v3938_v0  ;;  %v1231_v54 = vld [vmem:[%s5741_s2 + $0x108] sm:$0xff] }
 0x143   :  { %v452_v56 = vadd.f32 %v4591_v39, %v451_v55  ;;  %v3651_v61 = vpop.eup %3650  ;;  %v1006_v1 = vpop.f32.mrf.mxu1  ;;  %3483 = vmatmul.mubr.msk.f32.gmra.mxu1 %vm83_vm1, %v1831_v52 }
 0x144   :  { %v3022_v2 = vpop.f32.mrf.mxu0  ;;  %v5078_v3 = vadd.f32 %v3651_v61, %v3649_v53  ;;  %v1007_v39 = vadd.f32 %v5083_v4, %v1006_v1  ;;  %3485 = vmatprep.mubr.msk.f32.mxu1 %vm3939_vm2, %v3938_v0 }
 0x145   :  { %3664 = vtanh.f32 %v452_v56  ;;  %v3177_v7 = vpop.f32.mrf.mxu1  ;;  %3331 = vmatmul.mubr.msk.f32.gmra.mxu0 %vm83_vm1, %v1228_v60  ;;  %v1835_v2 = vld [vmem:[%s5742_s3 + $0x108] sm:$0xff] }
 0x146   :  { %v3653_v6 = vpop.eup %3652  ;;  %v456_v11 = vpop.f32.mrf.mxu0  ;;  %3666 = vtanh.f32 %v1007_v39  ;;  %3333 = vmatprep.mubr.msk.f32.mxu0 %vm3939_vm2, %v3938_v0 }
 0x147   :  { %v457_v14 = vadd.f32 %v5083_v4, %v456_v11  ;;  %v3655_v16 = vpop.eup %3654  ;;  %v1011_v18 = vpop.f32.mrf.mxu1  ;;  %3486 = vmatmul.mubr.msk.f32.gmra.mxu1 %vm83_vm1, %v1832_v5  ;;  %v1232_v11 = vld [vmem:[%s5741_s2 + $0x110] sm:$0xff] }
 0x148   :  { %v3025_v19 = vpop.f32.mrf.mxu0  ;;  %v5099_v20 = vadd.f32 %v3655_v16, %v3653_v6  ;;  %v1012_v23 = vadd.f32 %v5083_v4, %v1011_v18  ;;  %3488 = vmatprep.mubr.msk.f32.mxu1 %vm3939_vm2, %v3938_v0 }
 0x149   :  { %3668 = vtanh.f32 %v457_v14  ;;  %v3180_v29 = vpop.f32.mrf.mxu1  ;;  %3334 = vmatmul.mubr.msk.f32.gmra.mxu0 %vm83_vm1, %v1229_v15 }
 0x14a   :  { %v3657_v26 = vpop.eup %3656  ;;  %v461_v31 = vpop.f32.mrf.mxu0  ;;  %3670 = vtanh.f32 %v1012_v23  ;;  %3336 = vmatprep.mubr.msk.f32.mxu0 %vm3939_vm2, %v3938_v0  ;;  %v1836_v23 = vld [vmem:[%s5742_s3 + $0x110] sm:$0xff] }
 0x14b   :  { %v462_v32 = vadd.f32 %v5083_v4, %v461_v31  ;;  %v3659_v36 = vpop.eup %3658  ;;  %v1016_v37 = vpop.f32.mrf.mxu1  ;;  %3489 = vmatmul.mubr.msk.f32.gmra.mxu1 %vm83_vm1, %v1833_v24 }
 0x14c   :  { %v3028_v38 = vpop.f32.mrf.mxu0  ;;  %v5115_v41 = vadd.f32 %v3659_v36, %v3657_v26  ;;  %v1017_v44 = vadd.f32 %v5083_v4, %v1016_v37  ;;  %3491 = vmatprep.mubr.msk.f32.mxu1 %vm3939_vm2, %v3938_v0 }
 0x14d   :  { %3672 = vtanh.f32 %v462_v32  ;;  %v3183_v50 = vpop.f32.mrf.mxu1  ;;  %3337 = vmatmul.mubr.msk.f32.gmra.mxu0 %vm83_vm1, %v1230_v33  ;;  %v1233_v32 = vld [vmem:[%s5741_s2 + $0x118] sm:$0xff] }
 0x14e   :  { %v3661_v46 = vpop.eup %3660  ;;  %v466_v52 = vpop.f32.mrf.mxu0  ;;  %3674 = vtanh.f32 %v1017_v44  ;;  %3339 = vmatprep.mubr.msk.f32.mxu0 %vm3939_vm2, %v3938_v0 }
 0x14f   :  { %v467_v53 = vadd.f32 %v5083_v4, %v466_v52  ;;  %v3663_v55 = vpop.eup %3662  ;;  %v1021_v56 = vpop.f32.mrf.mxu1  ;;  %3492 = vmatmul.mubr.msk.f32.gmra.mxu1 %vm83_vm1, %v1834_v45  ;;  %v1837_v45 = vld [vmem:[%s5742_s3 + $0x118] sm:$0xff] }
 0x150   :  { %v3031_v60 = vpop.f32.mrf.mxu0  ;;  %v5131_v61 = vadd.f32 %v3663_v55, %v3661_v46  ;;  %v1022_v1 = vadd.f32 %v5083_v4, %v1021_v56  ;;  %3494 = vmatprep.mubr.msk.f32.mxu1 %vm3939_vm2, %v3938_v0 }
 0x151   :  { %3676 = vtanh.f32 %v467_v53  ;;  %v3186_v5 = vpop.f32.mrf.mxu1  ;;  %3340 = vmatmul.mubr.msk.f32.gmra.mxu0 %vm83_vm1, %v1231_v54  ;;  %v1234_v54 = vld [vmem:[%s5741_s2 + $0x120] sm:$0xff] }
 0x152   :  { %v3665_v39 = vpop.eup %3664  ;;  %v471_v6 = vpop.f32.mrf.mxu0  ;;  %3678 = vtanh.f32 %v1022_v1  ;;  %3342 = vmatprep.mubr.msk.f32.mxu0 %vm3939_vm2, %v3938_v0 }
 0x153   :  { %v472_v7 = vadd.f32 %v5083_v4, %v471_v6  ;;  %v3667_v14 = vpop.eup %3666  ;;  %v1026_v15 = vpop.f32.mrf.mxu1  ;;  %3495 = vmatmul.mubr.msk.f32.gmra.mxu1 %vm83_vm1, %v1835_v2 }
 0x154   :  { %v3034_v16 = vpop.f32.mrf.mxu0  ;;  %v5147_v18 = vadd.f32 %v3667_v14, %v3665_v39  ;;  %v1027_v19 = vadd.f32 %v5083_v4, %v1026_v15  ;;  %3497 = vmatprep.mubr.msk.f32.mxu1 %vm3939_vm2, %v3938_v0  ;;  %v1838_v39 = vld [vmem:[%s5742_s3 + $0x120] sm:$0xff]  ;;  %v1235_v14 = vld [vmem:[%s5741_s2 + $0x128] sm:$0xff] }
 0x155   :  { %3680 = vtanh.f32 %v472_v7  ;;  %v3189_v26 = vpop.f32.mrf.mxu1  ;;  %3343 = vmatmul.mubr.msk.f32.gmra.mxu0 %vm83_vm1, %v1232_v11 }
 0x156   :  { %v3669_v24 = vpop.eup %3668  ;;  %v476_v29 = vpop.f32.mrf.mxu0  ;;  %3682 = vtanh.f32 %v1027_v19  ;;  %3345 = vmatprep.mubr.msk.f32.mxu0 %vm3939_vm2, %v3938_v0  ;;  %v1839_v26 = vld [vmem:[%s5742_s3 + $0x128] sm:$0xff] }
 0x157   :  { %v477_v31 = vadd.f32 %v5083_v4, %v476_v29  ;;  %v3671_v33 = vpop.eup %3670  ;;  %v1031_v36 = vpop.f32.mrf.mxu1  ;;  %3498 = vmatmul.mubr.msk.f32.gmra.mxu1 %vm83_vm1, %v1836_v23 }
 0x158   :  { %v3037_v37 = vpop.f32.mrf.mxu0  ;;  %v5163_v38 = vadd.f32 %v3671_v33, %v3669_v24  ;;  %v1032_v44 = vadd.f32 %v5083_v4, %v1031_v36  ;;  %3500 = vmatprep.mubr.msk.f32.mxu1 %vm3939_vm2, %v3938_v0  ;;  %v1236_v36 = vld [vmem:[%s5741_s2 + $0x130] sm:$0xff] }
 0x159   :  { %3684 = vtanh.f32 %v477_v31  ;;  %v3192_v50 = vpop.f32.mrf.mxu1  ;;  %3346 = vmatmul.mubr.msk.f32.gmra.mxu0 %vm83_vm1, %v1233_v32 }
 0x15a   :  { %v3673_v46 = vpop.eup %3672  ;;  %v481_v52 = vpop.f32.mrf.mxu0  ;;  %3686 = vtanh.f32 %v1032_v44  ;;  %3348 = vmatprep.mubr.msk.f32.mxu0 %vm3939_vm2, %v3938_v0 }
 0x15b   :  { %v482_v53 = vadd.f32 %v5083_v4, %v481_v52  ;;  %v3675_v55 = vpop.eup %3674  ;;  %v1036_v56 = vpop.f32.mrf.mxu1  ;;  %3501 = vmatmul.mubr.msk.f32.gmra.mxu1 %vm83_vm1, %v1837_v45  ;;  %v1840_v52 = vld [vmem:[%s5742_s3 + $0x130] sm:$0xff] }
 0x15c   :  { %v3040_v60 = vpop.f32.mrf.mxu0  ;;  %v5179_v1 = vadd.f32 %v3675_v55, %v3673_v46  ;;  %v1037_v2 = vadd.f32 %v5083_v4, %v1036_v56  ;;  %3503 = vmatprep.mubr.msk.f32.mxu1 %vm3939_vm2, %v3938_v0 }
 0x15d   :  { %3688 = vtanh.f32 %v482_v53  ;;  %v3195_v6 = vpop.f32.mrf.mxu1  ;;  %3349 = vmatmul.mubr.msk.f32.gmra.mxu0 %vm83_vm1, %v1234_v54  ;;  %v1237_v60 = vld [vmem:[%s5741_s2 + $0x138] sm:$0xff] }
 0x15e   :  { %v3677_v5 = vpop.eup %3676  ;;  %v486_v7 = vpop.f32.mrf.mxu0  ;;  %3690 = vtanh.f32 %v1037_v2  ;;  %3351 = vmatprep.mubr.msk.f32.mxu0 %vm3939_vm2, %v3938_v0 }
 0x15f   :  { %v487_v11 = vadd.f32 %v5083_v4, %v486_v7  ;;  %v3679_v15 = vpop.eup %3678  ;;  %v1041_v16 = vpop.f32.mrf.mxu1  ;;  %3504 = vmatmul.mubr.msk.f32.gmra.mxu1 %vm83_vm1, %v1838_v39 }
 0x160   :  { %v3043_v19 = vpop.f32.mrf.mxu0  ;;  %v5195_v23 = vadd.f32 %v3679_v15, %v3677_v5  ;;  %v1042_v24 = vadd.f32 %v5083_v4, %v1041_v16  ;;  %3506 = vmatprep.mubr.msk.f32.mxu1 %vm3939_vm2, %v3938_v0 }
 0x161   :  { %3692 = vtanh.f32 %v487_v11  ;;  %v3198_v31 = vpop.f32.mrf.mxu1  ;;  %3352 = vmatmul.mubr.msk.f32.gmra.mxu0 %vm83_vm1, %v1235_v14  ;;  %v1841_v11 = vld [vmem:[%s5742_s3 + $0x138] sm:$0xff] }
 0x162   :  { %v3681_v29 = vpop.eup %3680  ;;  %v491_v32 = vpop.f32.mrf.mxu0  ;;  %3694 = vtanh.f32 %v1042_v24  ;;  %3354 = vmatprep.mubr.msk.f32.mxu0 %vm3939_vm2, %v3938_v0  ;;  %v1238_v24 = vld [vmem:[%s5741_s2 + $0x140] sm:$0xff] }
 0x163   :  { %v492_v33 = vadd.f32 %v5083_v4, %v491_v32  ;;  %v3683_v37 = vpop.eup %3682  ;;  %v1046_v44 = vpop.f32.mrf.mxu1  ;;  %3507 = vmatmul.mubr.msk.f32.gmra.mxu1 %vm83_vm1, %v1839_v26 }
 0x164   :  { %v3046_v45 = vpop.f32.mrf.mxu0  ;;  %v5211_v46 = vadd.f32 %v3683_v37, %v3681_v29  ;;  %v1047_v50 = vadd.f32 %v5083_v4, %v1046_v44  ;;  %3509 = vmatprep.mubr.msk.f32.mxu1 %vm3939_vm2, %v3938_v0 }
 0x165   :  { %3696 = vtanh.f32 %v492_v33  ;;  %v3201_v54 = vpop.f32.mrf.mxu1  ;;  %3355 = vmatmul.mubr.msk.f32.gmra.mxu0 %vm83_vm1, %v1236_v36  ;;  %v1842_v36 = vld [vmem:[%s5742_s3 + $0x140] sm:$0xff] }
 0x166   :  { %v3685_v53 = vpop.eup %3684  ;;  %v496_v55 = vpop.f32.mrf.mxu0  ;;  %3698 = vtanh.f32 %v1047_v50  ;;  %3357 = vmatprep.mubr.msk.f32.mxu0 %vm3939_vm2, %v3938_v0 }
 0x167   :  { %v497_v56 = vadd.f32 %v5083_v4, %v496_v55  ;;  %v3687_v2 = vpop.eup %3686  ;;  %v1051_v39 = vpop.f32.mrf.mxu1  ;;  %3510 = vmatmul.mubr.msk.f32.gmra.mxu1 %vm83_vm1, %v1840_v52  ;;  %v1239_v52 = vld [vmem:[%s5741_s2 + $0x148] sm:$0xff] }
 0x168   :  { %v3049_v5 = vpop.f32.mrf.mxu0  ;;  %v5227_v6 = vadd.f32 %v3687_v2, %v3685_v53  ;;  %v1052_v7 = vadd.f32 %v5083_v4, %v1051_v39  ;;  %3512 = vmatprep.mubr.msk.f32.mxu1 %vm3939_vm2, %v3938_v0  ;;  %v1843_v2 = vld [vmem:[%s5742_s3 + $0x148] sm:$0xff] }
 0x169   :  { %3700 = vtanh.f32 %v497_v56  ;;  %v3204_v15 = vpop.f32.mrf.mxu1  ;;  %3358 = vmatmul.mubr.msk.f32.gmra.mxu0 %vm83_vm1, %v1237_v60 }
 0x16a   :  { %v3689_v14 = vpop.eup %3688  ;;  %v501_v16 = vpop.f32.mrf.mxu0  ;;  %3702 = vtanh.f32 %v1052_v7  ;;  %3360 = vmatprep.mubr.msk.f32.mxu0 %vm3939_vm2, %v3938_v0 }
 0x16b   :  { %v502_v19 = vadd.f32 %v5083_v4, %v501_v16  ;;  %v3691_v26 = vpop.eup %3690  ;;  %v1056_v29 = vpop.f32.mrf.mxu1  ;;  %3513 = vmatmul.mubr.msk.f32.gmra.mxu1 %vm83_vm1, %v1841_v11 }
 0x16c   :  { %v3052_v31 = vpop.f32.mrf.mxu0  ;;  %v5243_v32 = vadd.f32 %v3691_v26, %v3689_v14  ;;  %v1057_v33 = vadd.f32 %v5083_v4, %v1056_v29  ;;  %3515 = vmatprep.mubr.msk.f32.mxu1 %vm3939_vm2, %v3938_v0  ;;  %v1240_v14 = vld [vmem:[%s5741_s2 + $0x150] sm:$0xff] }
 0x16d   :  { %3704 = vtanh.f32 %v502_v19  ;;  %v3207_v44 = vpop.f32.mrf.mxu1  ;;  %3361 = vmatmul.mubr.msk.f32.gmra.mxu0 %vm83_vm1, %v1238_v24  ;;  %v1844_v29 = vld [vmem:[%s5742_s3 + $0x150] sm:$0xff] }
 0x16e   :  { %v3693_v37 = vpop.eup %3692  ;;  %v506_v45 = vpop.f32.mrf.mxu0  ;;  %3706 = vtanh.f32 %v1057_v33  ;;  %3363 = vmatprep.mubr.msk.f32.mxu0 %vm3939_vm2, %v3938_v0  ;;  %v1241_v44 = vld [vmem:[%s5741_s2 + $0x158] sm:$0xff] }
 0x16f   :  { %v507_v50 = vadd.f32 %v5083_v4, %v506_v45  ;;  %v3695_v53 = vpop.eup %3694  ;;  %v1061_v54 = vpop.f32.mrf.mxu1  ;;  %3516 = vmatmul.mubr.msk.f32.gmra.mxu1 %vm83_vm1, %v1842_v36 }
 0x170   :  { %v3055_v55 = vpop.f32.mrf.mxu0  ;;  %v5259_v56 = vadd.f32 %v3695_v53, %v3693_v37  ;;  %v1062_v60 = vadd.f32 %v5083_v4, %v1061_v54  ;;  %3518 = vmatprep.mubr.msk.f32.mxu1 %vm3939_vm2, %v3938_v0 }
 0x171   :  { %3708 = vtanh.f32 %v507_v50  ;;  %v3210_v5 = vpop.f32.mrf.mxu1  ;;  %3364 = vmatmul.mubr.msk.f32.gmra.mxu0 %vm83_vm1, %v1239_v52  ;;  %v1845_v55 = vld [vmem:[%s5742_s3 + $0x158] sm:$0xff] }
 0x172   :  { %v3697_v39 = vpop.eup %3696  ;;  %v511_v7 = vpop.f32.mrf.mxu0  ;;  %3710 = vtanh.f32 %v1062_v60  ;;  %3366 = vmatprep.mubr.msk.f32.mxu0 %vm3939_vm2, %v3938_v0 }
 0x173   :  { %v512_v11 = vadd.f32 %v5083_v4, %v511_v7  ;;  %v3699_v15 = vpop.eup %3698  ;;  %v1066_v16 = vpop.f32.mrf.mxu1  ;;  %3519 = vmatmul.mubr.msk.f32.gmra.mxu1 %vm83_vm1, %v1843_v2  ;;  %v1242_v7 = vld [vmem:[%s5741_s2 + $0x160] sm:$0xff] }
 0x174   :  { %v3058_v19 = vpop.f32.mrf.mxu0  ;;  %v5275_v24 = vadd.f32 %v3699_v15, %v3697_v39  ;;  %v1067_v26 = vadd.f32 %v5083_v4, %v1066_v16  ;;  %3521 = vmatprep.mubr.msk.f32.mxu1 %vm3939_vm2, %v3938_v0 }
 0x175   :  { %3712 = vtanh.f32 %v512_v11  ;;  %v3213_v33 = vpop.f32.mrf.mxu1  ;;  %3367 = vmatmul.mubr.msk.f32.gmra.mxu0 %vm83_vm1, %v1240_v14 }
 0x176   :  { %v3701_v31 = vpop.eup %3700  ;;  %v516_v36 = vpop.f32.mrf.mxu0  ;;  %3714 = vtanh.f32 %v1067_v26  ;;  %3369 = vmatprep.mubr.msk.f32.mxu0 %vm3939_vm2, %v3938_v0  ;;  %v1846_v26 = vld [vmem:[%s5742_s3 + $0x160] sm:$0xff] }
 0x177   :  { %v517_v37 = vadd.f32 %v5083_v4, %v516_v36  ;;  %v3703_v45 = vpop.eup %3702  ;;  %v1071_v50 = vpop.f32.mrf.mxu1  ;;  %3522 = vmatmul.mubr.msk.f32.gmra.mxu1 %vm83_vm1, %v1844_v29 }
 0x178   :  { %v3061_v52 = vpop.f32.mrf.mxu0  ;;  %v5291_v53 = vadd.f32 %v3703_v45, %v3701_v31  ;;  %v1072_v54 = vadd.f32 %v5083_v4, %v1071_v50  ;;  %3524 = vmatprep.mubr.msk.f32.mxu1 %vm3939_vm2, %v3938_v0 }
 0x179   :  { %3716 = vtanh.f32 %v517_v37  ;;  %v3216_v2 = vpop.f32.mrf.mxu1  ;;  %3370 = vmatmul.mubr.msk.f32.gmra.mxu0 %vm83_vm1, %v1241_v44  ;;  %v1243_v37 = vld [vmem:[%s5741_s2 + $0x168] sm:$0xff] }
 0x17a   :  { %v3705_v60 = vpop.eup %3704  ;;  %v521_v39 = vpop.f32.mrf.mxu0  ;;  %3718 = vtanh.f32 %v1072_v54  ;;  %3372 = vmatprep.mubr.msk.f32.mxu0 %vm3939_vm2, %v3938_v0 }
 0x17b   :  { %v522_v5 = vadd.f32 %v5083_v4, %v521_v39  ;;  %v3707_v11 = vpop.eup %3706  ;;  %v1076_v14 = vpop.f32.mrf.mxu1  ;;  %3525 = vmatmul.mubr.msk.f32.gmra.mxu1 %vm83_vm1, %v1845_v55  ;;  %v1847_v55 = vld [vmem:[%s5742_s3 + $0x168] sm:$0xff] }
 0x17c   :  { %v3064_v15 = vpop.f32.mrf.mxu0  ;;  %v5307_v16 = vadd.f32 %v3707_v11, %v3705_v60  ;;  %v1077_v19 = vadd.f32 %v5083_v4, %v1076_v14  ;;  %3527 = vmatprep.mubr.msk.f32.mxu1 %vm3939_vm2, %v3938_v0 }
 0x17d   :  { %3720 = vtanh.f32 %v522_v5  ;;  %v3219_v31 = vpop.f32.mrf.mxu1  ;;  %3373 = vmatmul.mubr.msk.f32.gmra.mxu0 %vm83_vm1, %v1242_v7  ;;  %v1244_v7 = vld [vmem:[%s5741_s2 + $0x170] sm:$0xff] }
 0x17e   :  { %v3709_v29 = vpop.eup %3708  ;;  %v526_v33 = vpop.f32.mrf.mxu0  ;;  %3722 = vtanh.f32 %v1077_v19  ;;  %3375 = vmatprep.mubr.msk.f32.mxu0 %vm3939_vm2, %v3938_v0 }
 0x17f   :  { %v527_v36 = vadd.f32 %v5083_v4, %v526_v33  ;;  %v3711_v44 = vpop.eup %3710  ;;  %v1081_v45 = vpop.f32.mrf.mxu1  ;;  %3528 = vmatmul.mubr.msk.f32.gmra.mxu1 %vm83_vm1, %v1846_v26 }
 0x180   :  { %v3067_v50 = vpop.f32.mrf.mxu0  ;;  %v5323_v52 = vadd.f32 %v3711_v44, %v3709_v29  ;;  %v1082_v54 = vadd.f32 %v5083_v4, %v1081_v45  ;;  %3530 = vmatprep.mubr.msk.f32.mxu1 %vm3939_vm2, %v3938_v0  ;;  %v1848_v29 = vld [vmem:[%s5742_s3 + $0x170] sm:$0xff]  ;;  %v1245_v44 = vld [vmem:[%s5741_s2 + $0x178] sm:$0xff] }
 0x181   :  { %3724 = vtanh.f32 %v527_v36  ;;  %v3222_v2 = vpop.f32.mrf.mxu1  ;;  %3376 = vmatmul.mubr.msk.f32.gmra.mxu0 %vm83_vm1, %v1243_v37 }
 0x182   :  { %v3713_v60 = vpop.eup %3712  ;;  %v531_v39 = vpop.f32.mrf.mxu0  ;;  %3726 = vtanh.f32 %v1082_v54  ;;  %3378 = vmatprep.mubr.msk.f32.mxu0 %vm3939_vm2, %v3938_v0  ;;  %v1849_v2 = vld [vmem:[%s5742_s3 + $0x178] sm:$0xff] }
 0x183   :  { %v532_v5 = vadd.f32 %v5083_v4, %v531_v39  ;;  %v3715_v11 = vpop.eup %3714  ;;  %v1086_v14 = vpop.f32.mrf.mxu1  ;;  %3531 = vmatmul.mubr.msk.f32.gmra.mxu1 %vm83_vm1, %v1847_v55 }
 0x184   :  { %v3070_v15 = vpop.f32.mrf.mxu0  ;;  %v5339_v19 = vadd.f32 %v3715_v11, %v3713_v60  ;;  %v1087_v26 = vadd.f32 %v5083_v4, %v1086_v14  ;;  %3533 = vmatprep.mubr.msk.f32.mxu1 %vm3939_vm2, %v3938_v0  ;;  %v1246_v14 = vld [vmem:[%s5741_s2 + $0x180] sm:$0xff] }
 0x185   :  { %3728 = vtanh.f32 %v532_v5  ;;  %v3225_v33 = vpop.f32.mrf.mxu1  ;;  %3379 = vmatmul.mubr.msk.f32.gmra.mxu0 %vm83_vm1, %v1244_v7 }
 0x186   :  { %v3717_v31 = vpop.eup %3716  ;;  %v536_v36 = vpop.f32.mrf.mxu0  ;;  %3730 = vtanh.f32 %v1087_v26  ;;  %3381 = vmatprep.mubr.msk.f32.mxu0 %vm3939_vm2, %v3938_v0 }
 0x187   :  { %v537_v37 = vadd.f32 %v5083_v4, %v536_v36  ;;  %v3719_v45 = vpop.eup %3718  ;;  %v1091_v50 = vpop.f32.mrf.mxu1  ;;  %3534 = vmatmul.mubr.msk.f32.gmra.mxu1 %vm83_vm1, %v1848_v29  ;;  %v1850_v36 = vld [vmem:[%s5742_s3 + $0x180] sm:$0xff] }
 0x188   :  { %v3073_v54 = vpop.f32.mrf.mxu0  ;;  %v5355_v55 = vadd.f32 %v3719_v45, %v3717_v31  ;;  %v1092_v60 = vadd.f32 %v5083_v4, %v1091_v50  ;;  %3536 = vmatprep.mubr.msk.f32.mxu1 %vm3939_vm2, %v3938_v0 }
 0x189   :  { %3732 = vtanh.f32 %v537_v37  ;;  %v3228_v5 = vpop.f32.mrf.mxu1  ;;  %3382 = vmatmul.mubr.msk.f32.gmra.mxu0 %vm83_vm1, %v1245_v44 }
 0x18a   :  { %v3721_v39 = vpop.eup %3720  ;;  %v541_v7 = vpop.f32.mrf.mxu0  ;;  %3734 = vtanh.f32 %v1092_v60  ;;  %3384 = vmatprep.mubr.msk.f32.mxu0 %vm3939_vm2, %v3938_v0 }
 0x18b   :  { %v542_v11 = vadd.f32 %v5083_v4, %v541_v7  ;;  %v3723_v15 = vpop.eup %3722  ;;  %v1096_v26 = vpop.f32.mrf.mxu1  ;;  %3537 = vmatmul.mubr.msk.f32.gmra.mxu1 %vm83_vm1, %v1849_v2 }
 0x18c   :  { %v3076_v29 = vpop.f32.mrf.mxu0  ;;  %v5371_v31 = vadd.f32 %v3723_v15, %v3721_v39  ;;  %v1097_v33 = vadd.f32 %v5083_v4, %v1096_v26  ;;  %3539 = vmatprep.mubr.msk.f32.mxu1 %vm3939_vm2, %v3938_v0 }
 0x18d   :  { %3736 = vtanh.f32 %v542_v11  ;;  %v3231_v44 = vpop.f32.mrf.mxu1  ;;  %3385 = vmatmul.mubr.msk.f32.gmra.mxu0 %vm83_vm1, %v1246_v14 }
 0x18e   :  { %v3725_v37 = vpop.eup %3724  ;;  %v1460_v45 = vpop.f32.mrf.mxu0  ;;  %3738 = vtanh.f32 %v1097_v33 }
 0x18f   :  { %v1461_v50 = vadd.f32 %v5083_v4, %v1460_v45  ;;  %v3727_v54 = vpop.eup %3726  ;;  %v2064_v60 = vpop.f32.mrf.mxu1  ;;  %3540 = vmatmul.mubr.msk.f32.gmra.mxu1 %vm83_vm1, %v1850_v36 }
 0x190   :  { %v3242_v2 = vpop.f32.mrf.mxu0  ;;  %v5382_v39 = vadd.f32 %v3727_v54, %v3725_v37  ;;  %v2065_v0 = vadd.f32 %v5083_v4, %v2064_v60 }
 0x191   :  { %3740 = vtanh.f32 %v1461_v50  ;;  %v3397_v7 = vpop.f32.mrf.mxu1 }
 0x192   :  { %v3729_v5 = vpop.eup %3728  ;;  %v1465_v11 = vpop.f32.mrf.mxu0  ;;  %3742 = vtanh.f32 %v2065_v0 }
 0x193   :  { %v1466_v15 = vadd.f32 %v5083_v4, %v1465_v11  ;;  %v3731_v14 = vpop.eup %3730  ;;  %v2069_v26 = vpop.f32.mrf.mxu1 }
 0x194   :  { %v3245_v29 = vpop.f32.mrf.mxu0  ;;  %v5386_v33 = vadd.f32 %v3731_v14, %v3729_v5  ;;  %v2070_v36 = vadd.f32 %v5083_v4, %v2069_v26 }
 0x195   :  { %3744 = vtanh.f32 %v1466_v15  ;;  %v3400_v37 = vpop.f32.mrf.mxu1 }
 0x196   :  { %v3733_v44 = vpop.eup %3732  ;;  %v1470_v45 = vpop.f32.mrf.mxu0  ;;  %3746 = vtanh.f32 %v2070_v36 }
 0x197   :  { %v1471_v50 = vadd.f32 %v5083_v4, %v1470_v45  ;;  %v3735_v54 = vpop.eup %3734  ;;  %v2074_v60 = vpop.f32.mrf.mxu1 }
 0x198   :  { %v3248_v2 = vpop.f32.mrf.mxu0  ;;  %v5390_v0 = vadd.f32 %v3735_v54, %v3733_v44  ;;  %v2075_v7 = vadd.f32 %v5083_v4, %v2074_v60 }
 0x199   :  { %3748 = vtanh.f32 %v1471_v50  ;;  %v3403_v5 = vpop.f32.mrf.mxu1 }
 0x19a   :  { %5744 = vst [vmem:[#allocation2_spill] sm:$0xff] %v5390_v0  ;;  %v3737_v11 = vpop.eup %3736  ;;  %v1475_v14 = vpop.f32.mrf.mxu0  ;;  %3750 = vtanh.f32 %v2075_v7 }
 0x19b   :  { %v1476_v15 = vadd.f32 %v5083_v4, %v1475_v14  ;;  %v3739_v26 = vpop.eup %3738  ;;  %v2079_v29 = vpop.f32.mrf.mxu1 }
 0x19c   :  { %v3251_v37 = vpop.f32.mrf.mxu0  ;;  %v5394_v36 = vadd.f32 %v3739_v26, %v3737_v11  ;;  %v2080_v45 = vadd.f32 %v5083_v4, %v2079_v29 }
 0x19d   :  { %3752 = vtanh.f32 %v1476_v15  ;;  %v3406_v44 = vpop.f32.mrf.mxu1 }
 0x19e   :  { %v3741_v2 = vpop.eup %3740  ;;  %v1480_v54 = vpop.f32.mrf.mxu0  ;;  %3754 = vtanh.f32 %v2080_v45 }
 0x19f   :  { %v1753_v50 = vadd.f32 %v3741_v2, %v4662_v17  ;;  %v1481_v60 = vadd.f32 %v5083_v4, %v1480_v54  ;;  %v3743_v5 = vpop.eup %3742  ;;  %v2084_v7 = vpop.f32.mrf.mxu1 }
 0x1a0   :  { %v3254_v0 = vpop.f32.mrf.mxu0  ;;  %v2085_v37 = vadd.f32 %v5083_v4, %v2084_v7 }
 0x1a1   :  { %v2357_v14 = vadd.f32 %v3743_v5, %v1753_v50  ;;  %3756 = vtanh.f32 %v1481_v60  ;;  %v3409_v15 = vpop.f32.mrf.mxu1 }
 0x1a2   :  { %v3745_v11 = vpop.eup %3744  ;;  %v1485_v26 = vpop.f32.mrf.mxu0  ;;  %3758 = vtanh.f32 %v2085_v37 }
 0x1a3   :  { %v2406_v29 = vmul.f32 0.25, %v2357_v14  ;;  %v1754_v44 = vadd.f32 %v3745_v11, %v4678_v28  ;;  %v1486_v17 = vadd.f32 %v5083_v4, %v1485_v26  ;;  %v3747_v45 = vpop.eup %3746  ;;  %v2089_v2 = vpop.f32.mrf.mxu1 }
 0x1a4   :  { %v3257_v54 = vpop.f32.mrf.mxu0  ;;  %v2090_v50 = vadd.f32 %v5083_v4, %v2089_v2 }
 0x1a5   :  { %2456 = vst.msk [vmem:[%s5743_s6] sm:$0xff] %vm2455_vm3, %v2406_v29  ;;  %v2358_v0 = vadd.f32 %v3747_v45, %v1754_v44  ;;  %3760 = vtanh.f32 %v1486_v17  ;;  %v3412_v5 = vpop.f32.mrf.mxu1 }
 0x1a6   :  { %v3749_v60 = vpop.eup %3748  ;;  %v1490_v7 = vpop.f32.mrf.mxu0  ;;  %3762 = vtanh.f32 %v2090_v50 }
 0x1a7   :  { %v2407_v14 = vmul.f32 0.25, %v2358_v0  ;;  %v1755_v28 = vadd.f32 %v3749_v60, %v4694_v40  ;;  %v1491_v37 = vadd.f32 %v5083_v4, %v1490_v7  ;;  %v3751_v11 = vpop.eup %3750  ;;  %v2094_v15 = vpop.f32.mrf.mxu1 }
 0x1a8   :  { %v3260_v26 = vpop.f32.mrf.mxu0  ;;  %v2095_v44 = vadd.f32 %v5083_v4, %v2094_v15 }
 0x1a9   :  { %2457 = vst.msk [vmem:[%s5743_s6 + $0x8] sm:$0xff] %vm2455_vm3, %v2407_v14  ;;  %v2359_v29 = vadd.f32 %v3751_v11, %v1755_v28  ;;  %3764 = vtanh.f32 %v1491_v37  ;;  %v3415_v45 = vpop.f32.mrf.mxu1 }
 0x1aa   :  { %v3753_v17 = vpop.eup %3752  ;;  %v1495_v2 = vpop.f32.mrf.mxu0  ;;  %3766 = vtanh.f32 %v2095_v44 }
 0x1ab   :  { %v2408_v54 = vmul.f32 0.25, %v2359_v29  ;;  %v1756_v40 = vadd.f32 %v3753_v17, %v4710_v51  ;;  %v1496_v0 = vadd.f32 %v5083_v4, %v1495_v2  ;;  %v3755_v50 = vpop.eup %3754  ;;  %v2099_v60 = vpop.f32.mrf.mxu1 }
 0x1ac   :  { %v3263_v5 = vpop.f32.mrf.mxu0  ;;  %v2100_v14 = vadd.f32 %v5083_v4, %v2099_v60 }
 0x1ad   :  { %2458 = vst.msk [vmem:[%s5743_s6 + $0x10] sm:$0xff] %vm2455_vm3, %v2408_v54  ;;  %v2360_v7 = vadd.f32 %v3755_v50, %v1756_v40  ;;  %3768 = vtanh.f32 %v1496_v0  ;;  %v3418_v37 = vpop.f32.mrf.mxu1 }
 0x1ae   :  { %v3757_v28 = vpop.eup %3756  ;;  %v1500_v11 = vpop.f32.mrf.mxu0  ;;  %3770 = vtanh.f32 %v2100_v14 }
 0x1af   :  { %v2409_v15 = vmul.f32 0.25, %v2360_v7  ;;  %v1757_v51 = vadd.f32 %v3757_v28, %v4726_v62  ;;  %v1501_v26 = vadd.f32 %v5083_v4, %v1500_v11  ;;  %v3759_v29 = vpop.eup %3758  ;;  %v2104_v44 = vpop.f32.mrf.mxu1 }
 0x1b0   :  { %v3266_v17 = vpop.f32.mrf.mxu0  ;;  %v2105_v2 = vadd.f32 %v5083_v4, %v2104_v44 }
 0x1b1   :  { %2459 = vst.msk [vmem:[%s5743_s6 + $0x18] sm:$0xff] %vm2455_vm3, %v2409_v15  ;;  %v2361_v45 = vadd.f32 %v3759_v29, %v1757_v51  ;;  %3772 = vtanh.f32 %v1501_v26  ;;  %v3421_v40 = vpop.f32.mrf.mxu1 }
 0x1b2   :  { %v3761_v54 = vpop.eup %3760  ;;  %v1505_v0 = vpop.f32.mrf.mxu0  ;;  %3774 = vtanh.f32 %v2105_v2 }
 0x1b3   :  { %v2410_v50 = vmul.f32 0.25, %v2361_v45  ;;  %v1758_v62 = vadd.f32 %v3761_v54, %v4742_v10  ;;  %v1506_v60 = vadd.f32 %v5083_v4, %v1505_v0  ;;  %v3763_v5 = vpop.eup %3762  ;;  %v2109_v7 = vpop.f32.mrf.mxu1 }
 0x1b4   :  { %v3269_v14 = vpop.f32.mrf.mxu0  ;;  %v2110_v37 = vadd.f32 %v5083_v4, %v2109_v7 }
 0x1b5   :  { %2460 = vst.msk [vmem:[%s5743_s6 + $0x20] sm:$0xff] %vm2455_vm3, %v2410_v50  ;;  %v2362_v28 = vadd.f32 %v3763_v5, %v1758_v62  ;;  %3776 = vtanh.f32 %v1506_v60  ;;  %v3424_v15 = vpop.f32.mrf.mxu1 }
 0x1b6   :  { %v3765_v11 = vpop.eup %3764  ;;  %v1510_v51 = vpop.f32.mrf.mxu0  ;;  %3778 = vtanh.f32 %v2110_v37 }
 0x1b7   :  { %v2411_v26 = vmul.f32 0.25, %v2362_v28  ;;  %v1759_v10 = vadd.f32 %v3765_v11, %v4758_v22  ;;  %v1511_v29 = vadd.f32 %v5083_v4, %v1510_v51  ;;  %v3767_v44 = vpop.eup %3766  ;;  %v2114_v17 = vpop.f32.mrf.mxu1 }
 0x1b8   :  { %v3272_v45 = vpop.f32.mrf.mxu0  ;;  %v2115_v54 = vadd.f32 %v5083_v4, %v2114_v17 }
 0x1b9   :  { %2461 = vst.msk [vmem:[%s5743_s6 + $0x28] sm:$0xff] %vm2455_vm3, %v2411_v26  ;;  %v2363_v2 = vadd.f32 %v3767_v44, %v1759_v10  ;;  %3780 = vtanh.f32 %v1511_v29  ;;  %v3427_v0 = vpop.f32.mrf.mxu1 }
 0x1ba   :  { %v3769_v40 = vpop.eup %3768  ;;  %v1515_v50 = vpop.f32.mrf.mxu0  ;;  %3782 = vtanh.f32 %v2115_v54 }
 0x1bb   :  { %v2412_v62 = vmul.f32 0.25, %v2363_v2  ;;  %v1760_v22 = vadd.f32 %v3769_v40, %v4774_v34  ;;  %v1516_v60 = vadd.f32 %v5083_v4, %v1515_v50  ;;  %v3771_v5 = vpop.eup %3770  ;;  %v2119_v7 = vpop.f32.mrf.mxu1 }
 0x1bc   :  { %v3275_v14 = vpop.f32.mrf.mxu0  ;;  %v2120_v37 = vadd.f32 %v5083_v4, %v2119_v7 }
 0x1bd   :  { %2462 = vst.msk [vmem:[%s5743_s6 + $0x30] sm:$0xff] %vm2455_vm3, %v2412_v62  ;;  %v2364_v28 = vadd.f32 %v3771_v5, %v1760_v22  ;;  %3784 = vtanh.f32 %v1516_v60  ;;  %v3430_v15 = vpop.f32.mrf.mxu1 }
 0x1be   :  { %v3773_v11 = vpop.eup %3772  ;;  %v1520_v51 = vpop.f32.mrf.mxu0  ;;  %3786 = vtanh.f32 %v2120_v37 }
 0x1bf   :  { %v2413_v26 = vmul.f32 0.25, %v2364_v28  ;;  %v1761_v34 = vadd.f32 %v3773_v11, %v4790_v47  ;;  %v1521_v10 = vadd.f32 %v5083_v4, %v1520_v51  ;;  %v3775_v29 = vpop.eup %3774  ;;  %v2124_v44 = vpop.f32.mrf.mxu1 }
 0x1c0   :  { %v3278_v17 = vpop.f32.mrf.mxu0  ;;  %v2125_v2 = vadd.f32 %v5083_v4, %v2124_v44 }
 0x1c1   :  { %2463 = vst.msk [vmem:[%s5743_s6 + $0x38] sm:$0xff] %vm2455_vm3, %v2413_v26  ;;  %v2365_v45 = vadd.f32 %v3775_v29, %v1761_v34  ;;  %3788 = vtanh.f32 %v1521_v10  ;;  %v3433_v40 = vpop.f32.mrf.mxu1 }
 0x1c2   :  { %v3777_v54 = vpop.eup %3776  ;;  %v1525_v0 = vpop.f32.mrf.mxu0  ;;  %3790 = vtanh.f32 %v2125_v2  ;;  %v5474_v40 = vld [vmem:[%s5740_s5] ss:$0 sm:$0xff] }
 0x1c3   :  { %v2414_v50 = vmul.f32 0.25, %v2365_v45  ;;  %v1762_v47 = vadd.f32 %v3777_v54, %v4806_v59  ;;  %v1526_v62 = vadd.f32 %v5083_v4, %v1525_v0  ;;  %v3779_v22 = vpop.eup %3778  ;;  %v2129_v60 = vpop.f32.mrf.mxu1 }
 0x1c4   :  { %v3281_v5 = vpop.f32.mrf.mxu0  ;;  %v2130_v14 = vadd.f32 %v5083_v4, %v2129_v60 }
 0x1c5   :  { %2464 = vst.msk [vmem:[%s5743_s6 + $0x40] sm:$0xff] %vm2455_vm3, %v2414_v50  ;;  %v2366_v7 = vadd.f32 %v3779_v22, %v1762_v47  ;;  %3792 = vtanh.f32 %v1526_v62  ;;  %v3436_v37 = vpop.f32.mrf.mxu1 }
 0x1c6   :  { %v3781_v28 = vpop.eup %3780  ;;  %v1530_v11 = vpop.f32.mrf.mxu0  ;;  %3794 = vtanh.f32 %v2130_v14 }
 0x1c7   :  { %v2415_v15 = vmul.f32 0.25, %v2366_v7  ;;  %v1763_v59 = vadd.f32 %v3781_v28, %v4822_v8  ;;  %v1531_v51 = vadd.f32 %v5083_v4, %v1530_v11  ;;  %v3783_v26 = vpop.eup %3782  ;;  %v2134_v34 = vpop.f32.mrf.mxu1 }
 0x1c8   :  { %v3284_v10 = vpop.f32.mrf.mxu0  ;;  %v2135_v44 = vadd.f32 %v5083_v4, %v2134_v34 }
 0x1c9   :  { %2465 = vst.msk [vmem:[%s5743_s6 + $0x48] sm:$0xff] %vm2455_vm3, %v2415_v15  ;;  %v2367_v29 = vadd.f32 %v3783_v26, %v1763_v59  ;;  %3796 = vtanh.f32 %v1531_v51  ;;  %v3439_v45 = vpop.f32.mrf.mxu1 }
 0x1ca   :  { %v3785_v17 = vpop.eup %3784  ;;  %v1535_v2 = vpop.f32.mrf.mxu0  ;;  %3798 = vtanh.f32 %v2135_v44 }
 0x1cb   :  { %v2416_v54 = vmul.f32 0.25, %v2367_v29  ;;  %v1764_v8 = vadd.f32 %v3785_v17, %v4838_v21  ;;  %v1536_v0 = vadd.f32 %v5474_v40, %v1535_v2  ;;  %v3787_v50 = vpop.eup %3786  ;;  %v2139_v47 = vpop.f32.mrf.mxu1 }
 0x1cc   :  { %v3287_v62 = vpop.f32.mrf.mxu0  ;;  %v2140_v21 = vadd.f32 %v5474_v40, %v2139_v47 }
 0x1cd   :  { %2466 = vst.msk [vmem:[%s5743_s6 + $0x50] sm:$0xff] %vm2455_vm3, %v2416_v54  ;;  %v2368_v4 = vadd.f32 %v3787_v50, %v1764_v8  ;;  %3800 = vtanh.f32 %v1536_v0  ;;  %v3442_v60 = vpop.f32.mrf.mxu1 }
 0x1ce   :  { %v3789_v22 = vpop.eup %3788  ;;  %v1540_v5 = vpop.f32.mrf.mxu0  ;;  %3802 = vtanh.f32 %v2140_v21 }
 0x1cf   :  { %v2417_v7 = vmul.f32 0.25, %v2368_v4  ;;  %v1765_v14 = vadd.f32 %v3789_v22, %v4854_v35  ;;  %v1541_v28 = vadd.f32 %v5474_v40, %v1540_v5  ;;  %v3791_v37 = vpop.eup %3790  ;;  %v2144_v11 = vpop.f32.mrf.mxu1 }
 0x1d0   :  { %v3290_v15 = vpop.f32.mrf.mxu0  ;;  %v2145_v51 = vadd.f32 %v5474_v40, %v2144_v11 }
 0x1d1   :  { %2467 = vst.msk [vmem:[%s5743_s6 + $0x58] sm:$0xff] %vm2455_vm3, %v2417_v7  ;;  %v2369_v59 = vadd.f32 %v3791_v37, %v1765_v14  ;;  %3804 = vtanh.f32 %v1541_v28  ;;  %v3445_v34 = vpop.f32.mrf.mxu1 }
 0x1d2   :  { %v3793_v26 = vpop.eup %3792  ;;  %v1545_v10 = vpop.f32.mrf.mxu0  ;;  %3806 = vtanh.f32 %v2145_v51 }
 0x1d3   :  { %v2418_v29 = vmul.f32 0.25, %v2369_v59  ;;  %v1766_v35 = vadd.f32 %v3793_v26, %v4870_v49  ;;  %v1546_v44 = vadd.f32 %v5474_v40, %v1545_v10  ;;  %v3795_v17 = vpop.eup %3794  ;;  %v2149_v45 = vpop.f32.mrf.mxu1 }
 0x1d4   :  { %v3293_v2 = vpop.f32.mrf.mxu0  ;;  %v2150_v8 = vadd.f32 %v5474_v40, %v2149_v45 }
 0x1d5   :  { %2468 = vst.msk [vmem:[%s5743_s6 + $0x60] sm:$0xff] %vm2455_vm3, %v2418_v29  ;;  %v2370_v54 = vadd.f32 %v3795_v17, %v1766_v35  ;;  %3808 = vtanh.f32 %v1546_v44  ;;  %v3448_v50 = vpop.f32.mrf.mxu1 }
 0x1d6   :  { %v3797_v0 = vpop.eup %3796  ;;  %v1550_v47 = vpop.f32.mrf.mxu0  ;;  %3810 = vtanh.f32 %v2150_v8 }
 0x1d7   :  { %v2419_v62 = vmul.f32 0.25, %v2370_v54  ;;  %v1767_v49 = vadd.f32 %v3797_v0, %v4886_v63  ;;  %v1551_v4 = vadd.f32 %v5474_v40, %v1550_v47  ;;  %v3799_v21 = vpop.eup %3798  ;;  %v2154_v22 = vpop.f32.mrf.mxu1 }
 0x1d8   :  { %v3296_v60 = vpop.f32.mrf.mxu0  ;;  %v2155_v7 = vadd.f32 %v5474_v40, %v2154_v22 }
 0x1d9   :  { %2469 = vst.msk [vmem:[%s5743_s6 + $0x68] sm:$0xff] %vm2455_vm3, %v2419_v62  ;;  %v2371_v5 = vadd.f32 %v3799_v21, %v1767_v49  ;;  %3812 = vtanh.f32 %v1551_v4  ;;  %v3451_v28 = vpop.f32.mrf.mxu1 }
 0x1da   :  { %v3801_v14 = vpop.eup %3800  ;;  %v1555_v37 = vpop.f32.mrf.mxu0  ;;  %3814 = vtanh.f32 %v2155_v7 }
 0x1db   :  { %v2420_v11 = vmul.f32 0.25, %v2371_v5  ;;  %v1768_v63 = vadd.f32 %v3801_v14, %v4902_v13  ;;  %v1556_v15 = vadd.f32 %v5474_v40, %v1555_v37  ;;  %v3803_v59 = vpop.eup %3802  ;;  %v2159_v51 = vpop.f32.mrf.mxu1 }
 0x1dc   :  { %v3299_v26 = vpop.f32.mrf.mxu0  ;;  %v2160_v10 = vadd.f32 %v5474_v40, %v2159_v51 }
 0x1dd   :  { %2470 = vst.msk [vmem:[%s5743_s6 + $0x70] sm:$0xff] %vm2455_vm3, %v2420_v11  ;;  %v2372_v34 = vadd.f32 %v3803_v59, %v1768_v63  ;;  %3816 = vtanh.f32 %v1556_v15  ;;  %v3454_v35 = vpop.f32.mrf.mxu1 }
 0x1de   :  { %v3805_v29 = vpop.eup %3804  ;;  %v1560_v44 = vpop.f32.mrf.mxu0  ;;  %3818 = vtanh.f32 %v2160_v10 }
 0x1df   :  { %v2421_v17 = vmul.f32 0.25, %v2372_v34  ;;  %v1769_v13 = vadd.f32 %v3805_v29, %v4918_v27  ;;  %v1561_v45 = vadd.f32 %v5474_v40, %v1560_v44  ;;  %v3807_v2 = vpop.eup %3806  ;;  %v2164_v54 = vpop.f32.mrf.mxu1 }
 0x1e0   :  { %v3302_v8 = vpop.f32.mrf.mxu0  ;;  %v2165_v50 = vadd.f32 %v5474_v40, %v2164_v54 }
 0x1e1   :  { %2471 = vst.msk [vmem:[%s5743_s6 + $0x78] sm:$0xff] %vm2455_vm3, %v2421_v17  ;;  %v2373_v0 = vadd.f32 %v3807_v2, %v1769_v13  ;;  %3820 = vtanh.f32 %v1561_v45  ;;  %v3457_v62 = vpop.f32.mrf.mxu1 }
 0x1e2   :  { %v3809_v47 = vpop.eup %3808  ;;  %v1565_v49 = vpop.f32.mrf.mxu0  ;;  %3822 = vtanh.f32 %v2165_v50 }
 0x1e3   :  { %v2422_v4 = vmul.f32 0.25, %v2373_v0  ;;  %v1770_v27 = vadd.f32 %v3809_v47, %v4934_v43  ;;  %v1566_v21 = vadd.f32 %v5474_v40, %v1565_v49  ;;  %v3811_v22 = vpop.eup %3810  ;;  %v2169_v60 = vpop.f32.mrf.mxu1 }
 0x1e4   :  { %v3305_v5 = vpop.f32.mrf.mxu0  ;;  %v2170_v14 = vadd.f32 %v5474_v40, %v2169_v60 }
 0x1e5   :  { %2472 = vst.msk [vmem:[%s5743_s6 + $0x80] sm:$0xff] %vm2455_vm3, %v2422_v4  ;;  %v2374_v7 = vadd.f32 %v3811_v22, %v1770_v27  ;;  %3824 = vtanh.f32 %v1566_v21  ;;  %v3460_v37 = vpop.f32.mrf.mxu1 }
 0x1e6   :  { %v3813_v28 = vpop.eup %3812  ;;  %v1570_v11 = vpop.f32.mrf.mxu0  ;;  %3826 = vtanh.f32 %v2170_v14 }
 0x1e7   :  { %v2423_v63 = vmul.f32 0.25, %v2374_v7  ;;  %v1771_v43 = vadd.f32 %v3813_v28, %v4950_v57  ;;  %v1571_v15 = vadd.f32 %v5474_v40, %v1570_v11  ;;  %v3815_v59 = vpop.eup %3814  ;;  %v2174_v51 = vpop.f32.mrf.mxu1 }
 0x1e8   :  { %v3308_v26 = vpop.f32.mrf.mxu0  ;;  %v2175_v10 = vadd.f32 %v5474_v40, %v2174_v51 }
 0x1e9   :  { %2473 = vst.msk [vmem:[%s5743_s6 + $0x88] sm:$0xff] %vm2455_vm3, %v2423_v63  ;;  %v2375_v34 = vadd.f32 %v3815_v59, %v1771_v43  ;;  %3828 = vtanh.f32 %v1571_v15  ;;  %v3463_v35 = vpop.f32.mrf.mxu1 }
 0x1ea   :  { %v3817_v29 = vpop.eup %3816  ;;  %v1575_v44 = vpop.f32.mrf.mxu0  ;;  %3830 = vtanh.f32 %v2175_v10 }
 0x1eb   :  { %v2424_v17 = vmul.f32 0.25, %v2375_v34  ;;  %v1772_v57 = vadd.f32 %v3817_v29, %v4966_v9  ;;  %v1576_v13 = vadd.f32 %v5474_v40, %v1575_v44  ;;  %v3819_v45 = vpop.eup %3818  ;;  %v2179_v2 = vpop.f32.mrf.mxu1 }
 0x1ec   :  { %v3311_v54 = vpop.f32.mrf.mxu0  ;;  %v2180_v0 = vadd.f32 %v5474_v40, %v2179_v2 }
 0x1ed   :  { %2474 = vst.msk [vmem:[%s5743_s6 + $0x90] sm:$0xff] %vm2455_vm3, %v2424_v17  ;;  %v2376_v8 = vadd.f32 %v3819_v45, %v1772_v57  ;;  %3832 = vtanh.f32 %v1576_v13  ;;  %v3466_v47 = vpop.f32.mrf.mxu1 }
 0x1ee   :  { %v3821_v50 = vpop.eup %3820  ;;  %v1580_v62 = vpop.f32.mrf.mxu0  ;;  %3834 = vtanh.f32 %v2180_v0 }
 0x1ef   :  { %v2425_v49 = vmul.f32 0.25, %v2376_v8  ;;  %v1773_v9 = vadd.f32 %v3821_v50, %v4982_v25  ;;  %v1581_v4 = vadd.f32 %v5474_v40, %v1580_v62  ;;  %v3823_v27 = vpop.eup %3822  ;;  %v2184_v21 = vpop.f32.mrf.mxu1 }
 0x1f0   :  { %v3314_v22 = vpop.f32.mrf.mxu0  ;;  %v2185_v5 = vadd.f32 %v5474_v40, %v2184_v21 }
 0x1f1   :  { %2475 = vst.msk [vmem:[%s5743_s6 + $0x98] sm:$0xff] %vm2455_vm3, %v2425_v49  ;;  %v2377_v60 = vadd.f32 %v3823_v27, %v1773_v9  ;;  %3836 = vtanh.f32 %v1581_v4  ;;  %v3469_v14 = vpop.f32.mrf.mxu1 }
 0x1f2   :  { %v3825_v7 = vpop.eup %3824  ;;  %v1585_v28 = vpop.f32.mrf.mxu0  ;;  %3838 = vtanh.f32 %v2185_v5 }
 0x1f3   :  { %v2426_v37 = vmul.f32 0.25, %v2377_v60  ;;  %v1774_v25 = vadd.f32 %v3825_v7, %v4998_v42  ;;  %v1586_v11 = vadd.f32 %v5474_v40, %v1585_v28  ;;  %v3827_v63 = vpop.eup %3826  ;;  %v2189_v43 = vpop.f32.mrf.mxu1 }
 0x1f4   :  { %v3317_v15 = vpop.f32.mrf.mxu0  ;;  %v2190_v51 = vadd.f32 %v5474_v40, %v2189_v43 }
 0x1f5   :  { %2476 = vst.msk [vmem:[%s5743_s6 + $0xa0] sm:$0xff] %vm2455_vm3, %v2426_v37  ;;  %v2378_v59 = vadd.f32 %v3827_v63, %v1774_v25  ;;  %3840 = vtanh.f32 %v1586_v11  ;;  %v3472_v34 = vpop.f32.mrf.mxu1 }
 0x1f6   :  { %v3829_v26 = vpop.eup %3828  ;;  %v1590_v10 = vpop.f32.mrf.mxu0  ;;  %3842 = vtanh.f32 %v2190_v51 }
 0x1f7   :  { %v2427_v29 = vmul.f32 0.25, %v2378_v59  ;;  %v1775_v42 = vadd.f32 %v3829_v26, %v5014_v58  ;;  %v1591_v35 = vadd.f32 %v5474_v40, %v1590_v10  ;;  %v3831_v44 = vpop.eup %3830  ;;  %v2194_v17 = vpop.f32.mrf.mxu1 }
 0x1f8   :  { %v3320_v57 = vpop.f32.mrf.mxu0  ;;  %v2195_v45 = vadd.f32 %v5474_v40, %v2194_v17 }
 0x1f9   :  { %2477 = vst.msk [vmem:[%s5743_s6 + $0xa8] sm:$0xff] %vm2455_vm3, %v2427_v29  ;;  %v2379_v13 = vadd.f32 %v3831_v44, %v1775_v42  ;;  %3844 = vtanh.f32 %v1591_v35  ;;  %v3475_v54 = vpop.f32.mrf.mxu1 }
 0x1fa   :  { %v3833_v2 = vpop.eup %3832  ;;  %v1595_v8 = vpop.f32.mrf.mxu0  ;;  %3846 = vtanh.f32 %v2195_v45 }
 0x1fb   :  { %v2428_v0 = vmul.f32 0.25, %v2379_v13  ;;  %v1776_v58 = vadd.f32 %v3833_v2, %v5030_v12  ;;  %v1596_v50 = vadd.f32 %v5474_v40, %v1595_v8  ;;  %v3835_v47 = vpop.eup %3834  ;;  %v2199_v62 = vpop.f32.mrf.mxu1 }
 0x1fc   :  { %v3323_v49 = vpop.f32.mrf.mxu0  ;;  %v2200_v4 = vadd.f32 %v5474_v40, %v2199_v62 }
 0x1fd   :  { %2478 = vst.msk [vmem:[%s5743_s6 + $0xb0] sm:$0xff] %vm2455_vm3, %v2428_v0  ;;  %v2380_v9 = vadd.f32 %v3835_v47, %v1776_v58  ;;  %3848 = vtanh.f32 %v1596_v50  ;;  %v3478_v21 = vpop.f32.mrf.mxu1 }
 0x1fe   :  { %v3837_v27 = vpop.eup %3836  ;;  %v1600_v22 = vpop.f32.mrf.mxu0  ;;  %3850 = vtanh.f32 %v2200_v4 }
 0x1ff   :  { %v2429_v60 = vmul.f32 0.25, %v2380_v9  ;;  %v1777_v12 = vadd.f32 %v3837_v27, %v5046_v30  ;;  %v1601_v5 = vadd.f32 %v5474_v40, %v1600_v22  ;;  %v3839_v7 = vpop.eup %3838  ;;  %v2204_v14 = vpop.f32.mrf.mxu1 }
 0x200   :  { %v3326_v28 = vpop.f32.mrf.mxu0  ;;  %v2205_v25 = vadd.f32 %v5474_v40, %v2204_v14 }
 0x201   :  { %2479 = vst.msk [vmem:[%s5743_s6 + $0xb8] sm:$0xff] %vm2455_vm3, %v2429_v60  ;;  %v2381_v37 = vadd.f32 %v3839_v7, %v1777_v12  ;;  %3852 = vtanh.f32 %v1601_v5  ;;  %v3481_v63 = vpop.f32.mrf.mxu1 }
 0x202   :  { %v3841_v11 = vpop.eup %3840  ;;  %v1605_v43 = vpop.f32.mrf.mxu0  ;;  %3854 = vtanh.f32 %v2205_v25 }
 0x203   :  { %v2430_v15 = vmul.f32 0.25, %v2381_v37  ;;  %v1778_v30 = vadd.f32 %v3841_v11, %v5062_v48  ;;  %v1606_v59 = vadd.f32 %v5474_v40, %v1605_v43  ;;  %v3843_v51 = vpop.eup %3842  ;;  %v2209_v26 = vpop.f32.mrf.mxu1 }
 0x204   :  { %v3329_v34 = vpop.f32.mrf.mxu0  ;;  %v2210_v29 = vadd.f32 %v5474_v40, %v2209_v26 }
 0x205   :  { %2480 = vst.msk [vmem:[%s5743_s6 + $0xc0] sm:$0xff] %vm2455_vm3, %v2430_v15  ;;  %v2382_v10 = vadd.f32 %v3843_v51, %v1778_v30  ;;  %3856 = vtanh.f32 %v1606_v59  ;;  %v3484_v35 = vpop.f32.mrf.mxu1 }
 0x206   :  { %v3845_v42 = vpop.eup %3844  ;;  %v1610_v44 = vpop.f32.mrf.mxu0  ;;  %3858 = vtanh.f32 %v2210_v29 }
 0x207   :  { %v2431_v17 = vmul.f32 0.25, %v2382_v10  ;;  %v1779_v48 = vadd.f32 %v3845_v42, %v5078_v3  ;;  %v1611_v57 = vadd.f32 %v5474_v40, %v1610_v44  ;;  %v3847_v13 = vpop.eup %3846  ;;  %v2214_v45 = vpop.f32.mrf.mxu1 }
 0x208   :  { %v3332_v2 = vpop.f32.mrf.mxu0  ;;  %v2215_v8 = vadd.f32 %v5474_v40, %v2214_v45 }
 0x209   :  { %2481 = vst.msk [vmem:[%s5743_s6 + $0xc8] sm:$0xff] %vm2455_vm3, %v2431_v17  ;;  %v2383_v54 = vadd.f32 %v3847_v13, %v1779_v48  ;;  %3860 = vtanh.f32 %v1611_v57  ;;  %v3487_v58 = vpop.f32.mrf.mxu1 }
 0x20a   :  { %v3849_v0 = vpop.eup %3848  ;;  %v1615_v50 = vpop.f32.mrf.mxu0  ;;  %3862 = vtanh.f32 %v2215_v8 }
 0x20b   :  { %v2432_v47 = vmul.f32 0.25, %v2383_v54  ;;  %v1780_v3 = vadd.f32 %v3849_v0, %v5099_v20  ;;  %v1616_v62 = vadd.f32 %v5474_v40, %v1615_v50  ;;  %v3851_v49 = vpop.eup %3850  ;;  %v2219_v9 = vpop.f32.mrf.mxu1 }
 0x20c   :  { %v3335_v4 = vpop.f32.mrf.mxu0  ;;  %v2220_v21 = vadd.f32 %v5474_v40, %v2219_v9 }
 0x20d   :  { %2482 = vst.msk [vmem:[%s5743_s6 + $0xd0] sm:$0xff] %vm2455_vm3, %v2432_v47  ;;  %v2384_v27 = vadd.f32 %v3851_v49, %v1780_v3  ;;  %3864 = vtanh.f32 %v1616_v62  ;;  %v3490_v60 = vpop.f32.mrf.mxu1 }
 0x20e   :  { %v3853_v22 = vpop.eup %3852  ;;  %v1620_v12 = vpop.f32.mrf.mxu0  ;;  %3866 = vtanh.f32 %v2220_v21 }
 0x20f   :  { %v2433_v5 = vmul.f32 0.25, %v2384_v27  ;;  %v1781_v20 = vadd.f32 %v3853_v22, %v5115_v41  ;;  %v1621_v7 = vadd.f32 %v5474_v40, %v1620_v12  ;;  %v3855_v14 = vpop.eup %3854  ;;  %v2224_v28 = vpop.f32.mrf.mxu1 }
 0x210   :  { %v3338_v37 = vpop.f32.mrf.mxu0  ;;  %v2225_v11 = vadd.f32 %v5474_v40, %v2224_v28 }
 0x211   :  { %2483 = vst.msk [vmem:[%s5743_s6 + $0xd8] sm:$0xff] %vm2455_vm3, %v2433_v5  ;;  %v2385_v25 = vadd.f32 %v3855_v14, %v1781_v20  ;;  %3868 = vtanh.f32 %v1621_v7  ;;  %v3493_v43 = vpop.f32.mrf.mxu1 }
 0x212   :  { %v3857_v63 = vpop.eup %3856  ;;  %v1625_v15 = vpop.f32.mrf.mxu0  ;;  %3870 = vtanh.f32 %v2225_v11 }
 0x213   :  { %v2434_v30 = vmul.f32 0.25, %v2385_v25  ;;  %v1782_v41 = vadd.f32 %v3857_v63, %v5131_v61  ;;  %v1626_v59 = vadd.f32 %v5474_v40, %v1625_v15  ;;  %v3859_v51 = vpop.eup %3858  ;;  %v2229_v26 = vpop.f32.mrf.mxu1 }
 0x214   :  { %v3341_v34 = vpop.f32.mrf.mxu0  ;;  %v2230_v29 = vadd.f32 %v5474_v40, %v2229_v26 }
 0x215   :  { %2484 = vst.msk [vmem:[%s5743_s6 + $0xe0] sm:$0xff] %vm2455_vm3, %v2434_v30  ;;  %v2386_v10 = vadd.f32 %v3859_v51, %v1782_v41  ;;  %3872 = vtanh.f32 %v1626_v59  ;;  %v3496_v35 = vpop.f32.mrf.mxu1 }
 0x216   :  { %v3861_v42 = vpop.eup %3860  ;;  %v1630_v44 = vpop.f32.mrf.mxu0  ;;  %3874 = vtanh.f32 %v2230_v29 }
 0x217   :  { %v2435_v17 = vmul.f32 0.25, %v2386_v10  ;;  %v1783_v61 = vadd.f32 %v3861_v42, %v5147_v18  ;;  %v1631_v48 = vadd.f32 %v5474_v40, %v1630_v44  ;;  %v3863_v57 = vpop.eup %3862  ;;  %v2234_v13 = vpop.f32.mrf.mxu1 }
 0x218   :  { %v3344_v45 = vpop.f32.mrf.mxu0  ;;  %v2235_v54 = vadd.f32 %v5474_v40, %v2234_v13 }
 0x219   :  { %2485 = vst.msk [vmem:[%s5743_s6 + $0xe8] sm:$0xff] %vm2455_vm3, %v2435_v17  ;;  %v2387_v2 = vadd.f32 %v3863_v57, %v1783_v61  ;;  %3876 = vtanh.f32 %v1631_v48  ;;  %v3499_v0 = vpop.f32.mrf.mxu1 }
 0x21a   :  { %v3865_v8 = vpop.eup %3864  ;;  %v1635_v58 = vpop.f32.mrf.mxu0  ;;  %3878 = vtanh.f32 %v2235_v54 }
 0x21b   :  { %v2436_v50 = vmul.f32 0.25, %v2387_v2  ;;  %v1784_v18 = vadd.f32 %v3865_v8, %v5163_v38  ;;  %v1636_v47 = vadd.f32 %v5474_v40, %v1635_v58  ;;  %v3867_v3 = vpop.eup %3866  ;;  %v2239_v62 = vpop.f32.mrf.mxu1 }
 0x21c   :  { %v3347_v49 = vpop.f32.mrf.mxu0  ;;  %v2240_v4 = vadd.f32 %v5474_v40, %v2239_v62 }
 0x21d   :  { %2486 = vst.msk [vmem:[%s5743_s6 + $0xf0] sm:$0xff] %vm2455_vm3, %v2436_v50  ;;  %v2388_v9 = vadd.f32 %v3867_v3, %v1784_v18  ;;  %3880 = vtanh.f32 %v1636_v47  ;;  %v3502_v21 = vpop.f32.mrf.mxu1 }
 0x21e   :  { %v3869_v27 = vpop.eup %3868  ;;  %v1640_v22 = vpop.f32.mrf.mxu0  ;;  %3882 = vtanh.f32 %v2240_v4 }
 0x21f   :  { %v2437_v60 = vmul.f32 0.25, %v2388_v9  ;;  %v1785_v38 = vadd.f32 %v3869_v27, %v5179_v1  ;;  %v1641_v12 = vadd.f32 %v5474_v40, %v1640_v22  ;;  %v3871_v5 = vpop.eup %3870  ;;  %v2244_v20 = vpop.f32.mrf.mxu1 }
 0x220   :  { %v3350_v7 = vpop.f32.mrf.mxu0  ;;  %v2245_v28 = vadd.f32 %v5474_v40, %v2244_v20 }
 0x221   :  { %2487 = vst.msk [vmem:[%s5743_s6 + $0xf8] sm:$0xff] %vm2455_vm3, %v2437_v60  ;;  %v2389_v14 = vadd.f32 %v3871_v5, %v1785_v38  ;;  %3884 = vtanh.f32 %v1641_v12  ;;  %v3505_v25 = vpop.f32.mrf.mxu1 }
 0x222   :  { %v3873_v37 = vpop.eup %3872  ;;  %v1645_v11 = vpop.f32.mrf.mxu0  ;;  %3886 = vtanh.f32 %v2245_v28 }
 0x223   :  { %v2438_v63 = vmul.f32 0.25, %v2389_v14  ;;  %v1786_v1 = vadd.f32 %v3873_v37, %v5195_v23  ;;  %v1646_v43 = vadd.f32 %v5474_v40, %v1645_v11  ;;  %v3875_v15 = vpop.eup %3874  ;;  %v2249_v30 = vpop.f32.mrf.mxu1 }
 0x224   :  { %v3353_v41 = vpop.f32.mrf.mxu0  ;;  %v2250_v51 = vadd.f32 %v5474_v40, %v2249_v30 }
 0x225   :  { %2488 = vst.msk [vmem:[%s5743_s6 + $0x100] sm:$0xff] %vm2455_vm3, %v2438_v63  ;;  %v2390_v59 = vadd.f32 %v3875_v15, %v1786_v1  ;;  %3888 = vtanh.f32 %v1646_v43  ;;  %v3508_v34 = vpop.f32.mrf.mxu1 }
 0x226   :  { %v3877_v26 = vpop.eup %3876  ;;  %v1650_v10 = vpop.f32.mrf.mxu0  ;;  %3890 = vtanh.f32 %v2250_v51 }
 0x227   :  { %v2439_v29 = vmul.f32 0.25, %v2390_v59  ;;  %v1787_v23 = vadd.f32 %v3877_v26, %v5211_v46  ;;  %v1651_v42 = vadd.f32 %v5474_v40, %v1650_v10  ;;  %v3879_v35 = vpop.eup %3878  ;;  %v2254_v44 = vpop.f32.mrf.mxu1 }
 0x228   :  { %v3356_v17 = vpop.f32.mrf.mxu0  ;;  %v2255_v48 = vadd.f32 %v5474_v40, %v2254_v44 }
 0x229   :  { %2489 = vst.msk [vmem:[%s5743_s6 + $0x108] sm:$0xff] %vm2455_vm3, %v2439_v29  ;;  %v2391_v61 = vadd.f32 %v3879_v35, %v1787_v23  ;;  %3892 = vtanh.f32 %v1651_v42  ;;  %v3511_v13 = vpop.f32.mrf.mxu1 }
 0x22a   :  { %v3881_v57 = vpop.eup %3880  ;;  %v1655_v45 = vpop.f32.mrf.mxu0  ;;  %3894 = vtanh.f32 %v2255_v48 }
 0x22b   :  { %v2440_v2 = vmul.f32 0.25, %v2391_v61  ;;  %v1788_v46 = vadd.f32 %v3881_v57, %v5227_v6  ;;  %v1656_v54 = vadd.f32 %v5474_v40, %v1655_v45  ;;  %v3883_v8 = vpop.eup %3882  ;;  %v2259_v0 = vpop.f32.mrf.mxu1 }
 0x22c   :  { %v3359_v58 = vpop.f32.mrf.mxu0  ;;  %v2260_v18 = vadd.f32 %v5474_v40, %v2259_v0 }
 0x22d   :  { %2490 = vst.msk [vmem:[%s5743_s6 + $0x110] sm:$0xff] %vm2455_vm3, %v2440_v2  ;;  %v2392_v50 = vadd.f32 %v3883_v8, %v1788_v46  ;;  %3896 = vtanh.f32 %v1656_v54  ;;  %v3514_v3 = vpop.f32.mrf.mxu1 }
 0x22e   :  { %v3885_v47 = vpop.eup %3884  ;;  %v1660_v62 = vpop.f32.mrf.mxu0  ;;  %3898 = vtanh.f32 %v2260_v18 }
 0x22f   :  { %v2441_v49 = vmul.f32 0.25, %v2392_v50  ;;  %v1789_v6 = vadd.f32 %v3885_v47, %v5243_v32  ;;  %v1661_v9 = vadd.f32 %v5474_v40, %v1660_v62  ;;  %v3887_v4 = vpop.eup %3886  ;;  %v2264_v27 = vpop.f32.mrf.mxu1 }
 0x230   :  { %v3362_v21 = vpop.f32.mrf.mxu0  ;;  %v2265_v60 = vadd.f32 %v5474_v40, %v2264_v27 }
 0x231   :  { %2491 = vst.msk [vmem:[%s5743_s6 + $0x118] sm:$0xff] %vm2455_vm3, %v2441_v49  ;;  %v2393_v22 = vadd.f32 %v3887_v4, %v1789_v6  ;;  %3900 = vtanh.f32 %v1661_v9  ;;  %v3517_v12 = vpop.f32.mrf.mxu1 }
 0x232   :  { %v3889_v38 = vpop.eup %3888  ;;  %v1665_v5 = vpop.f32.mrf.mxu0  ;;  %3902 = vtanh.f32 %v2265_v60 }
 0x233   :  { %v2442_v20 = vmul.f32 0.25, %v2393_v22  ;;  %v1790_v32 = vadd.f32 %v3889_v38, %v5259_v56  ;;  %v1666_v7 = vadd.f32 %v5474_v40, %v1665_v5  ;;  %v3891_v14 = vpop.eup %3890  ;;  %v2269_v28 = vpop.f32.mrf.mxu1 }
 0x234   :  { %v3365_v37 = vpop.f32.mrf.mxu0  ;;  %v2270_v11 = vadd.f32 %v5474_v40, %v2269_v28 }
 0x235   :  { %2492 = vst.msk [vmem:[%s5743_s6 + $0x120] sm:$0xff] %vm2455_vm3, %v2442_v20  ;;  %v2394_v25 = vadd.f32 %v3891_v14, %v1790_v32  ;;  %3904 = vtanh.f32 %v1666_v7  ;;  %v3520_v1 = vpop.f32.mrf.mxu1 }
 0x236   :  { %v3893_v63 = vpop.eup %3892  ;;  %v1670_v43 = vpop.f32.mrf.mxu0  ;;  %3906 = vtanh.f32 %v2270_v11 }
 0x237   :  { %v2443_v15 = vmul.f32 0.25, %v2394_v25  ;;  %v1791_v56 = vadd.f32 %v3893_v63, %v5275_v24  ;;  %v1671_v30 = vadd.f32 %v5474_v40, %v1670_v43  ;;  %v3895_v41 = vpop.eup %3894  ;;  %v2274_v59 = vpop.f32.mrf.mxu1 }
 0x238   :  { %v3368_v51 = vpop.f32.mrf.mxu0  ;;  %v2275_v34 = vadd.f32 %v5474_v40, %v2274_v59 }
 0x239   :  { %2493 = vst.msk [vmem:[%s5743_s6 + $0x128] sm:$0xff] %vm2455_vm3, %v2443_v15  ;;  %v2395_v26 = vadd.f32 %v3895_v41, %v1791_v56  ;;  %3908 = vtanh.f32 %v1671_v30  ;;  %v3523_v29 = vpop.f32.mrf.mxu1 }
 0x23a   :  { %v3897_v10 = vpop.eup %3896  ;;  %v1675_v23 = vpop.f32.mrf.mxu0  ;;  %3910 = vtanh.f32 %v2275_v34 }
 0x23b   :  { %v2444_v42 = vmul.f32 0.25, %v2395_v26  ;;  %v1792_v24 = vadd.f32 %v3897_v10, %v5291_v53  ;;  %v1676_v35 = vadd.f32 %v5474_v40, %v1675_v23  ;;  %v3899_v44 = vpop.eup %3898  ;;  %v2279_v17 = vpop.f32.mrf.mxu1 }
 0x23c   :  { %v3371_v61 = vpop.f32.mrf.mxu0  ;;  %v2280_v57 = vadd.f32 %v5474_v40, %v2279_v17 }
 0x23d   :  { %2494 = vst.msk [vmem:[%s5743_s6 + $0x130] sm:$0xff] %vm2455_vm3, %v2444_v42  ;;  %v2396_v48 = vadd.f32 %v3899_v44, %v1792_v24  ;;  %3912 = vtanh.f32 %v1676_v35  ;;  %v3526_v45 = vpop.f32.mrf.mxu1 }
 0x23e   :  { %v3901_v13 = vpop.eup %3900  ;;  %v1680_v2 = vpop.f32.mrf.mxu0  ;;  %3914 = vtanh.f32 %v2280_v57 }
 0x23f   :  { %v2445_v46 = vmul.f32 0.25, %v2396_v48  ;;  %v1793_v53 = vadd.f32 %v3901_v13, %v5307_v16  ;;  %v1681_v54 = vadd.f32 %v5474_v40, %v1680_v2  ;;  %v3903_v8 = vpop.eup %3902  ;;  %v2284_v0 = vpop.f32.mrf.mxu1 }
 0x240   :  { %v3374_v58 = vpop.f32.mrf.mxu0  ;;  %v2285_v18 = vadd.f32 %v5474_v40, %v2284_v0 }
 0x241   :  { %2495 = vst.msk [vmem:[%s5743_s6 + $0x138] sm:$0xff] %vm2455_vm3, %v2445_v46  ;;  %v2397_v50 = vadd.f32 %v3903_v8, %v1793_v53  ;;  %3916 = vtanh.f32 %v1681_v54  ;;  %v3529_v3 = vpop.f32.mrf.mxu1  ;;  %v5745_v8 = vld [vmem:[#allocation2_spill] sm:$0xff] }
 0x242   :  { %v3905_v47 = vpop.eup %3904  ;;  %v1685_v62 = vpop.f32.mrf.mxu0  ;;  %3918 = vtanh.f32 %v2285_v18 }
 0x243   :  { %v2446_v49 = vmul.f32 0.25, %v2397_v50  ;;  %v1794_v16 = vadd.f32 %v3905_v47, %v5323_v52  ;;  %v1686_v6 = vadd.f32 %v5474_v40, %v1685_v62  ;;  %v3907_v9 = vpop.eup %3906  ;;  %v2289_v4 = vpop.f32.mrf.mxu1 }
 0x244   :  { %v3377_v27 = vpop.f32.mrf.mxu0  ;;  %v2290_v22 = vadd.f32 %v5474_v40, %v2289_v4 }
 0x245   :  { %2496 = vst.msk [vmem:[%s5743_s6 + $0x140] sm:$0xff] %vm2455_vm3, %v2446_v49  ;;  %v2398_v21 = vadd.f32 %v3907_v9, %v1794_v16  ;;  %3920 = vtanh.f32 %v1686_v6  ;;  %v3532_v38 = vpop.f32.mrf.mxu1 }
 0x246   :  { %v3909_v60 = vpop.eup %3908  ;;  %v1690_v12 = vpop.f32.mrf.mxu0  ;;  %3922 = vtanh.f32 %v2290_v22 }
 0x247   :  { %v2447_v5 = vmul.f32 0.25, %v2398_v21  ;;  %v1795_v52 = vadd.f32 %v3909_v60, %v5339_v19  ;;  %v1691_v20 = vadd.f32 %v5474_v40, %v1690_v12  ;;  %v3911_v32 = vpop.eup %3910  ;;  %v2294_v7 = vpop.f32.mrf.mxu1 }
 0x248   :  { %v3380_v14 = vpop.f32.mrf.mxu0  ;;  %v2295_v37 = vadd.f32 %v5474_v40, %v2294_v7 }
 0x249   :  { %2497 = vst.msk [vmem:[%s5743_s6 + $0x148] sm:$0xff] %vm2455_vm3, %v2447_v5  ;;  %v2399_v28 = vadd.f32 %v3911_v32, %v1795_v52  ;;  %3924 = vtanh.f32 %v1691_v20  ;;  %v3535_v11 = vpop.f32.mrf.mxu1 }
 0x24a   :  { %v3913_v25 = vpop.eup %3912  ;;  %v1695_v63 = vpop.f32.mrf.mxu0  ;;  %3926 = vtanh.f32 %v2295_v37 }
 0x24b   :  { %v2448_v1 = vmul.f32 0.25, %v2399_v28  ;;  %v1796_v19 = vadd.f32 %v3913_v25, %v5355_v55  ;;  %v1696_v43 = vadd.f32 %v5474_v40, %v1695_v63  ;;  %v3915_v15 = vpop.eup %3914  ;;  %v2299_v56 = vpop.f32.mrf.mxu1 }
 0x24c   :  { %v3383_v30 = vpop.f32.mrf.mxu0  ;;  %v2300_v59 = vadd.f32 %v5474_v40, %v2299_v56 }
 0x24d   :  { %2498 = vst.msk [vmem:[%s5743_s6 + $0x150] sm:$0xff] %vm2455_vm3, %v2448_v1  ;;  %v2400_v41 = vadd.f32 %v3915_v15, %v1796_v19  ;;  %3928 = vtanh.f32 %v1696_v43  ;;  %v3538_v26 = vpop.f32.mrf.mxu1 }
 0x24e   :  { %v3917_v51 = vpop.eup %3916  ;;  %v1700_v34 = vpop.f32.mrf.mxu0  ;;  %3930 = vtanh.f32 %v2300_v59 }
 0x24f   :  { %v2449_v10 = vmul.f32 0.25, %v2400_v41  ;;  %v1797_v55 = vadd.f32 %v3917_v51, %v5371_v31  ;;  %v1701_v29 = vadd.f32 %v5474_v40, %v1700_v34  ;;  %v3919_v23 = vpop.eup %3918  ;;  %v2304_v42 = vpop.f32.mrf.mxu1 }
 0x250   :  { %v3386_v24 = vpop.f32.mrf.mxu0  ;;  %v2305_v44 = vadd.f32 %v5474_v40, %v2304_v42 }
 0x251   :  { %2499 = vst.msk [vmem:[%s5743_s6 + $0x158] sm:$0xff] %vm2455_vm3, %v2449_v10  ;;  %v2401_v35 = vadd.f32 %v3919_v23, %v1797_v55  ;;  %3932 = vtanh.f32 %v1701_v29  ;;  %v3541_v61 = vpop.f32.mrf.mxu1 }
 0x252   :  { %v3921_v17 = vpop.eup %3920  ;;  %3934 = vtanh.f32 %v2305_v44 }
 0x253   :  { %v2450_v48 = vmul.f32 0.25, %v2401_v35  ;;  %v1798_v31 = vadd.f32 %v3921_v17, %v5382_v39  ;;  %v3923_v57 = vpop.eup %3922 }
 0x255   :  { %2500 = vst.msk [vmem:[%s5743_s6 + $0x160] sm:$0xff] %vm2455_vm3, %v2450_v48  ;;  %v2402_v13 = vadd.f32 %v3923_v57, %v1798_v31 }
 0x256   :  { %v3925_v45 = vpop.eup %3924 }
 0x257   :  { %v2451_v2 = vmul.f32 0.25, %v2402_v13  ;;  %v1799_v46 = vadd.f32 %v3925_v45, %v5386_v33  ;;  %v3927_v53 = vpop.eup %3926 }
 0x259   :  { %2501 = vst.msk [vmem:[%s5743_s6 + $0x168] sm:$0xff] %vm2455_vm3, %v2451_v2  ;;  %v2403_v40 = vadd.f32 %v3927_v53, %v1799_v46 }
 0x25a   :  { %v3929_v39 = vpop.eup %3928 }
 0x25b   :  { %v2452_v54 = vmul.f32 0.25, %v2403_v40  ;;  %v1800_v0 = vadd.f32 %v3929_v39, %v5745_v8  ;;  %v3931_v58 = vpop.eup %3930 }
 0x25d   :  { %2502 = vst.msk [vmem:[%s5743_s6 + $0x170] sm:$0xff] %vm2455_vm3, %v2452_v54  ;;  %v2404_v50 = vadd.f32 %v3931_v58, %v1800_v0 }
 0x25e   :  { %v3933_v18 = vpop.eup %3932 }
 0x25f   :  { %v2453_v33 = vmul.f32 0.25, %v2404_v50  ;;  %v1801_v47 = vadd.f32 %v3933_v18, %v5394_v36  ;;  %v3935_v3 = vpop.eup %3934 }
 0x261   :  { %2503 = vst.msk [vmem:[%s5743_s6 + $0x178] sm:$0xff] %vm2455_vm3, %v2453_v33  ;;  %v2405_v62 = vadd.f32 %v3935_v3, %v1801_v47 }
 0x263   :  { %v2454_v49 = vmul.f32 0.25, %v2405_v62 }
 0x265   :  { %2504 = vst.msk [vmem:[%s5743_s6 + $0x180] sm:$0xff] %vm2455_vm3, %v2454_v49 }

// kernel: _lambda_.4
= control target key start
LH: loop header
LB: loop body
LE: loop exit
PB: predicated region body
PF: predicated region fallthrough
CT: control target
= control target key end

     0   :  { %v753_v0 = vmov 0.0   ;;  %vm85_vm0 = vcmask 1045504   ;;  %vm63_vm1 = vcmask 179200   ;;  %vm650_vm2 = vcmask 130048   ;;  %s1299_s4 = inlined_call_operand.vmem [shape: f32[150,16], index: 4, kind: input, shape index: {}]   ;;  %s1300_s0 = inlined_call_operand.vmem [shape: f32[50,150], index: 0, kind: input, shape index: {}]   ;;  %s1301_s1 = inlined_call_operand.vmem [shape: f32[50,150], index: 1, kind: input, shape index: {}]   ;;  %s1302_s2 = inlined_call_operand.vmem [shape: f32[50,150], index: 2, kind: input, shape index: {}]   ;;  %s1303_s3 = inlined_call_operand.vmem [shape: f32[50,150], index: 3, kind: input, shape index: {}]   ;;  %s1304_s5 = inlined_call_operand.vmem [shape: f32[1,16], index: 5, kind: input, shape index: {}]   ;;  %s1305_s6 = inlined_call_operand.vmem [shape: f32[50,16], index: 6, kind: output, shape index: {}]  }
   0x1   :  { %89 = vmatprep.subr.mxu0 %v753_v0  ;;  %231 = vmatprep.subr.mxu1 %v753_v0  ;;  %v794_v1 = vld [vmem:[%s1299_s4 + $0x78] sm:$0xff]  ;;  %v799_v2 = vld [vmem:[%s1299_s4 + $0x70] sm:$0xff]  ;;  %v808_v3 = vld [vmem:[%s1299_s4 + $0x68] sm:$0xff]  ;;  %vm657_vm3 = vcmask 123904  }
   0x2   :  { %90 = vmatpush1.msra.mxu0 %v794_v1  ;;  %232 = vmatpush1.msra.mxu1 %v794_v1  ;;  %v817_v4 = vld [vmem:[%s1299_s4 + $0x60] sm:$0xff]  ;;  %v826_v5 = vld [vmem:[%s1299_s4 + $0x58] sm:$0xff]  ;;  %v835_v6 = vld [vmem:[%s1299_s4 + $0x50] sm:$0xff] }
   0x3   :  { %91 = vmatprep.subr.mxu0 %v753_v0  ;;  %233 = vmatprep.subr.mxu1 %v753_v0  ;;  %v844_v7 = vld [vmem:[%s1299_s4 + $0x48] sm:$0xff]  ;;  %v853_v8 = vld [vmem:[%s1299_s4 + $0x40] sm:$0xff]  ;;  %v862_v9 = vld [vmem:[%s1299_s4 + $0x38] sm:$0xff] }
   0x4   :  { %92 = vmatpush1.msra.mxu0 %v799_v2  ;;  %234 = vmatpush1.msra.mxu1 %v799_v2  ;;  %v871_v10 = vld [vmem:[%s1299_s4 + $0x30] sm:$0xff]  ;;  %v880_v11 = vld [vmem:[%s1299_s4 + $0x28] sm:$0xff]  ;;  %v889_v12 = vld [vmem:[%s1299_s4 + $0x20] sm:$0xff] }
   0x5   :  { %93 = vmatprep.subr.mxu0 %v753_v0  ;;  %235 = vmatprep.subr.mxu1 %v753_v0  ;;  %v898_v13 = vld [vmem:[%s1299_s4 + $0x18] sm:$0xff]  ;;  %v907_v14 = vld [vmem:[%s1299_s4 + $0x10] sm:$0xff]  ;;  %v916_v15 = vld [vmem:[%s1299_s4 + $0x8] sm:$0xff] }
   0x6   :  { %94 = vmatpush1.msra.mxu0 %v808_v3  ;;  %236 = vmatpush1.msra.mxu1 %v808_v3  ;;  %v925_v16 = vld [vmem:[%s1299_s4] sm:$0xff]  ;;  %v934_v17 = vld [vmem:[%s1299_s4 + $0x90] sm:$0x3f]  ;;  %v943_v18 = vld [vmem:[%s1299_s4 + $0x88] sm:$0xff] }
   0x7   :  { %95 = vmatprep.subr.mxu0 %v753_v0  ;;  %237 = vmatprep.subr.mxu1 %v753_v0  ;;  %v954_v19 = vld [vmem:[%s1299_s4 + $0x80] sm:$0xff]  ;;  %v44_v20 = vld [vmem:[%s1300_s0 + $0x8] sm:$0xff]  ;;  %v46_v24 = vld [vmem:[%s1300_s0 + $0x18] sm:$0xff] }
   0x8   :  { %96 = vmatpush1.msra.mxu0 %v817_v4  ;;  %238 = vmatpush1.msra.mxu1 %v817_v4  ;;  %v43_v21 = vld [vmem:[%s1300_s0] sm:$0xff]  ;;  %v197_v22 = vld [vmem:[%s1301_s1 + $0x8] sm:$0xff]  ;;  %v45_v25 = vld [vmem:[%s1300_s0 + $0x10] sm:$0xff] }
   0x9   :  { %97 = vmatprep.subr.mxu0 %v753_v0  ;;  %239 = vmatprep.subr.mxu1 %v753_v0  ;;  %v196_v23 = vld [vmem:[%s1301_s1] sm:$0xff]  ;;  %v199_v26 = vld [vmem:[%s1301_s1 + $0x18] sm:$0xff]  ;;  %v198_v27 = vld [vmem:[%s1301_s1 + $0x10] sm:$0xff] }
   0xa   :  { %98 = vmatpush1.msra.mxu0 %v826_v5  ;;  %240 = vmatpush1.msra.mxu1 %v826_v5  ;;  %v48_v28 = vld [vmem:[%s1300_s0 + $0x28] sm:$0xff]  ;;  %v47_v29 = vld [vmem:[%s1300_s0 + $0x20] sm:$0xff]  ;;  %v50_v32 = vld [vmem:[%s1300_s0 + $0x38] sm:$0xff] }
   0xb   :  { %99 = vmatprep.subr.mxu0 %v753_v0  ;;  %241 = vmatprep.subr.mxu1 %v753_v0  ;;  %v201_v30 = vld [vmem:[%s1301_s1 + $0x28] sm:$0xff]  ;;  %v200_v31 = vld [vmem:[%s1301_s1 + $0x20] sm:$0xff]  ;;  %v49_v33 = vld [vmem:[%s1300_s0 + $0x30] sm:$0xff] }
   0xc   :  { %100 = vmatpush1.msra.mxu0 %v835_v6  ;;  %242 = vmatpush1.msra.mxu1 %v835_v6  ;;  %v203_v34 = vld [vmem:[%s1301_s1 + $0x38] sm:$0xff]  ;;  %v202_v35 = vld [vmem:[%s1301_s1 + $0x30] sm:$0xff]  ;;  %v52_v36 = vld [vmem:[%s1300_s0 + $0x48] sm:$0xff] }
   0xd   :  { %101 = vmatprep.subr.mxu0 %v753_v0  ;;  %243 = vmatprep.subr.mxu1 %v753_v0  ;;  %v51_v37 = vld [vmem:[%s1300_s0 + $0x40] sm:$0xff]  ;;  %v205_v38 = vld [vmem:[%s1301_s1 + $0x48] sm:$0xff]  ;;  %v54_v40 = vld [vmem:[%s1300_s0 + $0x58] sm:$0xff] }
   0xe   :  { %102 = vmatpush1.msra.mxu0 %v844_v7  ;;  %244 = vmatpush1.msra.mxu1 %v844_v7  ;;  %v204_v39 = vld [vmem:[%s1301_s1 + $0x40] sm:$0xff]  ;;  %v53_v41 = vld [vmem:[%s1300_s0 + $0x50] sm:$0xff]  ;;  %v207_v42 = vld [vmem:[%s1301_s1 + $0x58] sm:$0xff] }
   0xf   :  { %103 = vmatprep.subr.mxu0 %v753_v0  ;;  %245 = vmatprep.subr.mxu1 %v753_v0  ;;  %v206_v43 = vld [vmem:[%s1301_s1 + $0x50] sm:$0xff]  ;;  %v56_v44 = vld [vmem:[%s1300_s0 + $0x68] sm:$0x3]  ;;  %v55_v45 = vld [vmem:[%s1300_s0 + $0x60] sm:$0x3] }
  0x10   :  { %104 = vmatpush1.msra.mxu0 %v853_v8  ;;  %246 = vmatpush1.msra.mxu1 %v853_v8  ;;  %v209_v46 = vld [vmem:[%s1301_s1 + $0x68] sm:$0x3]  ;;  %v208_v47 = vld [vmem:[%s1301_s1 + $0x60] sm:$0x3]  ;;  %v348_v52 = vld [vmem:[%s1302_s2 + $0x18] sm:$0xff] }
  0x11   :  { %105 = vmatprep.subr.mxu0 %v753_v0  ;;  %247 = vmatprep.subr.mxu1 %v753_v0  ;;  %v346_v48 = vld [vmem:[%s1302_s2 + $0x8] sm:$0xff]  ;;  %v345_v50 = vld [vmem:[%s1302_s2] sm:$0xff]  ;;  %v497_v53 = vld [vmem:[%s1303_s3 + $0x18] sm:$0xff] }
  0x12   :  { %106 = vmatpush1.msra.mxu0 %v862_v9  ;;  %248 = vmatpush1.msra.mxu1 %v862_v9  ;;  %v495_v49 = vld [vmem:[%s1303_s3 + $0x8] sm:$0xff]  ;;  %v494_v51 = vld [vmem:[%s1303_s3] sm:$0xff]  ;;  %v347_v54 = vld [vmem:[%s1302_s2 + $0x10] sm:$0xff] }
  0x13   :  { %107 = vmatprep.subr.mxu0 %v753_v0  ;;  %249 = vmatprep.subr.mxu1 %v753_v0  ;;  %v496_v55 = vld [vmem:[%s1303_s3 + $0x10] sm:$0xff]  ;;  %v350_v56 = vld [vmem:[%s1302_s2 + $0x28] sm:$0xff]  ;;  %v349_v58 = vld [vmem:[%s1302_s2 + $0x20] sm:$0xff] }
  0x14   :  { %108 = vmatpush1.msra.mxu0 %v871_v10  ;;  %250 = vmatpush1.msra.mxu1 %v871_v10  ;;  %v499_v57 = vld [vmem:[%s1303_s3 + $0x28] sm:$0xff]  ;;  %v498_v59 = vld [vmem:[%s1303_s3 + $0x20] sm:$0xff]  ;;  %v352_v60 = vld [vmem:[%s1302_s2 + $0x38] sm:$0xff] }
  0x15   :  { %109 = vmatprep.subr.mxu0 %v753_v0  ;;  %251 = vmatprep.subr.mxu1 %v753_v0  ;;  %v501_v61 = vld [vmem:[%s1303_s3 + $0x38] sm:$0xff]  ;;  %v351_v62 = vld [vmem:[%s1302_s2 + $0x30] sm:$0xff] }
  0x16   :  { %110 = vmatpush1.msra.mxu0 %v880_v11  ;;  %252 = vmatpush1.msra.mxu1 %v880_v11  ;;  %v500_v63 = vld [vmem:[%s1303_s3 + $0x30] sm:$0xff] }
  0x17   :  { %111 = vmatprep.subr.mxu0 %v753_v0  ;;  %253 = vmatprep.subr.mxu1 %v753_v0 }
  0x18   :  { %112 = vmatpush1.msra.mxu0 %v889_v12  ;;  %254 = vmatpush1.msra.mxu1 %v889_v12 }
  0x19   :  { %113 = vmatprep.subr.mxu0 %v753_v0  ;;  %255 = vmatprep.subr.mxu1 %v753_v0 }
  0x1a   :  { %114 = vmatpush1.msra.mxu0 %v898_v13  ;;  %256 = vmatpush1.msra.mxu1 %v898_v13 }
  0x1b   :  { %115 = vmatprep.subr.mxu0 %v753_v0  ;;  %257 = vmatprep.subr.mxu1 %v753_v0 }
  0x1c   :  { %116 = vmatpush1.msra.mxu0 %v907_v14  ;;  %258 = vmatpush1.msra.mxu1 %v907_v14 }
  0x1d   :  { %117 = vmatprep.subr.mxu0 %v753_v0  ;;  %259 = vmatprep.subr.mxu1 %v753_v0 }
  0x1e   :  { %118 = vmatpush1.msra.mxu0 %v916_v15  ;;  %260 = vmatpush1.msra.mxu1 %v916_v15 }
  0x1f   :  { %119 = vmatprep.subr.mxu0 %v753_v0  ;;  %261 = vmatprep.subr.mxu1 %v753_v0 }
  0x20   :  { %120 = vmatpush1.msra.mxu0 %v925_v16  ;;  %262 = vmatpush1.msra.mxu1 %v925_v16 }
  0x21   :  { %147 = vmatprep.subr.mxu0 %v753_v0  ;;  %289 = vmatprep.subr.mxu1 %v753_v0 }
  0x22   :  { %664 = vmatpush2.msk.msra.mxu0 %vm85_vm0, %v934_v17  ;;  %672 = vmatpush2.msk.msra.mxu1 %vm85_vm0, %v934_v17 }
  0x23   :  { %149 = vmatprep.subr.mxu0 %v753_v0  ;;  %291 = vmatprep.subr.mxu1 %v753_v0 }
  0x24   :  { %150 = vmatpush2.msra.mxu0 %v943_v18  ;;  %292 = vmatpush2.msra.mxu1 %v943_v18 }
  0x25   :  { %151 = vmatprep.subr.mxu0 %v753_v0  ;;  %293 = vmatprep.subr.mxu1 %v753_v0 }
  0x26   :  { %152 = vmatpush2.msra.mxu0 %v954_v19  ;;  %665 = vmatprep.mubr.msk.f32.mxu0 %vm63_vm1, %v44_v20 }
  0x27   :  { %294 = vmatpush2.msra.mxu1 %v954_v19  ;;  %154 = vmatmul.mubr.f32.vlgmr.msra.gmra.mxu0 %v43_v21 }
  0x28   :  { %673 = vmatprep.mubr.msk.f32.mxu1 %vm63_vm1, %v197_v22  ;;  %380 = vmatprep.subr.mxu0 %v753_v0 }
  0x29   :  { %529 = vmatprep.subr.mxu1 %v753_v0  ;;  %296 = vmatmul.mubr.f32.vlgmr.msra.gmra.mxu1 %v196_v23 }
  0x2a   :  { %381 = vmatpush1.msra.mxu0 %v794_v1  ;;  %530 = vmatpush1.msra.mxu1 %v794_v1  ;;  %v503_v1 = vld [vmem:[%s1303_s3 + $0x48] sm:$0xff] }
  0x2b   :  { %382 = vmatprep.subr.mxu0 %v753_v0  ;;  %531 = vmatprep.subr.mxu1 %v753_v0 }
  0x2c   :  { %383 = vmatpush1.msra.mxu0 %v799_v2  ;;  %532 = vmatpush1.msra.mxu1 %v799_v2  ;;  %v353_v2 = vld [vmem:[%s1302_s2 + $0x40] sm:$0xff] }
  0x2d   :  { %384 = vmatprep.subr.mxu0 %v753_v0  ;;  %533 = vmatprep.subr.mxu1 %v753_v0 }
  0x2e   :  { %385 = vmatpush1.msra.mxu0 %v808_v3  ;;  %534 = vmatpush1.msra.mxu1 %v808_v3  ;;  %v502_v3 = vld [vmem:[%s1303_s3 + $0x40] sm:$0xff] }
  0x2f   :  { %386 = vmatprep.subr.mxu0 %v753_v0  ;;  %535 = vmatprep.subr.mxu1 %v753_v0 }
  0x30   :  { %387 = vmatpush1.msra.mxu0 %v817_v4  ;;  %536 = vmatpush1.msra.mxu1 %v817_v4  ;;  %v356_v4 = vld [vmem:[%s1302_s2 + $0x58] sm:$0xff] }
  0x31   :  { %388 = vmatprep.subr.mxu0 %v753_v0  ;;  %537 = vmatprep.subr.mxu1 %v753_v0 }
  0x32   :  { %389 = vmatpush1.msra.mxu0 %v826_v5  ;;  %538 = vmatpush1.msra.mxu1 %v826_v5  ;;  %v505_v5 = vld [vmem:[%s1303_s3 + $0x58] sm:$0xff] }
  0x33   :  { %390 = vmatprep.subr.mxu0 %v753_v0  ;;  %539 = vmatprep.subr.mxu1 %v753_v0 }
  0x34   :  { %666 = vmatprep.mubr.msk.f32.mxu0 %vm63_vm1, %v46_v24  ;;  %391 = vmatpush1.msra.mxu0 %v835_v6 }
  0x35   :  { %540 = vmatpush1.msra.mxu1 %v835_v6  ;;  %159 = vmatmul.mubr.f32.gmra.mxu0 %v45_v25  ;;  %v355_v6 = vld [vmem:[%s1302_s2 + $0x50] sm:$0xff] }
  0x36   :  { %392 = vmatprep.subr.mxu0 %v753_v0  ;;  %541 = vmatprep.subr.mxu1 %v753_v0 }
  0x37   :  { %674 = vmatprep.mubr.msk.f32.mxu1 %vm63_vm1, %v199_v26  ;;  %393 = vmatpush1.msra.mxu0 %v844_v7 }
  0x38   :  { %542 = vmatpush1.msra.mxu1 %v844_v7  ;;  %394 = vmatprep.subr.mxu0 %v753_v0  ;;  %v504_v7 = vld [vmem:[%s1303_s3 + $0x50] sm:$0xff] }
  0x39   :  { %301 = vmatmul.mubr.f32.gmra.mxu1 %v198_v27  ;;  %543 = vmatprep.subr.mxu1 %v753_v0 }
  0x3a   :  { %667 = vmatprep.mubr.msk.f32.mxu0 %vm63_vm1, %v48_v28  ;;  %395 = vmatpush1.msra.mxu0 %v853_v8 }
  0x3b   :  { %544 = vmatpush1.msra.mxu1 %v853_v8  ;;  %164 = vmatmul.mubr.f32.gmra.mxu0 %v47_v29  ;;  %v358_v8 = vld [vmem:[%s1302_s2 + $0x68] sm:$0x3] }
  0x3c   :  { %396 = vmatprep.subr.mxu0 %v753_v0  ;;  %545 = vmatprep.subr.mxu1 %v753_v0 }
  0x3d   :  { %675 = vmatprep.mubr.msk.f32.mxu1 %vm63_vm1, %v201_v30  ;;  %397 = vmatpush1.msra.mxu0 %v862_v9 }
  0x3e   :  { %546 = vmatpush1.msra.mxu1 %v862_v9  ;;  %398 = vmatprep.subr.mxu0 %v753_v0  ;;  %v507_v9 = vld [vmem:[%s1303_s3 + $0x68] sm:$0x3] }
  0x3f   :  { %306 = vmatmul.mubr.f32.gmra.mxu1 %v200_v31  ;;  %547 = vmatprep.subr.mxu1 %v753_v0 }
  0x40   :  { %668 = vmatprep.mubr.msk.f32.mxu0 %vm63_vm1, %v50_v32  ;;  %399 = vmatpush1.msra.mxu0 %v871_v10 }
  0x41   :  { %548 = vmatpush1.msra.mxu1 %v871_v10  ;;  %169 = vmatmul.mubr.f32.gmra.mxu0 %v49_v33  ;;  %v357_v10 = vld [vmem:[%s1302_s2 + $0x60] sm:$0x3] }
  0x42   :  { %400 = vmatprep.subr.mxu0 %v753_v0  ;;  %549 = vmatprep.subr.mxu1 %v753_v0 }
  0x43   :  { %676 = vmatprep.mubr.msk.f32.mxu1 %vm63_vm1, %v203_v34  ;;  %401 = vmatpush1.msra.mxu0 %v880_v11 }
  0x44   :  { %550 = vmatpush1.msra.mxu1 %v880_v11  ;;  %402 = vmatprep.subr.mxu0 %v753_v0  ;;  %v506_v11 = vld [vmem:[%s1303_s3 + $0x60] sm:$0x3] }
  0x45   :  { %311 = vmatmul.mubr.f32.gmra.mxu1 %v202_v35  ;;  %551 = vmatprep.subr.mxu1 %v753_v0  ;;  %v1239_v35 = vld [vmem:[%s1304_s5] ss:$0 sm:$0xff] }
  0x46   :  { %669 = vmatprep.mubr.msk.f32.mxu0 %vm63_vm1, %v52_v36  ;;  %403 = vmatpush1.msra.mxu0 %v889_v12 }
  0x47   :  { %552 = vmatpush1.msra.mxu1 %v889_v12  ;;  %174 = vmatmul.mubr.f32.gmra.mxu0 %v51_v37 }
  0x48   :  { %404 = vmatprep.subr.mxu0 %v753_v0  ;;  %553 = vmatprep.subr.mxu1 %v753_v0 }
  0x49   :  { %677 = vmatprep.mubr.msk.f32.mxu1 %vm63_vm1, %v205_v38  ;;  %405 = vmatpush1.msra.mxu0 %v898_v13 }
  0x4a   :  { %554 = vmatpush1.msra.mxu1 %v898_v13  ;;  %406 = vmatprep.subr.mxu0 %v753_v0 }
  0x4b   :  { %316 = vmatmul.mubr.f32.gmra.mxu1 %v204_v39  ;;  %555 = vmatprep.subr.mxu1 %v753_v0 }
  0x4c   :  { %670 = vmatprep.mubr.msk.f32.mxu0 %vm63_vm1, %v54_v40  ;;  %407 = vmatpush1.msra.mxu0 %v907_v14 }
  0x4d   :  { %556 = vmatpush1.msra.mxu1 %v907_v14  ;;  %179 = vmatmul.mubr.f32.gmra.mxu0 %v53_v41 }
  0x4e   :  { %408 = vmatprep.subr.mxu0 %v753_v0  ;;  %557 = vmatprep.subr.mxu1 %v753_v0 }
  0x4f   :  { %678 = vmatprep.mubr.msk.f32.mxu1 %vm63_vm1, %v207_v42  ;;  %409 = vmatpush1.msra.mxu0 %v916_v15 }
  0x50   :  { %558 = vmatpush1.msra.mxu1 %v916_v15  ;;  %410 = vmatprep.subr.mxu0 %v753_v0 }
  0x51   :  { %321 = vmatmul.mubr.f32.gmra.mxu1 %v206_v43  ;;  %559 = vmatprep.subr.mxu1 %v753_v0 }
  0x52   :  { %671 = vmatprep.mubr.msk.f32.mxu0 %vm63_vm1, %v56_v44  ;;  %411 = vmatpush1.msra.mxu0 %v925_v16 }
  0x53   :  { %560 = vmatpush1.msra.mxu1 %v925_v16  ;;  %184 = vmatmul.mubr.f32.gmra.mxu0 %v55_v45 }
  0x54   :  { %438 = vmatprep.subr.mxu0 %v753_v0  ;;  %587 = vmatprep.subr.mxu1 %v753_v0 }
  0x55   :  { %679 = vmatprep.mubr.msk.f32.mxu1 %vm63_vm1, %v209_v46  ;;  %680 = vmatpush2.msk.msra.mxu0 %vm85_vm0, %v934_v17 }
  0x56   :  { %688 = vmatpush2.msk.msra.mxu1 %vm85_vm0, %v934_v17  ;;  %440 = vmatprep.subr.mxu0 %v753_v0 }
  0x57   :  { %326 = vmatmul.mubr.f32.gmra.mxu1 %v208_v47  ;;  %589 = vmatprep.subr.mxu1 %v753_v0 }
  0x58   :  { %441 = vmatpush2.msra.mxu0 %v943_v18  ;;  %590 = vmatpush2.msra.mxu1 %v943_v18 }
  0x59   :  { %442 = vmatprep.subr.mxu0 %v753_v0  ;;  %591 = vmatprep.subr.mxu1 %v753_v0  ;;  %v354_v0 = vld [vmem:[%s1302_s2 + $0x48] sm:$0xff] }
  0x5a   :  { %443 = vmatpush2.msra.mxu0 %v954_v19  ;;  %681 = vmatprep.mubr.msk.f32.mxu0 %vm63_vm1, %v346_v48 }
  0x5b   :  { %592 = vmatpush2.msra.mxu1 %v954_v19  ;;  %689 = vmatprep.mubr.msk.f32.mxu1 %vm63_vm1, %v495_v49 }
  0x5c   :  { %445 = vmatmul.mubr.f32.vlgmr.msra.gmra.mxu0 %v345_v50  ;;  %594 = vmatmul.mubr.f32.vlgmr.msra.gmra.mxu1 %v494_v51 }
  0x5d   :  { %682 = vmatprep.mubr.msk.f32.mxu0 %vm63_vm1, %v348_v52  ;;  %690 = vmatprep.mubr.msk.f32.mxu1 %vm63_vm1, %v497_v53 }
  0x60   :  { %450 = vmatmul.mubr.f32.gmra.mxu0 %v347_v54  ;;  %599 = vmatmul.mubr.f32.gmra.mxu1 %v496_v55 }
  0x61   :  { %683 = vmatprep.mubr.msk.f32.mxu0 %vm63_vm1, %v350_v56  ;;  %691 = vmatprep.mubr.msk.f32.mxu1 %vm63_vm1, %v499_v57 }
  0x64   :  { %455 = vmatmul.mubr.f32.gmra.mxu0 %v349_v58  ;;  %604 = vmatmul.mubr.f32.gmra.mxu1 %v498_v59 }
  0x65   :  { %684 = vmatprep.mubr.msk.f32.mxu0 %vm63_vm1, %v352_v60  ;;  %692 = vmatprep.mubr.msk.f32.mxu1 %vm63_vm1, %v501_v61 }
  0x68   :  { %460 = vmatmul.mubr.f32.gmra.mxu0 %v351_v62  ;;  %609 = vmatmul.mubr.f32.gmra.mxu1 %v500_v63 }
  0x69   :  { %685 = vmatprep.mubr.msk.f32.mxu0 %vm63_vm1, %v354_v0  ;;  %693 = vmatprep.mubr.msk.f32.mxu1 %vm63_vm1, %v503_v1 }
  0x6c   :  { %465 = vmatmul.mubr.f32.gmra.mxu0 %v353_v2  ;;  %614 = vmatmul.mubr.f32.gmra.mxu1 %v502_v3 }
  0x6d   :  { %686 = vmatprep.mubr.msk.f32.mxu0 %vm63_vm1, %v356_v4  ;;  %694 = vmatprep.mubr.msk.f32.mxu1 %vm63_vm1, %v505_v5 }
  0x70   :  { %470 = vmatmul.mubr.f32.gmra.mxu0 %v355_v6  ;;  %619 = vmatmul.mubr.f32.gmra.mxu1 %v504_v7 }
  0x71   :  { %687 = vmatprep.mubr.msk.f32.mxu0 %vm63_vm1, %v358_v8  ;;  %695 = vmatprep.mubr.msk.f32.mxu1 %vm63_vm1, %v507_v9 }
  0x74   :  { %475 = vmatmul.mubr.f32.gmra.mxu0 %v357_v10  ;;  %624 = vmatmul.mubr.f32.gmra.mxu1 %v506_v11 }
  0xe7   :  { %v155_v12 = vpop.f32.mrf.mxu0 }
  0xe8   :  { %v156_v39 = vadd.f32 %v1239_v35, %v155_v12 }
  0xe9   :  { %v297_v13 = vpop.f32.mrf.mxu1  ;;  %v157_v14 = vpop.f32.mrf.mxu0 }
  0xea   :  { %v298_v40 = vadd.f32 %v1239_v35, %v297_v13  ;;  %697 = vtanh.f32 %v156_v39 }
  0xeb   :  { %v299_v15 = vpop.f32.mrf.mxu1 }
  0xec   :  { %699 = vtanh.f32 %v298_v40 }
  0xf5   :  { %v160_v16 = vpop.f32.mrf.mxu0 }
  0xf6   :  { %v161_v42 = vadd.f32 %v1239_v35, %v160_v16 }
  0xf7   :  { %v162_v17 = vpop.f32.mrf.mxu0  ;;  %v698_v6 = vpop.eup %697 }
  0xf8   :  { %701 = vtanh.f32 %v161_v42 }
  0xf9   :  { %v302_v18 = vpop.f32.mrf.mxu1  ;;  %v700_v7 = vpop.eup %699 }
  0xfa   :  { %v303_v43 = vadd.f32 %v1239_v35, %v302_v18 }
  0xfb   :  { %v165_v19 = vpop.f32.mrf.mxu0  ;;  %v304_v20 = vpop.f32.mrf.mxu1 }
  0xfc   :  { %v166_v45 = vadd.f32 %v1239_v35, %v165_v19  ;;  %703 = vtanh.f32 %v303_v43  ;;  %v338_v19 = vadd.f32 %v700_v7, %v698_v6 }
  0xfd   :  { %v167_v21 = vpop.f32.mrf.mxu0 }
  0xfe   :  { %705 = vtanh.f32 %v166_v45 }
  0xff   :  { %v307_v22 = vpop.f32.mrf.mxu1 }
 0x100   :  { %v308_v48 = vadd.f32 %v1239_v35, %v307_v22 }
 0x101   :  { %v170_v23 = vpop.f32.mrf.mxu0  ;;  %v309_v24 = vpop.f32.mrf.mxu1 }
 0x102   :  { %v171_v51 = vadd.f32 %v1239_v35, %v170_v23 }
 0x103   :  { %v172_v25 = vpop.f32.mrf.mxu0 }
 0x105   :  { %v312_v26 = vpop.f32.mrf.mxu1  ;;  %v702_v10 = vpop.eup %701 }
 0x106   :  { %v313_v56 = vadd.f32 %v1239_v35, %v312_v26 }
 0x107   :  { %v175_v27 = vpop.f32.mrf.mxu0  ;;  %v314_v28 = vpop.f32.mrf.mxu1 }
 0x108   :  { %v176_v59 = vadd.f32 %v1239_v35, %v175_v27 }
 0x109   :  { %v177_v29 = vpop.f32.mrf.mxu0  ;;  %v704_v14 = vpop.eup %703 }
 0x10b   :  { %v317_v30 = vpop.f32.mrf.mxu1  ;;  %v706_v18 = vpop.eup %705 }
 0x10c   :  { %v318_v0 = vadd.f32 %v1239_v35, %v317_v30 }
 0x10d   :  { %v180_v31 = vpop.f32.mrf.mxu0  ;;  %v319_v32 = vpop.f32.mrf.mxu1 }
 0x10e   :  { %v181_v3 = vadd.f32 %v1239_v35, %v180_v31  ;;  %v339_v32 = vadd.f32 %v704_v14, %v702_v10 }
 0x10f   :  { %v182_v33 = vpop.f32.mrf.mxu0 }
 0x111   :  { %v322_v34 = vpop.f32.mrf.mxu1 }
 0x112   :  { %v323_v11 = vadd.f32 %v1239_v35, %v322_v34 }
 0x113   :  { %v185_v36 = vpop.f32.mrf.mxu0  ;;  %v324_v37 = vpop.f32.mrf.mxu1 }
 0x114   :  { %v186_v15 = vadd.f32 %v1239_v35, %v185_v36 }
 0x115   :  { %v187_v38 = vpop.f32.mrf.mxu0 }
 0x117   :  { %v1243_v41 = vpop.f32.mrf.mxu1 }
 0x118   :  { %v328_v28 = vadd.f32 %v1239_v35, %v1243_v41 }
 0x119   :  { %v329_v44 = vpop.f32.mrf.mxu1 }
 0x11c   :  { %v446_v46 = vpop.f32.mrf.mxu0  ;;  %v595_v47 = vpop.f32.mrf.mxu1 }
 0x11d   :  { %v447_v49 = vadd.f32 %v1239_v35, %v446_v46  ;;  %v596_v50 = vadd.f32 %v1239_v35, %v595_v47 }
 0x11e   :  { %v448_v52 = vpop.f32.mrf.mxu0  ;;  %v597_v53 = vpop.f32.mrf.mxu1 }
 0x11f   :  { %707 = vtanh.f32 %v447_v49 }
 0x120   :  { %709 = vtanh.f32 %v596_v50  ;;  %v451_v54 = vpop.f32.mrf.mxu0  ;;  %v600_v55 = vpop.f32.mrf.mxu1 }
 0x121   :  { %711 = vtanh.f32 %v308_v48  ;;  %v452_v57 = vadd.f32 %v1239_v35, %v451_v54  ;;  %v601_v58 = vadd.f32 %v1239_v35, %v600_v55 }
 0x122   :  { %713 = vtanh.f32 %v171_v51  ;;  %v453_v60 = vpop.f32.mrf.mxu0  ;;  %v602_v61 = vpop.f32.mrf.mxu1 }
 0x123   :  { %715 = vtanh.f32 %v452_v57 }
 0x124   :  { %717 = vtanh.f32 %v601_v58  ;;  %v456_v62 = vpop.f32.mrf.mxu0  ;;  %v605_v63 = vpop.f32.mrf.mxu1 }
 0x125   :  { %719 = vtanh.f32 %v313_v56  ;;  %v457_v1 = vadd.f32 %v1239_v35, %v456_v62  ;;  %v606_v2 = vadd.f32 %v1239_v35, %v605_v63 }
 0x126   :  { %721 = vtanh.f32 %v176_v59  ;;  %v458_v4 = vpop.f32.mrf.mxu0  ;;  %v607_v5 = vpop.f32.mrf.mxu1 }
 0x127   :  { %723 = vtanh.f32 %v457_v1 }
 0x128   :  { %725 = vtanh.f32 %v606_v2  ;;  %v461_v8 = vpop.f32.mrf.mxu0  ;;  %v610_v9 = vpop.f32.mrf.mxu1 }
 0x129   :  { %727 = vtanh.f32 %v318_v0  ;;  %v462_v12 = vadd.f32 %v1239_v35, %v461_v8  ;;  %v611_v13 = vadd.f32 %v1239_v35, %v610_v9 }
 0x12a   :  { %729 = vtanh.f32 %v181_v3  ;;  %v463_v16 = vpop.f32.mrf.mxu0  ;;  %v612_v17 = vpop.f32.mrf.mxu1 }
 0x12b   :  { %731 = vtanh.f32 %v462_v12 }
 0x12c   :  { %v708_v20 = vpop.eup %707  ;;  %733 = vtanh.f32 %v611_v13  ;;  %v466_v21 = vpop.f32.mrf.mxu0 }
 0x12d   :  { %v615_v22 = vpop.f32.mrf.mxu1  ;;  %v710_v23 = vpop.eup %709  ;;  %735 = vtanh.f32 %v323_v11  ;;  %v487_v24 = vadd.f32 %v708_v20, %v338_v19  ;;  %v467_v25 = vadd.f32 %v1239_v35, %v466_v21 }
 0x12e   :  { %v616_v26 = vadd.f32 %v1239_v35, %v615_v22  ;;  %v712_v27 = vpop.eup %711  ;;  %737 = vtanh.f32 %v186_v15  ;;  %v468_v29 = vpop.f32.mrf.mxu0 }
 0x12f   :  { %v617_v30 = vpop.f32.mrf.mxu1  ;;  %v714_v31 = vpop.eup %713  ;;  %v636_v33 = vadd.f32 %v710_v23, %v487_v24  ;;  %739 = vtanh.f32 %v467_v25  ;;  %v340_v47 = vadd.f32 %v712_v27, %v706_v18 }
 0x130   :  { %v716_v34 = vpop.eup %715  ;;  %741 = vtanh.f32 %v616_v26  ;;  %v471_v36 = vpop.f32.mrf.mxu0 }
 0x131   :  { %v620_v37 = vpop.f32.mrf.mxu1  ;;  %v718_v38 = vpop.eup %717  ;;  %v643_v39 = vmul.f32 0.25, %v636_v33  ;;  %v488_v40 = vadd.f32 %v716_v34, %v339_v32  ;;  %v472_v42 = vadd.f32 %v1239_v35, %v471_v36  ;;  %743 = vtanh.f32 %v328_v28 }
 0x132   :  { %v621_v43 = vadd.f32 %v1239_v35, %v620_v37  ;;  %v720_v44 = vpop.eup %719  ;;  %v473_v41 = vpop.f32.mrf.mxu0 }
 0x133   :  { %v622_v45 = vpop.f32.mrf.mxu1  ;;  %v722_v46 = vpop.eup %721  ;;  %651 = vst.msk [vmem:[%s1305_s6] sm:$0xff] %vm650_vm2, %v643_v39  ;;  %v637_v48 = vadd.f32 %v718_v38, %v488_v40  ;;  %745 = vtanh.f32 %v472_v42  ;;  %v341_v61 = vadd.f32 %v720_v44, %v714_v31 }
 0x134   :  { %v724_v49 = vpop.eup %723  ;;  %747 = vtanh.f32 %v621_v43  ;;  %v476_v50 = vpop.f32.mrf.mxu0 }
 0x135   :  { %v625_v51 = vpop.f32.mrf.mxu1  ;;  %v726_v52 = vpop.eup %725  ;;  %v644_v53 = vmul.f32 0.25, %v637_v48  ;;  %v489_v54 = vadd.f32 %v724_v49, %v340_v47  ;;  %v477_v55 = vadd.f32 %v1239_v35, %v476_v50 }
 0x136   :  { %v626_v56 = vadd.f32 %v1239_v35, %v625_v51  ;;  %v728_v57 = vpop.eup %727  ;;  %v478_v58 = vpop.f32.mrf.mxu0 }
 0x137   :  { %v627_v59 = vpop.f32.mrf.mxu1  ;;  %v730_v60 = vpop.eup %729  ;;  %652 = vst.msk [vmem:[%s1305_s6 + $0x8] sm:$0xff] %vm650_vm2, %v644_v53  ;;  %v638_v62 = vadd.f32 %v726_v52, %v489_v54  ;;  %749 = vtanh.f32 %v477_v55  ;;  %v342_v35 = vadd.f32 %v728_v57, %v722_v46 }
 0x138   :  { %v732_v63 = vpop.eup %731  ;;  %751 = vtanh.f32 %v626_v56 }
 0x139   :  { %v734_v0 = vpop.eup %733  ;;  %v645_v1 = vmul.f32 0.25, %v638_v62  ;;  %v490_v2 = vadd.f32 %v732_v63, %v341_v61 }
 0x13a   :  { %v736_v3 = vpop.eup %735 }
 0x13b   :  { %v738_v4 = vpop.eup %737  ;;  %653 = vst.msk [vmem:[%s1305_s6 + $0x10] sm:$0xff] %vm650_vm2, %v645_v1  ;;  %v639_v5 = vadd.f32 %v734_v0, %v490_v2  ;;  %v343_v11 = vadd.f32 %v736_v3, %v730_v60 }
 0x13c   :  { %v740_v6 = vpop.eup %739 }
 0x13d   :  { %v742_v7 = vpop.eup %741  ;;  %v646_v8 = vmul.f32 0.25, %v639_v5  ;;  %v491_v9 = vadd.f32 %v740_v6, %v342_v35 }
 0x13e   :  { %v744_v10 = vpop.eup %743 }
 0x13f   :  { %654 = vst.msk [vmem:[%s1305_s6 + $0x18] sm:$0xff] %vm650_vm2, %v646_v8  ;;  %v640_v12 = vadd.f32 %v742_v7, %v491_v9  ;;  %v344_v17 = vadd.f32 %v744_v10, %v738_v4 }
 0x140   :  { %v746_v13 = vpop.eup %745 }
 0x141   :  { %v748_v14 = vpop.eup %747  ;;  %v647_v15 = vmul.f32 0.25, %v640_v12  ;;  %v492_v16 = vadd.f32 %v746_v13, %v343_v11 }
 0x143   :  { %655 = vst.msk [vmem:[%s1305_s6 + $0x20] sm:$0xff] %vm650_vm2, %v647_v15  ;;  %v641_v18 = vadd.f32 %v748_v14, %v492_v16 }
 0x144   :  { %v750_v19 = vpop.eup %749 }
 0x145   :  { %v752_v20 = vpop.eup %751  ;;  %v648_v21 = vmul.f32 0.25, %v641_v18  ;;  %v493_v22 = vadd.f32 %v750_v19, %v344_v17 }
 0x147   :  { %656 = vst.msk [vmem:[%s1305_s6 + $0x28] sm:$0xff] %vm650_vm2, %v648_v21  ;;  %v642_v23 = vadd.f32 %v752_v20, %v493_v22 }
 0x149   :  { %v649_v24 = vmul.f32 0.25, %v642_v23 }
 0x14b   :  { %658 = vst.msk [vmem:[%s1305_s6 + $0x30] sm:$0x3] %vm657_vm3, %v649_v24 }

// kernel: _lambda_.5
= control target key start
LH: loop header
LB: loop body
LE: loop exit
PB: predicated region body
PF: predicated region fallthrough
CT: control target
= control target key end

     0   :  { %v319_v3 = vmov 0.0   ;;  %v320_v23 = vmov 1983009808   ;;  %v78_v25 = vlaneseq  ;;  %s519_s0 = inlined_call_operand.vmem [shape: f32[2,400], index: 0, kind: input, shape index: {}]   ;;  %s520_s1 = inlined_call_operand.vmem [shape: f32[400,120], index: 1, kind: input, shape index: {}]   ;;  %s521_s2 = inlined_call_operand.vmem [shape: f32[1,120], index: 2, kind: input, shape index: {}]   ;;  %s522_s3 = inlined_call_operand.hbm [shape: f32[2,120], index: 3, kind: output, shape index: {}]  }
   0x1   :  { %v47_v0 = vld [vmem:[%s520_s1 + $0xf8] sm:$0xff]  ;;  %167 = vmatprep.subr.mxu1 %v319_v3  ;;  %v46_v4 = vld [vmem:[%s520_s1 + $0xf0] sm:$0xff]  ;;  %v45_v7 = vld [vmem:[%s520_s1 + $0xe8] sm:$0xff]  ;;  %v76_v24 = vunpack.c.l.s4 %v320_v23 }
   0x2   :  { %v31_v1 = vld [vmem:[%s520_s1 + $0x78] sm:$0xff]  ;;  %256 = vmatprep.subr.mxu0 %v47_v0  ;;  %v30_v5 = vld [vmem:[%s520_s1 + $0x70] sm:$0xff]  ;;  %v29_v8 = vld [vmem:[%s520_s1 + $0x68] sm:$0xff]  ;;  %v79_v33 = vshrl.u32 %v78_v25, 7 }
   0x3   :  { %v63_v2 = vld [vmem:[%s520_s1 + $0x178] sm:$0xff]  ;;  %v62_v6 = vld [vmem:[%s520_s1 + $0x170] sm:$0xff]  ;;  %257 = vmatpush3.msra.mxu0 %v31_v1  ;;  %v61_v9 = vld [vmem:[%s520_s1 + $0x168] sm:$0xff]  ;;  %v77_v32 = vunpack.c.0.s8 %v76_v24 }
   0x4   :  { %168 = vmatpush1.msra.mxu1 %v63_v2  ;;  %258 = vmatprep.subr.mxu0 %v46_v4  ;;  %v44_v10 = vld [vmem:[%s520_s1 + $0xe0] sm:$0xff]  ;;  %v43_v13 = vld [vmem:[%s520_s1 + $0xd8] sm:$0xff]  ;;  %v42_v16 = vld [vmem:[%s520_s1 + $0xd0] sm:$0xff] }
   0x5   :  { %169 = vmatprep.subr.mxu1 %v319_v3  ;;  %259 = vmatpush3.msra.mxu0 %v30_v5  ;;  %v28_v11 = vld [vmem:[%s520_s1 + $0x60] sm:$0xff]  ;;  %v27_v14 = vld [vmem:[%s520_s1 + $0x58] sm:$0xff]  ;;  %v26_v17 = vld [vmem:[%s520_s1 + $0x50] sm:$0xff] }
   0x6   :  { %170 = vmatpush1.msra.mxu1 %v62_v6  ;;  %260 = vmatprep.subr.mxu0 %v45_v7  ;;  %v60_v12 = vld [vmem:[%s520_s1 + $0x160] sm:$0xff]  ;;  %v59_v15 = vld [vmem:[%s520_s1 + $0x158] sm:$0xff]  ;;  %v58_v18 = vld [vmem:[%s520_s1 + $0x150] sm:$0xff] }
   0x7   :  { %171 = vmatprep.subr.mxu1 %v319_v3  ;;  %261 = vmatpush3.msra.mxu0 %v29_v8  ;;  %v41_v19 = vld [vmem:[%s520_s1 + $0xc8] sm:$0xff]  ;;  %v40_v22 = vld [vmem:[%s520_s1 + $0xc0] sm:$0xff]  ;;  %v39_v28 = vld [vmem:[%s520_s1 + $0xb8] sm:$0xff] }
   0x8   :  { %172 = vmatpush1.msra.mxu1 %v61_v9  ;;  %262 = vmatprep.subr.mxu0 %v44_v10  ;;  %v25_v20 = vld [vmem:[%s520_s1 + $0x48] sm:$0xff]  ;;  %v24_v26 = vld [vmem:[%s520_s1 + $0x40] sm:$0xff]  ;;  %v23_v29 = vld [vmem:[%s520_s1 + $0x38] sm:$0xff] }
   0x9   :  { %173 = vmatprep.subr.mxu1 %v319_v3  ;;  %263 = vmatpush3.msra.mxu0 %v28_v11  ;;  %v57_v21 = vld [vmem:[%s520_s1 + $0x148] sm:$0xff]  ;;  %v56_v27 = vld [vmem:[%s520_s1 + $0x140] sm:$0xff]  ;;  %v55_v30 = vld [vmem:[%s520_s1 + $0x138] sm:$0xff] }
   0xa   :  { %174 = vmatpush1.msra.mxu1 %v60_v12  ;;  %264 = vmatprep.subr.mxu0 %v43_v13  ;;  %v38_v31 = vld [vmem:[%s520_s1 + $0xb0] sm:$0xff] }
   0xb   :  { %175 = vmatprep.subr.mxu1 %v319_v3  ;;  %265 = vmatpush3.msra.mxu0 %v27_v14  ;;  %v22_v34 = vld [vmem:[%s520_s1 + $0x30] sm:$0xff] }
   0xc   :  { %176 = vmatpush1.msra.mxu1 %v59_v15  ;;  %266 = vmatprep.subr.mxu0 %v42_v16  ;;  %v54_v35 = vld [vmem:[%s520_s1 + $0x130] sm:$0xff] }
   0xd   :  { %177 = vmatprep.subr.mxu1 %v319_v3  ;;  %267 = vmatpush3.msra.mxu0 %v26_v17 }
   0xe   :  { %178 = vmatpush1.msra.mxu1 %v58_v18  ;;  %268 = vmatprep.subr.mxu0 %v41_v19 }
   0xf   :  { %179 = vmatprep.subr.mxu1 %v319_v3  ;;  %269 = vmatpush3.msra.mxu0 %v25_v20 }
  0x10   :  { %180 = vmatpush1.msra.mxu1 %v57_v21  ;;  %270 = vmatprep.subr.mxu0 %v40_v22 }
  0x11   :  { %181 = vmatprep.subr.mxu1 %v319_v3  ;;  %271 = vmatpush3.msra.mxu0 %v24_v26 }
  0x12   :  { %182 = vmatpush1.msra.mxu1 %v56_v27  ;;  %272 = vmatprep.subr.mxu0 %v39_v28 }
  0x13   :  { %183 = vmatprep.subr.mxu1 %v319_v3 }
  0x14   :  { %8 = vsyncpa [#allocation3], 0  ;;  %273 = vmatpush3.msra.mxu0 %v23_v29  ;;  %184 = vmatpush1.msra.mxu1 %v55_v30  ;;  %v37_v36 = vld [vmem:[%s520_s1 + $0xa8] sm:$0xff]  ;;  %v36_v39 = vld [vmem:[%s520_s1 + $0xa0] sm:$0xff]  ;;  %v80_v40 = vsub.s32 %v77_v32, %v79_v33  ;;  %vm94_vm0 = vcmask 130048   ;;  %s321_s7 = smov [#allocation2]  }
  0x15   :  { %274 = vmatprep.subr.mxu0 %v38_v31  ;;  %185 = vmatprep.subr.mxu1 %v319_v3  ;;  %v21_v37 = vld [vmem:[%s520_s1 + $0x28] sm:$0xff]  ;;  %v20_v41 = vld [vmem:[%s520_s1 + $0x20] sm:$0xff]  ;;  %v35_v44 = vld [vmem:[%s520_s1 + $0x98] sm:$0xff]  ;;  %vm238_vm1 = vcmask 975872  }
  0x16   :  { %v53_v38 = vld [vmem:[%s520_s1 + $0x128] sm:$0xff]  ;;  %275 = vmatpush3.msra.mxu0 %v22_v34  ;;  %186 = vmatpush1.msra.mxu1 %v54_v35  ;;  %v52_v42 = vld [vmem:[%s520_s1 + $0x120] sm:$0xff]  ;;  %v19_v46 = vld [vmem:[%s520_s1 + $0x18] sm:$0xff] }
  0x17   :  { %276 = vmatprep.subr.mxu0 %v37_v36  ;;  %187 = vmatprep.subr.mxu1 %v319_v3  ;;  %v15_v43 = vld [vmem:[%s519_s0] sm:$0xff]  ;;  %v51_v47 = vld [vmem:[%s520_s1 + $0x118] sm:$0xff]  ;;  %v34_v48 = vld [vmem:[%s520_s1 + $0x90] sm:$0xff] }
  0x18   :  { %277 = vmatpush3.msra.mxu0 %v21_v37  ;;  %188 = vmatpush1.msra.mxu1 %v53_v38  ;;  %v74_v45 = vcombine.high %v15_v43, %v15_v43  ;;  %v81_v49 = vrot.slane %v15_v43, %v80_v40  ;;  %v18_v50 = vld [vmem:[%s520_s1 + $0x10] sm:$0xff]  ;;  %v33_v52 = vld [vmem:[%s520_s1 + $0x88] sm:$0xff]  ;;  %v32_v56 = vld [vmem:[%s520_s1 + $0x80] sm:$0xff] }
  0x19   :  { %278 = vmatprep.subr.mxu0 %v36_v39  ;;  %189 = vmatprep.subr.mxu1 %v319_v3  ;;  %v50_v51 = vld [vmem:[%s520_s1 + $0x110] sm:$0xff]  ;;  %v17_v54 = vld [vmem:[%s520_s1 + $0x8] sm:$0xff]  ;;  %v16_v58 = vld [vmem:[%s520_s1] sm:$0xff] }
  0x1a   :  { %279 = vmatpush3.msra.mxu0 %v20_v41  ;;  %190 = vmatpush1.msra.mxu1 %v52_v42  ;;  %v88_v53 = vrot.slane %v74_v45, %v80_v40  ;;  %v49_v55 = vld [vmem:[%s520_s1 + $0x108] sm:$0xff]  ;;  %v89_v57 = vcombine.high %v81_v49, %v81_v49  ;;  %v48_v59 = vld [vmem:[%s520_s1 + $0x100] sm:$0xff] }
  0x1b   :  { %280 = vmatprep.subr.mxu0 %v35_v44  ;;  %191 = vmatprep.subr.mxu1 %v319_v3  ;;  %v65_v61 = vld [vmem:[%s520_s1 + $0x188] sm:$0xff]  ;;  %v64_v62 = vld [vmem:[%s520_s1 + $0x180] sm:$0xff]  ;;  %s246_s1 = sshll.u32 %s321_s7, 4  ;;  %s247_s1 = int_to_ptr.vmem [resolvable:$true] %s246_s1 }
  0x1c   :  { %281 = vmatpush3.msra.mxu0 %v19_v46  ;;  %192 = vmatpush1.msra.mxu1 %v51_v47  ;;  %v90_v60 = vcombine.high %v88_v53, %v88_v53  ;;  %v254_v1 = vld [vmem:[%s521_s2] ss:$0 sm:$0xff]  ;;  %s297_s8 = scalar_lea.vmem %s247_s1, 32  ;;  %p302_p1 = scmp.lt.s32.totalorder %s247_s1, %s247_s1 }
  0x1d   :  { %282 = vmatprep.subr.mxu0 %v34_v48  ;;  %193 = vmatprep.subr.mxu1 %v319_v3  ;;  %p298_p0 = scmp.ne.s32.totalorder %s247_s1, %s297_s8  ;;  %p303_p2 = scmp.lt.s32.totalorder %s297_s8, %s297_s8 }
  0x1e   :  { %283 = vmatpush3.msra.mxu0 %v18_v50  ;;  %194 = vmatpush1.msra.mxu1 %v50_v51 }
  0x1f   :  { %284 = vmatprep.subr.mxu0 %v33_v52  ;;  %195 = vmatprep.subr.mxu1 %v319_v3  ;;  %p304_p3 = por %p303_p2, %p302_p1 }
  0x20   :  { %285 = vmatpush3.msra.mxu0 %v17_v54  ;;  %196 = vmatpush1.msra.mxu1 %v49_v55 }
  0x21   :  { %286 = vmatprep.subr.mxu0 %v32_v56  ;;  %197 = vmatprep.subr.mxu1 %v319_v3  ;;  %p305_p4 = pnand %p304_p3, %p298_p0 }
  0x22   :  { %287 = vmatpush3.msra.mxu0 %v16_v58  ;;  %161 = vmatprep.mubr.f32.mxu0 %v89_v57 }
  0x23   :  { %198 = vmatpush1.msra.mxu1 %v48_v59  ;;  %162 = vmatmul.mubr.f32.vlgmr.msra.gmra.mxu0 %v81_v49 }
  0x24   :  { %227 = vmatprep.subr.mxu1 %v319_v3  ;;  %255 = vmatprep.mubr.msk.f32.mxu1 %vm94_vm0, %v90_v60 }
  0x25   :  { %228 = vmatpush2.msra.mxu1 %v65_v61 }
  0x26   :  { %229 = vmatprep.subr.mxu1 %v319_v3 }
  0x27   :  { %230 = vmatpush2.msra.mxu1 %v64_v62 }
  0x28   :  { %232 = vmatmul.mubr.f32.vlgmr.msra.gmra.mxu1 %v88_v53 }
  0xe3   :  { %v288_v63 = vpop.f32.mrf.mxu0 }
  0xe5   :  { %v289_v0 = vpop.f32.mrf.mxu0 }
  0xe6   :  { %v290_v2 = vadd.f32 %v289_v0, %v288_v63 }
  0xe8   :  { %v164_v4 = vadd.f32 %v290_v2, %v254_v1  ;;  %v233_v5 = vpop.f32.mrf.mxu1 }
  0xea   :  { %v234_v6 = vadd.f32 %v233_v5, %v164_v4  ;;  %v235_v7 = vpop.f32.mrf.mxu1 }
  0xec   :  { %295 = vtanh.f32 %v234_v6 }
  0xf9   :  { %v296_v8 = vpop.eup %295 }
  0xfa   :  { %239 = vst.msk [vmem:[#allocation2] sm:$0x3] %vm238_vm1, %v296_v8 }
  0xfb   :  { %308 = shalt.err (!%p305_p4)
}
  0xfc   :  { %249 = dma.vmem_to_hbm [thread:$0]  %s247_s1, 32, %s522_s3, [#allocation3]  }
  0xfd   :  { %317 = dma.done.wait [#allocation3], 32  }
  0xfe   :  { %318 = vsyncadd [#allocation3], 4294967264 }
  0xff   :  { %253 = vsyncpa [#allocation3], 1 }

</bundles_post_ra>
